<compile_context>
chip_gen: v5e
topology: v5e:2x2
jax: 0.10.0
libtpu: 0.0.40
codegen_flags: <defaults>
</compile_context>

<pallas_src>
import jax
import jax.numpy as jnp
from jax import lax
from jax.experimental import pallas as pl
from jax.experimental.pallas import tpu as pltpu


# ----------------------------------------------------------------------------
# helpers: generation-aware VMEM budgeting / batch tiling
# ----------------------------------------------------------------------------
def _round_up(n, m):
    return ((n + m - 1) // m) * m


def _vmem_caps():
    """Returns (vmem_limit_bytes to request, planning budget for the tiler)."""
    cap = 64 * 1024 * 1024                       # conservative fallback (v7x-sized)
    try:
        info = pltpu.get_tpu_info()
        cap = int(getattr(info, "vmem_capacity_bytes", cap))
    except Exception:
        pass
    limit = min(int(cap * 0.55), 100 * 1024 * 1024)   # scoped VMEM asked of Mosaic
    budget = int(limit * 0.7)                         # what the tile chooser may plan
    return limit, budget


def _pick_batch_tile(B, rp, kk, cout, budget):
    """Largest divisor of B whose resident VMEM footprint (double-buffered bf16
    input + output blocks, f32 accumulator, weights) fits the budget, capped at
    B//2 so every conv layer gets >= 2 parallel grid steps when B >= 2 (v7x
    dual-TensorCore).  bt=1 always fits, so awkward batch sizes never fall back
    to an un-fittable whole-batch block."""
    def resident(bt):
        x_blk = bt * 4 * rp * kk * 2          # bf16 input block
        o_blk = bt * rp * cout * 2            # bf16 output block
        acc = bt * 4 * rp * cout * 4          # f32 pre-max accumulator (in-kernel)
        wgt = (kk * cout * 2 + cout * 4) * 2  # weights + bias (double-buffered)
        return 2 * x_blk + 2 * o_blk + acc + wgt

    cap = max(B // 2, 1)
    best = 1
    for d in range(1, cap + 1):
        if B % d == 0 and resident(d) <= budget:
            best = d
    return best


# ----------------------------------------------------------------------------
# Kernel 1: fused conv5x5 (im2col matmul) + bias + ReLU + 2x2 max-pool.
#
#   x_ref : (bt, 4, rows_pad, K*K*Cin) bf16 -- axis 1 enumerates the pool
#                                              candidates (dy, dx)
#   w_ref : (K*K*Cin, Cout) bf16
#   b_ref : (1, 1, Cout)    f32
#   o_ref : (bt, rows_pad, Cout) bf16 -- pooled, post-ReLU activation
#
# relu(max_c(conv_c) + bias) == maxpool2x2(relu(conv + bias)): the bias is
# shared by the four candidates and (+bias, relu) are monotone, so the pool is
# an elementwise max over the candidate matmuls.  All four candidates go
# through ONE weight-stationary MXU matmul (rows_pad % 16 == 0 makes both
# reshapes tile-aligned no-ops).
# ----------------------------------------------------------------------------
def conv_pool_kernel(x_ref, w_ref, b_ref, o_ref):
    bt, cands, rp, kk = x_ref.shape
    cout = o_ref.shape[-1]
    lhs = x_ref[...].reshape(bt * cands * rp, kk)
    acc = jnp.dot(lhs, w_ref[...], preferred_element_type=jnp.float32)
    acc = acc.reshape(bt, cands, rp, cout)
    pooled = jnp.max(acc, axis=1)                         # (bt, rp, cout)
    o_ref[...] = jnp.maximum(pooled + b_ref[...], 0.0).astype(o_ref.dtype)


def _im2col_pool(x_nhwc, K, rows_pad):
    """(B,H,W,Cin) -> (B, 4, rows_pad, K*K*Cin) bf16 pool-candidate im2col.

    Axis 1 enumerates the 2x2 pool candidates (dy, dx); axis 2 is (ho, wo)
    flattened and zero-padded to rows_pad.  Pure data movement (pad + strided
    slices + stack): one XLA fusion outside the kernel.  Contraction order is
    (kh, kw, cin), matching w.reshape(K*K*Cin, Cout) for HWIO weights."""
    B, H, W, Cin = x_nhwc.shape
    pad = (K - 1) // 2
    Ho, Wo = H // 2, W // 2                       # floor pooling (torch MaxPool2d(2))
    xp = jnp.pad(x_nhwc.astype(jnp.bfloat16),     # cast is a no-op after conv1
                 ((0, 0), (pad, pad), (pad, pad), (0, 0)))
    cands = []
    for dy in range(2):
        for dx in range(2):
            taps = []
            for kh in range(K):
                for kw in range(K):
                    h0, w0 = dy + kh, dx + kw
                    taps.append(xp[:, h0:h0 + 2 * Ho - 1:2,
                                   w0:w0 + 2 * Wo - 1:2, :])     # (B,Ho,Wo,Cin)
            t = jnp.stack(taps, axis=3)                          # (B,Ho,Wo,KK,Cin)
            cands.append(t.reshape(B, Ho * Wo, K * K * Cin))
    xc = jnp.stack(cands, axis=1)                                # (B,4,rows,KK*Cin)
    rows = Ho * Wo
    if rows_pad > rows:
        xc = jnp.pad(xc, ((0, 0), (0, 0), (0, rows_pad - rows), (0, 0)))
    return xc


def conv5x5_relu_pool(x_nhwc, w, b):
    """Fused conv(5x5, SAME) + ReLU + maxpool(2): (B,H,W,Cin) -> (B,Ho,Wo,Cout)."""
    B, H, W, _ = x_nhwc.shape
    K, _, Cin, Cout = w.shape
    kk = K * K * Cin
    Ho, Wo = H // 2, W // 2
    rows = Ho * Wo
    rp = _round_up(rows, 16)     # 16: tile-aligned reshapes for bf16 LHS / f32 acc
    xcol = _im2col_pool(x_nhwc, K, rp)                   # (B, 4, rp, kk) bf16
    vmem_limit, budget = _vmem_caps()
    bt = _pick_batch_tile(B, rp, kk, Cout, budget)
    out = pl.pallas_call(
        conv_pool_kernel,
        out_shape=jax.ShapeDtypeStruct((B, rp, Cout), jnp.bfloat16),
        grid=(B // bt,),
        in_specs=[
            pl.BlockSpec((bt, 4, rp, kk), lambda i: (i, 0, 0, 0)),
            pl.BlockSpec((kk, Cout), lambda i: (0, 0)),
            pl.BlockSpec((1, 1, Cout), lambda i: (0, 0, 0)),
        ],
        out_specs=pl.BlockSpec((bt, rp, Cout), lambda i: (i, 0, 0)),
        compiler_params=pltpu.CompilerParams(
            dimension_semantics=("parallel",),    # v7x: shard batch tiles on both TCs
            vmem_limit_bytes=vmem_limit),
    )(xcol,
      w.reshape(kk, Cout).astype(jnp.bfloat16),
      b.reshape(1, 1, Cout).astype(jnp.float32))
    return out[:, :rows, :].reshape(B, Ho, Wo, Cout)


# ----------------------------------------------------------------------------
# Kernel 2: fc1 -> ReLU -> fc2 (+ optionally fused weighted softmax CE).
# fc1 runs with bf16 inputs / f32 accumulation; fc2 (logit-forming) stays f32.
# mean reduction == dot(1/B, per-sample CE); weighted == dot(sw, per-sample CE)
# (matches torch.dot(sample_weight, F.cross_entropy(..., reduction='none'))).
# ----------------------------------------------------------------------------
def mlp_logits_kernel(x_ref, w1_ref, b1_ref, w2_ref, b2_ref, logits_ref):
    h = jnp.dot(x_ref[...], w1_ref[...], preferred_element_type=jnp.float32) + b1_ref[...]
    h = jnp.maximum(h, 0.0)
    logits_ref[...] = (jnp.dot(h, w2_ref[...], preferred_element_type=jnp.float32)
                       + b2_ref[...]).astype(logits_ref.dtype)


def mlp_ce_kernel(x_ref, w1_ref, b1_ref, w2_ref, b2_ref, y_ref, sw_ref,
                  logits_ref, loss_ref):
    h = jnp.dot(x_ref[...], w1_ref[...], preferred_element_type=jnp.float32) + b1_ref[...]
    h = jnp.maximum(h, 0.0)
    lg = jnp.dot(h, w2_ref[...], preferred_element_type=jnp.float32) + b2_ref[...]
    logits_ref[...] = lg.astype(logits_ref.dtype)
    m = jnp.max(lg, axis=-1, keepdims=True)
    lse = m + jnp.log(jnp.sum(jnp.exp(lg - m), axis=-1, keepdims=True))
    cls = lax.broadcasted_iota(jnp.int32, lg.shape, 1)
    picked = jnp.sum(jnp.where(cls == y_ref[...], lg, 0.0), axis=-1, keepdims=True)
    ce = lse - picked                                              # (B, 1)
    loss_ref[...] = jnp.sum(sw_ref[...] * ce, keepdims=True)       # (1, 1)


def mlp_head(feat, w1, b1, w2, b2, y=None, sw=None):
    B, Din = feat.shape
    Dh = w1.shape[1]
    C = w2.shape[1]
    args = [feat.astype(jnp.bfloat16),
            w1.astype(jnp.bfloat16),
            b1.reshape(1, Dh).astype(jnp.float32),
            w2.astype(jnp.float32),
            b2.reshape(1, C).astype(jnp.float32)]
    base_specs = [
        pl.BlockSpec((B, Din), lambda i: (0, 0)),
        pl.BlockSpec((Din, Dh), lambda i: (0, 0)),
        pl.BlockSpec((1, Dh), lambda i: (0, 0)),
        pl.BlockSpec((Dh, C), lambda i: (0, 0)),
        pl.BlockSpec((1, C), lambda i: (0, 0)),
    ]
    if y is None:
        logits = pl.pallas_call(
            mlp_logits_kernel,
            out_shape=jax.ShapeDtypeStruct((B, C), jnp.float32),
            grid=(1,),
            in_specs=base_specs,
            out_specs=pl.BlockSpec((B, C), lambda i: (0, 0)),
        )(*args)
        return logits, None
    logits, loss = pl.pallas_call(
        mlp_ce_kernel,
        out_shape=(jax.ShapeDtypeStruct((B, C), jnp.float32),
                   jax.ShapeDtypeStruct((1, 1), jnp.float32)),
        grid=(1,),
        in_specs=base_specs + [
            pl.BlockSpec((B, 1), lambda i: (0, 0)),
            pl.BlockSpec((B, 1), lambda i: (0, 0)),
        ],
        out_specs=(pl.BlockSpec((B, C), lambda i: (0, 0)),
                   pl.BlockSpec((1, 1), lambda i: (0, 0))),
    )(*args, y.reshape(B, 1).astype(jnp.int32), sw.reshape(B, 1).astype(jnp.float32))
    return logits, loss[0, 0]


# ----------------------------------------------------------------------------
# Full forward (mirrors ConvNet.forward)
# ----------------------------------------------------------------------------
def convnet_forward(params, x_nchw, y=None, sample_weight=None):
    x = jnp.transpose(x_nchw, (0, 2, 3, 1))                         # NCHW -> NHWC
    B = x.shape[0]

    x = conv5x5_relu_pool(x, params['conv1_w'], params['conv1_b'])  # (B,14,14,32)
    x = conv5x5_relu_pool(x, params['conv2_w'], params['conv2_b'])  # (B, 7, 7,64)
    x = conv5x5_relu_pool(x, params['conv3_w'], params['conv3_b'])  # (B, 3, 3,64)

    feat = x.reshape(B, -1)   # NHWC flatten; fc1_w is stored in this layout.

    if y is None:
        logits, loss = mlp_head(feat, params['fc1_w'], params['fc1_b'],
                                params['fc2_w'], params['fc2_b'])
        return loss, logits
    if sample_weight is None:
        sw = jnp.full((B,), 1.0 / B, jnp.float32)                   # mean reduction
    else:
        sw = sample_weight.astype(jnp.float32)
    logits, loss = mlp_head(feat, params['fc1_w'], params['fc1_b'],
                            params['fc2_w'], params['fc2_b'], y=y, sw=sw)
    return loss, logits


# ----------------------------------------------------------------------------
# Deterministic parameter init (shapes from ConvNet.__init__; hidden_dim=512)
# ----------------------------------------------------------------------------
def init_params(key, hidden_dim=512, n_classes=10):
    ks = jax.random.split(key, 10)

    def w(k, shape, fan_in):
        return jax.random.normal(k, shape, jnp.float32) / jnp.sqrt(float(fan_in))

    return {
        'conv1_w': w(ks[0], (5, 5, 1, 32), 5 * 5 * 1),     # HWIO
        'conv1_b': w(ks[1], (32,), 5 * 5 * 1),
        'conv2_w': w(ks[2], (5, 5, 32, 64), 5 * 5 * 32),
        'conv2_b': w(ks[3], (64,), 5 * 5 * 32),
        'conv3_w': w(ks[4], (5, 5, 64, 64), 5 * 5 * 64),
        'conv3_b': w(ks[5], (64,), 5 * 5 * 64),
        # fc1_w stored in NHWC-flatten layout (see convnet_forward)
        'fc1_w': w(ks[6], (64 * 3 * 3, hidden_dim), 64 * 3 * 3),
        'fc1_b': w(ks[7], (hidden_dim,), 64 * 3 * 3),
        'fc2_w': w(ks[8], (hidden_dim, n_classes), hidden_dim),
        'fc2_b': w(ks[9], (n_classes,), hidden_dim),
    }


# ----------------------------------------------------------------------------
# Pure-JAX f32 reference for a correctness check
# ----------------------------------------------------------------------------
def reference_forward(params, x_nchw, y, sample_weight=None):
    x = jnp.transpose(x_nchw, (0, 2, 3, 1))

    def conv(x, w, b):
        o = lax.conv_general_dilated(x, w, (1, 1), 'SAME',
                                     dimension_numbers=('NHWC', 'HWIO', 'NHWC'),
                                     precision=lax.Precision.HIGHEST)
        return jnp.maximum(o + b, 0.0)

    def pool(x):
        return lax.reduce_window(x, -jnp.inf, lax.max, (1, 2, 2, 1), (1, 2, 2, 1), 'VALID')

    x = pool(conv(x, params['conv1_w'], params['conv1_b']))
    x = pool(conv(x, params['conv2_w'], params['conv2_b']))
    x = pool(conv(x, params['conv3_w'], params['conv3_b']))
    B = x.shape[0]
    feat = x.reshape(B, -1)                                        # NHWC flatten
    h = jnp.maximum(feat @ params['fc1_w'] + params['fc1_b'], 0.0)
    logits = h @ params['fc2_w'] + params['fc2_b']
    logp = jax.nn.log_softmax(logits, axis=-1)
    ce = -jnp.take_along_axis(logp, y[:, None], axis=-1)[:, 0]
    loss = jnp.mean(ce) if sample_weight is None else jnp.dot(sample_weight, ce)
    return loss, logits


if __name__ == "__main__":
    key = jax.random.PRNGKey(0)
    kx, ky, kp = jax.random.split(key, 3)
    params = init_params(kp)

    # MNIST-like input implied by fc1 = Linear(64*3*3, ...): 28 -> 14 -> 7 -> 3
    x = jax.random.normal(kx, (2, 1, 28, 28), jnp.float32)   # NCHW, like PyTorch
    y = jax.random.randint(ky, (2,), 0, 10, jnp.int32)
    sw = jnp.array([0.25, 0.75], jnp.float32)

    fwd = jax.jit(lambda x, y: convnet_forward(params, x, y))
    fwd_w = jax.jit(lambda x, y, sw: convnet_forward(params, x, y, sw))
    fwd_nl = jax.jit(lambda x: convnet_forward(params, x)[1])     # y=None path

    loss, logits = fwd(x, y)
    loss_w, _ = fwd_w(x, y, sw)
    logits_nl = fwd_nl(x)
    jax.block_until_ready((loss, logits, loss_w, logits_nl))

    ref_loss, ref_logits = reference_forward(params, x, y)
    ref_loss_w, _ = reference_forward(params, x, y, sw)

    # The conv/fc1 path runs with bf16 activations and MXU inputs (per the
    # perf review), so compare against the f32 reference with a relaxed
    # tolerance appropriate for three chained bf16 conv layers.
    assert logits.shape == (2, 10)
    assert jnp.allclose(logits, ref_logits, atol=1e-1, rtol=1e-1)
    assert jnp.allclose(logits_nl, ref_logits, atol=1e-1, rtol=1e-1)
    assert jnp.allclose(loss, ref_loss, atol=1e-1, rtol=1e-1)
    assert jnp.allclose(loss_w, ref_loss_w, atol=1e-1, rtol=1e-1)

    print("KERNEL_OK")
</pallas_src>

<mosaic_0001>
module attributes {stable_mosaic.version = 11 : i64} {
  func.func @conv_pool_kernel(%arg0: i32, %arg1: memref<1x4x208x25xbf16, #tpu.memory_space<vmem>>, %arg2: memref<25x32xbf16, #tpu.memory_space<vmem>>, %arg3: memref<1x1x32xf32, #tpu.memory_space<vmem>>, %arg4: memref<1x208x32xbf16, #tpu.memory_space<vmem>>) attributes {dimension_semantics = [#tpu.dimension_semantics<parallel>], iteration_bounds = array<i64: 2>, scalar_prefetch = 0 : i64, scratch_operands = 0 : i64, tpu.core_type = #tpu.core_type<tc>, window_params = [{transform_indices = @transform_0, window_bounds = array<i64: 1, 4, 208, 25>}, {pipeline_mode = #tpu.pipeline_mode<synchronous>, transform_indices = @transform_1, window_bounds = array<i64: 25, 32>}, {pipeline_mode = #tpu.pipeline_mode<synchronous>, transform_indices = @transform_2, window_bounds = array<i64: 1, 1, 32>}, {transform_indices = @transform_3, window_bounds = array<i64: 1, 208, 32>}]} {
    %c0 = arith.constant 0 : index
    %c0_0 = arith.constant 0 : index
    %c0_1 = arith.constant 0 : index
    %c0_2 = arith.constant 0 : index
    %0 = vector.load %arg1[%c0, %c0_0, %c0_1, %c0_2] : memref<1x4x208x25xbf16, #tpu.memory_space<vmem>>, vector<1x4x208x25xbf16>
    %1 = vector.shape_cast %0 : vector<1x4x208x25xbf16> to vector<832x25xbf16>
    %c0_3 = arith.constant 0 : index
    %c0_4 = arith.constant 0 : index
    %2 = vector.load %arg2[%c0_3, %c0_4] : memref<25x32xbf16, #tpu.memory_space<vmem>>, vector<25x32xbf16>
    %cst = arith.constant dense<0.000000e+00> : vector<832x32xf32>
    %3 = tpu.matmul %1, %2, %cst {dimension_numbers = #tpu.dot_dimension_numbers<[1], [0], [0], [1], [0, 0, 1, 1], [], []>} : vector<832x25xbf16>, vector<25x32xbf16>, vector<832x32xf32> -> vector<832x32xf32>
    %4 = vector.shape_cast %3 : vector<832x32xf32> to vector<1x4x208x32xf32>
    %cst_5 = arith.constant dense<0xFF800000> : vector<1x208x32xf32>
    %5 = vector.multi_reduction <maximumf>, %4, %cst_5 [1] : vector<1x4x208x32xf32> to vector<1x208x32xf32>
    %c0_6 = arith.constant 0 : index
    %c0_7 = arith.constant 0 : index
    %c0_8 = arith.constant 0 : index
    %6 = vector.load %arg3[%c0_6, %c0_7, %c0_8] : memref<1x1x32xf32, #tpu.memory_space<vmem>>, vector<1x1x32xf32>
    %7 = vector.broadcast %6 : vector<1x1x32xf32> to vector<1x208x32xf32>
    %8 = arith.addf %5, %7 : vector<1x208x32xf32>
    %cst_9 = arith.constant 0.000000e+00 : f32
    %9 = vector.broadcast %cst_9 : f32 to vector<1x208x32xf32>
    %10 = arith.maximumf %8, %9 : vector<1x208x32xf32>
    %11 = arith.truncf %10 : vector<1x208x32xf32> to vector<1x208x32xbf16>
    %c0_10 = arith.constant 0 : index
    %c0_11 = arith.constant 0 : index
    %c0_12 = arith.constant 0 : index
    %12 = vector.load %arg4[%c0_10, %c0_11, %c0_12] : memref<1x208x32xbf16, #tpu.memory_space<vmem>>, vector<1x208x32xbf16>
    tpu.vector_store %arg4[%c0_10, %c0_11, %c0_12], %11 {strides = array<i32>} : memref<1x208x32xbf16, #tpu.memory_space<vmem>>, vector<1x208x32xbf16>,
    return
  }
  func.func @transform_0(%arg0: i32) -> (i32, i32, i32, i32) {
    %c0_i32 = arith.constant 0 : i32
    %c0_i32_0 = arith.constant 0 : i32
    %c0_i32_1 = arith.constant 0 : i32
    %c0_i32_2 = arith.constant 0 : i32
    return %arg0, %c0_i32, %c0_i32_0, %c0_i32_1 : i32, i32, i32, i32
  }
  func.func @transform_1(%arg0: i32) -> (i32, i32) {
    %c0_i32 = arith.constant 0 : i32
    %c0_i32_0 = arith.constant 0 : i32
    %c0_i32_1 = arith.constant 0 : i32
    return %c0_i32, %c0_i32_0 : i32, i32
  }
  func.func @transform_2(%arg0: i32) -> (i32, i32, i32) {
    %c0_i32 = arith.constant 0 : i32
    %c0_i32_0 = arith.constant 0 : i32
    %c0_i32_1 = arith.constant 0 : i32
    %c0_i32_2 = arith.constant 0 : i32
    return %c0_i32, %c0_i32_0, %c0_i32_1 : i32, i32, i32
  }
  func.func @transform_3(%arg0: i32) -> (i32, i32, i32) {
    %c0_i32 = arith.constant 0 : i32
    %c0_i32_0 = arith.constant 0 : i32
    %c0_i32_1 = arith.constant 0 : i32
    return %arg0, %c0_i32, %c0_i32_0 : i32, i32, i32
  }
}

module attributes {stable_mosaic.version = 11 : i64} {
  func.func @conv_pool_kernel(%arg0: i32, %arg1: memref<1x4x64x800xbf16, #tpu.memory_space<vmem>>, %arg2: memref<800x64xbf16, #tpu.memory_space<vmem>>, %arg3: memref<1x1x64xf32, #tpu.memory_space<vmem>>, %arg4: memref<1x64x64xbf16, #tpu.memory_space<vmem>>) attributes {dimension_semantics = [#tpu.dimension_semantics<parallel>], iteration_bounds = array<i64: 2>, scalar_prefetch = 0 : i64, scratch_operands = 0 : i64, tpu.core_type = #tpu.core_type<tc>, window_params = [{transform_indices = @transform_0, window_bounds = array<i64: 1, 4, 64, 800>}, {pipeline_mode = #tpu.pipeline_mode<synchronous>, transform_indices = @transform_1, window_bounds = array<i64: 800, 64>}, {pipeline_mode = #tpu.pipeline_mode<synchronous>, transform_indices = @transform_2, window_bounds = array<i64: 1, 1, 64>}, {transform_indices = @transform_3, window_bounds = array<i64: 1, 64, 64>}]} {
    %c0 = arith.constant 0 : index
    %c0_0 = arith.constant 0 : index
    %c0_1 = arith.constant 0 : index
    %c0_2 = arith.constant 0 : index
    %0 = vector.load %arg1[%c0, %c0_0, %c0_1, %c0_2] : memref<1x4x64x800xbf16, #tpu.memory_space<vmem>>, vector<1x4x64x800xbf16>
    %1 = vector.shape_cast %0 : vector<1x4x64x800xbf16> to vector<256x800xbf16>
    %c0_3 = arith.constant 0 : index
    %c0_4 = arith.constant 0 : index
    %2 = vector.load %arg2[%c0_3, %c0_4] : memref<800x64xbf16, #tpu.memory_space<vmem>>, vector<800x64xbf16>
    %cst = arith.constant dense<0.000000e+00> : vector<256x64xf32>
    %3 = tpu.matmul %1, %2, %cst {dimension_numbers = #tpu.dot_dimension_numbers<[1], [0], [0], [1], [0, 0, 1, 1], [], []>} : vector<256x800xbf16>, vector<800x64xbf16>, vector<256x64xf32> -> vector<256x64xf32>
    %4 = vector.shape_cast %3 : vector<256x64xf32> to vector<1x4x64x64xf32>
    %cst_5 = arith.constant dense<0xFF800000> : vector<1x64x64xf32>
    %5 = vector.multi_reduction <maximumf>, %4, %cst_5 [1] : vector<1x4x64x64xf32> to vector<1x64x64xf32>
    %c0_6 = arith.constant 0 : index
    %c0_7 = arith.constant 0 : index
    %c0_8 = arith.constant 0 : index
    %6 = vector.load %arg3[%c0_6, %c0_7, %c0_8] : memref<1x1x64xf32, #tpu.memory_space<vmem>>, vector<1x1x64xf32>
    %7 = vector.broadcast %6 : vector<1x1x64xf32> to vector<1x64x64xf32>
    %8 = arith.addf %5, %7 : vector<1x64x64xf32>
    %cst_9 = arith.constant 0.000000e+00 : f32
    %9 = vector.broadcast %cst_9 : f32 to vector<1x64x64xf32>
    %10 = arith.maximumf %8, %9 : vector<1x64x64xf32>
    %11 = arith.truncf %10 : vector<1x64x64xf32> to vector<1x64x64xbf16>
    %c0_10 = arith.constant 0 : index
    %c0_11 = arith.constant 0 : index
    %c0_12 = arith.constant 0 : index
    %12 = vector.load %arg4[%c0_10, %c0_11, %c0_12] : memref<1x64x64xbf16, #tpu.memory_space<vmem>>, vector<1x64x64xbf16>
    tpu.vector_store %arg4[%c0_10, %c0_11, %c0_12], %11 {strides = array<i32>} : memref<1x64x64xbf16, #tpu.memory_space<vmem>>, vector<1x64x64xbf16>,
    return
  }
  func.func @transform_0(%arg0: i32) -> (i32, i32, i32, i32) {
    %c0_i32 = arith.constant 0 : i32
    %c0_i32_0 = arith.constant 0 : i32
    %c0_i32_1 = arith.constant 0 : i32
    %c0_i32_2 = arith.constant 0 : i32
    return %arg0, %c0_i32, %c0_i32_0, %c0_i32_1 : i32, i32, i32, i32
  }
  func.func @transform_1(%arg0: i32) -> (i32, i32) {
    %c0_i32 = arith.constant 0 : i32
    %c0_i32_0 = arith.constant 0 : i32
    %c0_i32_1 = arith.constant 0 : i32
    return %c0_i32, %c0_i32_0 : i32, i32
  }
  func.func @transform_2(%arg0: i32) -> (i32, i32, i32) {
    %c0_i32 = arith.constant 0 : i32
    %c0_i32_0 = arith.constant 0 : i32
    %c0_i32_1 = arith.constant 0 : i32
    %c0_i32_2 = arith.constant 0 : i32
    return %c0_i32, %c0_i32_0, %c0_i32_1 : i32, i32, i32
  }
  func.func @transform_3(%arg0: i32) -> (i32, i32, i32) {
    %c0_i32 = arith.constant 0 : i32
    %c0_i32_0 = arith.constant 0 : i32
    %c0_i32_1 = arith.constant 0 : i32
    return %arg0, %c0_i32, %c0_i32_0 : i32, i32, i32
  }
}

module attributes {stable_mosaic.version = 11 : i64} {
  func.func @conv_pool_kernel(%arg0: i32, %arg1: memref<1x4x16x1600xbf16, #tpu.memory_space<vmem>>, %arg2: memref<1600x64xbf16, #tpu.memory_space<vmem>>, %arg3: memref<1x1x64xf32, #tpu.memory_space<vmem>>, %arg4: memref<1x16x64xbf16, #tpu.memory_space<vmem>>) attributes {dimension_semantics = [#tpu.dimension_semantics<parallel>], iteration_bounds = array<i64: 2>, scalar_prefetch = 0 : i64, scratch_operands = 0 : i64, tpu.core_type = #tpu.core_type<tc>, window_params = [{transform_indices = @transform_0, window_bounds = array<i64: 1, 4, 16, 1600>}, {pipeline_mode = #tpu.pipeline_mode<synchronous>, transform_indices = @transform_1, window_bounds = array<i64: 1600, 64>}, {pipeline_mode = #tpu.pipeline_mode<synchronous>, transform_indices = @transform_2, window_bounds = array<i64: 1, 1, 64>}, {transform_indices = @transform_3, window_bounds = array<i64: 1, 16, 64>}]} {
    %c0 = arith.constant 0 : index
    %c0_0 = arith.constant 0 : index
    %c0_1 = arith.constant 0 : index
    %c0_2 = arith.constant 0 : index
    %0 = vector.load %arg1[%c0, %c0_0, %c0_1, %c0_2] : memref<1x4x16x1600xbf16, #tpu.memory_space<vmem>>, vector<1x4x16x1600xbf16>
    %1 = vector.shape_cast %0 : vector<1x4x16x1600xbf16> to vector<64x1600xbf16>
    %c0_3 = arith.constant 0 : index
    %c0_4 = arith.constant 0 : index
    %2 = vector.load %arg2[%c0_3, %c0_4] : memref<1600x64xbf16, #tpu.memory_space<vmem>>, vector<1600x64xbf16>
    %cst = arith.constant dense<0.000000e+00> : vector<64x64xf32>
    %3 = tpu.matmul %1, %2, %cst {dimension_numbers = #tpu.dot_dimension_numbers<[1], [0], [0], [1], [0, 0, 1, 1], [], []>} : vector<64x1600xbf16>, vector<1600x64xbf16>, vector<64x64xf32> -> vector<64x64xf32>
    %4 = vector.shape_cast %3 : vector<64x64xf32> to vector<1x4x16x64xf32>
    %cst_5 = arith.constant dense<0xFF800000> : vector<1x16x64xf32>
    %5 = vector.multi_reduction <maximumf>, %4, %cst_5 [1] : vector<1x4x16x64xf32> to vector<1x16x64xf32>
    %c0_6 = arith.constant 0 : index
    %c0_7 = arith.constant 0 : index
    %c0_8 = arith.constant 0 : index
    %6 = vector.load %arg3[%c0_6, %c0_7, %c0_8] : memref<1x1x64xf32, #tpu.memory_space<vmem>>, vector<1x1x64xf32>
    %7 = vector.broadcast %6 : vector<1x1x64xf32> to vector<1x16x64xf32>
    %8 = arith.addf %5, %7 : vector<1x16x64xf32>
    %cst_9 = arith.constant 0.000000e+00 : f32
    %9 = vector.broadcast %cst_9 : f32 to vector<1x16x64xf32>
    %10 = arith.maximumf %8, %9 : vector<1x16x64xf32>
    %11 = arith.truncf %10 : vector<1x16x64xf32> to vector<1x16x64xbf16>
    %c0_10 = arith.constant 0 : index
    %c0_11 = arith.constant 0 : index
    %c0_12 = arith.constant 0 : index
    %12 = vector.load %arg4[%c0_10, %c0_11, %c0_12] : memref<1x16x64xbf16, #tpu.memory_space<vmem>>, vector<1x16x64xbf16>
    tpu.vector_store %arg4[%c0_10, %c0_11, %c0_12], %11 {strides = array<i32>} : memref<1x16x64xbf16, #tpu.memory_space<vmem>>, vector<1x16x64xbf16>,
    return
  }
  func.func @transform_0(%arg0: i32) -> (i32, i32, i32, i32) {
    %c0_i32 = arith.constant 0 : i32
    %c0_i32_0 = arith.constant 0 : i32
    %c0_i32_1 = arith.constant 0 : i32
    %c0_i32_2 = arith.constant 0 : i32
    return %arg0, %c0_i32, %c0_i32_0, %c0_i32_1 : i32, i32, i32, i32
  }
  func.func @transform_1(%arg0: i32) -> (i32, i32) {
    %c0_i32 = arith.constant 0 : i32
    %c0_i32_0 = arith.constant 0 : i32
    %c0_i32_1 = arith.constant 0 : i32
    return %c0_i32, %c0_i32_0 : i32, i32
  }
  func.func @transform_2(%arg0: i32) -> (i32, i32, i32) {
    %c0_i32 = arith.constant 0 : i32
    %c0_i32_0 = arith.constant 0 : i32
    %c0_i32_1 = arith.constant 0 : i32
    %c0_i32_2 = arith.constant 0 : i32
    return %c0_i32, %c0_i32_0, %c0_i32_1 : i32, i32, i32
  }
  func.func @transform_3(%arg0: i32) -> (i32, i32, i32) {
    %c0_i32 = arith.constant 0 : i32
    %c0_i32_0 = arith.constant 0 : i32
    %c0_i32_1 = arith.constant 0 : i32
    return %arg0, %c0_i32, %c0_i32_0 : i32, i32, i32
  }
}

module attributes {stable_mosaic.version = 11 : i64} {
  func.func @mlp_ce_kernel(%arg0: i32, %arg1: memref<2x576xbf16, #tpu.memory_space<vmem>>, %arg2: memref<576x512xbf16, #tpu.memory_space<vmem>>, %arg3: memref<1x512xf32, #tpu.memory_space<vmem>>, %arg4: memref<512x10xf32, #tpu.memory_space<vmem>>, %arg5: memref<1x10xf32, #tpu.memory_space<vmem>>, %arg6: memref<2x1xi32, #tpu.memory_space<vmem>>, %arg7: memref<2x1xf32, #tpu.memory_space<vmem>>, %arg8: memref<2x10xf32, #tpu.memory_space<vmem>>, %arg9: memref<1x1xf32, #tpu.memory_space<vmem>>) attributes {dimension_semantics = [#tpu.dimension_semantics<arbitrary>], iteration_bounds = array<i64: 1>, scalar_prefetch = 0 : i64, scratch_operands = 0 : i64, tpu.core_type = #tpu.core_type<tc>, window_params = [{pipeline_mode = #tpu.pipeline_mode<synchronous>, transform_indices = @transform_0, window_bounds = array<i64: 2, 576>}, {pipeline_mode = #tpu.pipeline_mode<synchronous>, transform_indices = @transform_1, window_bounds = array<i64: 576, 512>}, {pipeline_mode = #tpu.pipeline_mode<synchronous>, transform_indices = @transform_2, window_bounds = array<i64: 1, 512>}, {pipeline_mode = #tpu.pipeline_mode<synchronous>, transform_indices = @transform_3, window_bounds = array<i64: 512, 10>}, {pipeline_mode = #tpu.pipeline_mode<synchronous>, transform_indices = @transform_4, window_bounds = array<i64: 1, 10>}, {pipeline_mode = #tpu.pipeline_mode<synchronous>, transform_indices = @transform_5, window_bounds = array<i64: 2, 1>}, {pipeline_mode = #tpu.pipeline_mode<synchronous>, transform_indices = @transform_6, window_bounds = array<i64: 2, 1>}, {pipeline_mode = #tpu.pipeline_mode<synchronous>, transform_indices = @transform_7, window_bounds = array<i64: 2, 10>}, {pipeline_mode = #tpu.pipeline_mode<synchronous>, transform_indices = @transform_8, window_bounds = array<i64: 1, 1>}]} {
    %c0 = arith.constant 0 : index
    %c0_0 = arith.constant 0 : index
    %0 = vector.load %arg1[%c0, %c0_0] : memref<2x576xbf16, #tpu.memory_space<vmem>>, vector<2x576xbf16>
    %c0_1 = arith.constant 0 : index
    %c0_2 = arith.constant 0 : index
    %1 = vector.load %arg2[%c0_1, %c0_2] : memref<576x512xbf16, #tpu.memory_space<vmem>>, vector<576x512xbf16>
    %cst = arith.constant dense<0.000000e+00> : vector<2x512xf32>
    %2 = tpu.matmul %0, %1, %cst {dimension_numbers = #tpu.dot_dimension_numbers<[1], [0], [0], [1], [0, 0, 1, 1], [], []>} : vector<2x576xbf16>, vector<576x512xbf16>, vector<2x512xf32> -> vector<2x512xf32>
    %c0_3 = arith.constant 0 : index
    %c0_4 = arith.constant 0 : index
    %3 = vector.load %arg3[%c0_3, %c0_4] : memref<1x512xf32, #tpu.memory_space<vmem>>, vector<1x512xf32>
    %4 = vector.broadcast %3 : vector<1x512xf32> to vector<2x512xf32>
    %5 = arith.addf %2, %4 : vector<2x512xf32>
    %cst_5 = arith.constant 0.000000e+00 : f32
    %6 = vector.broadcast %cst_5 : f32 to vector<2x512xf32>
    %7 = arith.maximumf %5, %6 : vector<2x512xf32>
    %c0_6 = arith.constant 0 : index
    %c0_7 = arith.constant 0 : index
    %8 = vector.load %arg4[%c0_6, %c0_7] : memref<512x10xf32, #tpu.memory_space<vmem>>, vector<512x10xf32>
    %cst_8 = arith.constant dense<0.000000e+00> : vector<2x10xf32>
    %9 = tpu.matmul %7, %8, %cst_8 {dimension_numbers = #tpu.dot_dimension_numbers<[1], [0], [0], [1], [0, 0, 1, 1], [], []>} : vector<2x512xf32>, vector<512x10xf32>, vector<2x10xf32> -> vector<2x10xf32>
    %c0_9 = arith.constant 0 : index
    %c0_10 = arith.constant 0 : index
    %10 = vector.load %arg5[%c0_9, %c0_10] : memref<1x10xf32, #tpu.memory_space<vmem>>, vector<1x10xf32>
    %11 = vector.broadcast %10 : vector<1x10xf32> to vector<2x10xf32>
    %12 = arith.addf %9, %11 : vector<2x10xf32>
    %c0_11 = arith.constant 0 : index
    %c0_12 = arith.constant 0 : index
    %13 = vector.load %arg8[%c0_11, %c0_12] : memref<2x10xf32, #tpu.memory_space<vmem>>, vector<2x10xf32>
    tpu.vector_store %arg8[%c0_11, %c0_12], %12 {strides = array<i32>} : memref<2x10xf32, #tpu.memory_space<vmem>>, vector<2x10xf32>,
    %cst_13 = arith.constant dense<0xFF800000> : vector<2xf32>
    %14 = vector.multi_reduction <maximumf>, %12, %cst_13 [1] : vector<2x10xf32> to vector<2xf32>
    %15 = vector.shape_cast %14 : vector<2xf32> to vector<2x1xf32>
    %16 = vector.broadcast %15 : vector<2x1xf32> to vector<2x10xf32>
    %17 = arith.subf %12, %16 : vector<2x10xf32>
    %18 = math.exp %17 : vector<2x10xf32>
    %cst_14 = arith.constant dense<0.000000e+00> : vector<2xf32>
    %19 = vector.multi_reduction <add>, %18, %cst_14 [1] : vector<2x10xf32> to vector<2xf32>
    %20 = vector.shape_cast %19 : vector<2xf32> to vector<2x1xf32>
    %21 = math.log %20 : vector<2x1xf32>
    %22 = arith.addf %15, %21 : vector<2x1xf32>
    %23 = tpu.iota {dimensions = array<i32: 1>} : vector<2x10xi32>
    %c0_15 = arith.constant 0 : index
    %c0_16 = arith.constant 0 : index
    %24 = vector.load %arg6[%c0_15, %c0_16] : memref<2x1xi32, #tpu.memory_space<vmem>>, vector<2x1xi32>
    %25 = vector.broadcast %24 : vector<2x1xi32> to vector<2x10xi32>
    %26 = arith.cmpi eq, %23, %25 : vector<2x10xi32>
    %cst_17 = arith.constant 0.000000e+00 : f32
    %27 = vector.broadcast %cst_17 : f32 to vector<2x10xf32>
    %28 = arith.select %26, %12, %27 : vector<2x10xi1>, vector<2x10xf32>
    %cst_18 = arith.constant dense<0.000000e+00> : vector<2xf32>
    %29 = vector.multi_reduction <add>, %28, %cst_18 [1] : vector<2x10xf32> to vector<2xf32>
    %30 = vector.shape_cast %29 : vector<2xf32> to vector<2x1xf32>
    %31 = arith.subf %22, %30 : vector<2x1xf32>
    %c0_19 = arith.constant 0 : index
    %c0_20 = arith.constant 0 : index
    %32 = vector.load %arg7[%c0_19, %c0_20] : memref<2x1xf32, #tpu.memory_space<vmem>>, vector<2x1xf32>
    %33 = arith.mulf %32, %31 : vector<2x1xf32>
    %34 = vector.shape_cast %33 : vector<2x1xf32> to vector<1x2x1xf32>
    %cst_21 = arith.constant dense<0.000000e+00> : vector<1xf32>
    %35 = vector.multi_reduction <add>, %34, %cst_21 [1, 2] : vector<1x2x1xf32> to vector<1xf32>
    %36 = vector.shape_cast %35 : vector<1xf32> to vector<1x1x1xf32>
    %37 = vector.extract %36[0, 0, 0] : f32 from vector<1x1x1xf32>
    %38 = vector.broadcast %37 : f32 to vector<1x1xf32>
    %c0_22 = arith.constant 0 : index
    %c0_23 = arith.constant 0 : index
    %39 = vector.load %arg9[%c0_22, %c0_23] : memref<1x1xf32, #tpu.memory_space<vmem>>, vector<1x1xf32>
    tpu.vector_store %arg9[%c0_22, %c0_23], %38 {strides = array<i32>} : memref<1x1xf32, #tpu.memory_space<vmem>>, vector<1x1xf32>,
    return
  }
  func.func @transform_0(%arg0: i32) -> (i32, i32) {
    %c0_i32 = arith.constant 0 : i32
    %c0_i32_0 = arith.constant 0 : i32
    %c0_i32_1 = arith.constant 0 : i32
    return %c0_i32, %c0_i32_0 : i32, i32
  }
  func.func @transform_1(%arg0: i32) -> (i32, i32) {
    %c0_i32 = arith.constant 0 : i32
    %c0_i32_0 = arith.constant 0 : i32
    %c0_i32_1 = arith.constant 0 : i32
    return %c0_i32, %c0_i32_0 : i32, i32
  }
  func.func @transform_2(%arg0: i32) -> (i32, i32) {
    %c0_i32 = arith.constant 0 : i32
    %c0_i32_0 = arith.constant 0 : i32
    %c0_i32_1 = arith.constant 0 : i32
    return %c0_i32, %c0_i32_0 : i32, i32
  }
  func.func @transform_3(%arg0: i32) -> (i32, i32) {
    %c0_i32 = arith.constant 0 : i32
    %c0_i32_0 = arith.constant 0 : i32
    %c0_i32_1 = arith.constant 0 : i32
    return %c0_i32, %c0_i32_0 : i32, i32
  }
  func.func @transform_4(%arg0: i32) -> (i32, i32) {
    %c0_i32 = arith.constant 0 : i32
    %c0_i32_0 = arith.constant 0 : i32
    %c0_i32_1 = arith.constant 0 : i32
    return %c0_i32, %c0_i32_0 : i32, i32
  }
  func.func @transform_5(%arg0: i32) -> (i32, i32) {
    %c0_i32 = arith.constant 0 : i32
    %c0_i32_0 = arith.constant 0 : i32
    %c0_i32_1 = arith.constant 0 : i32
    return %c0_i32, %c0_i32_0 : i32, i32
  }
  func.func @transform_6(%arg0: i32) -> (i32, i32) {
    %c0_i32 = arith.constant 0 : i32
    %c0_i32_0 = arith.constant 0 : i32
    %c0_i32_1 = arith.constant 0 : i32
    return %c0_i32, %c0_i32_0 : i32, i32
  }
  func.func @transform_7(%arg0: i32) -> (i32, i32) {
    %c0_i32 = arith.constant 0 : i32
    %c0_i32_0 = arith.constant 0 : i32
    %c0_i32_1 = arith.constant 0 : i32
    return %c0_i32, %c0_i32_0 : i32, i32
  }
  func.func @transform_8(%arg0: i32) -> (i32, i32) {
    %c0_i32 = arith.constant 0 : i32
    %c0_i32_0 = arith.constant 0 : i32
    %c0_i32_1 = arith.constant 0 : i32
    return %c0_i32, %c0_i32_0 : i32, i32
  }
}

</mosaic_0001>

<bundles_post_ra>
// kernel: _lambda_.4
= control target key start
LH: loop header
LB: loop body
LE: loop exit
PB: predicated region body
PF: predicated region fallthrough
CT: control target
= control target key end

     0   :  { %s1709_s12 = smov 0   ;;  %s2034_s0 = inlined_call_operand.vmem [shape: bf16[2,4,208,25], index: 0, kind: input, shape index: {}]   ;;  %s2035_s1 = inlined_call_operand.vmem [shape: bf16[25,32], index: 1, kind: input, shape index: {}]   ;;  %s2036_s2 = inlined_call_operand.vmem [shape: f32[1,1,32], index: 2, kind: input, shape index: {}]   ;;  %s2037_s3 = inlined_call_operand.vmem [shape: bf16[2,208,32], index: 3, kind: output, shape index: {}]  }
   0x1 LB: > { %s1331_s13 = sadd.s32 4294967295, %s1686_s12   ;;  %p1335_p0 = scmp.ge.s32.totalorder %s1686_s12, 1  ;;  %s1686_s12 = sphi %s1709_s12, %s13_s12  }
   0x2   : > { %p137_p1 = scmp.lt.s32.totalorder %s1686_s12, 3 }
   0x4   : > { %p138_p2 = pnand %p1335_p0, %p137_p1 }
   0x5   : > { %p161_p3 = scmp.lt.s32.totalorder (!%p138_p2), %s1331_s13, 1 }
   0x6   : > { %141 = sbr.rel (%p138_p2) target bundleno = 369 (0x171), region = 32 }
   0xb   : > { %v1552_v0 = vld [vmem:[%s2035_s1 + $0x8] sm:$0xf]  ;;  %v1661_v1 = vld [vmem:[%s2035_s1 + $0x8] sm:$0x10]  ;;  %vm708_vm0 = vcmask 1043456   ;;  %vm709_vm1 = vcmask 1044480  }
   0xc   : > { %v1553_v2 = vor.u32 %v1661_v1, %v1552_v0  ;;  %v1688_v3 = vmov 65535   ;;  %s2039_s13 = smov (!%p161_p3, %s1331_s13), 1  ;;  %v1660_v7 = vld [vmem:[%s2035_s1] sm:$0xff]  ;;  %vm551_vm2 = vcmask 203776   ;;  %vm984_vm3 = vcmask 261120  }
   0xd   : > { %v710_v4 = vsel %vm708_vm0, 4294967295, %v1688_v3  ;;  %s1668_s18 = smul.u32 416, %s2039_s13  ;;  %v1813_v56 = vld [vmem:[%s2036_s2] ss:$0 sm:$0xff]  ;;  %vm1249_vm4 = vcmask 257024  }
   0xe   : > { %v711_v5 = vsel %vm709_vm1, %v710_v4, 0  ;;  %s1669_s26 = smul.u32 104, %s2039_s13 }
   0xf   : > { %v713_v6 = vand.u32 %v1553_v2, %v711_v5  ;;  %s1732_s23 = scalar_lea.vmem %s2034_s0, %s1668_s18 }
  0x10   : > { %v1608_v8 = vld [vmem:[%s1732_s23] sm:$0xff]  ;;  %v1621_v9 = vld [vmem:[%s1732_s23 + $0x68] sm:$0xff]  ;;  %v1634_v10 = vld [vmem:[%s1732_s23 + $0xd0] sm:$0xff]  ;;  %s1824_s29 = scalar_lea.vmem %s2037_s3, %s1669_s26 }
  0x11   : > { %721 = vmatpush.bf16.msra.mxu0 %v713_v6  ;;  %1662 = vmatpush.bf16.msra.mxu1 %v713_v6  ;;  %v1647_v11 = vld [vmem:[%s1732_s23 + $0x138] sm:$0xff]  ;;  %v1609_v12 = vld [vmem:[%s1732_s23 + $0x8] sm:$0xff]  ;;  %v1622_v13 = vld [vmem:[%s1732_s23 + $0x70] sm:$0xff] }
  0x12   : > { %1663 = vmatpush.bf16.msra.mxu2 %v713_v6  ;;  %1664 = vmatpush.bf16.msra.mxu3 %v713_v6  ;;  %v1635_v14 = vld [vmem:[%s1732_s23 + $0xd8] sm:$0xff]  ;;  %v1648_v15 = vld [vmem:[%s1732_s23 + $0x140] sm:$0xff]  ;;  %v1610_v16 = vld [vmem:[%s1732_s23 + $0x10] sm:$0xff] }
  0x13   : > { %v1623_v17 = vld [vmem:[%s1732_s23 + $0x78] sm:$0xff]  ;;  %v1636_v18 = vld [vmem:[%s1732_s23 + $0xe0] sm:$0xff]  ;;  %v1649_v19 = vld [vmem:[%s1732_s23 + $0x148] sm:$0xff] }
  0x14   : > { %v1611_v20 = vld [vmem:[%s1732_s23 + $0x18] sm:$0xff]  ;;  %v1624_v21 = vld [vmem:[%s1732_s23 + $0x80] sm:$0xff]  ;;  %v1637_v22 = vld [vmem:[%s1732_s23 + $0xe8] sm:$0xff] }
  0x15   : > { %722 = vmatpush.bf16.msra.mxu0 %v1660_v7  ;;  %1665 = vmatpush.bf16.msra.mxu1 %v1660_v7  ;;  %v1650_v23 = vld [vmem:[%s1732_s23 + $0x150] sm:$0xff]  ;;  %v1612_v24 = vld [vmem:[%s1732_s23 + $0x20] sm:$0xff]  ;;  %v1625_v25 = vld [vmem:[%s1732_s23 + $0x88] sm:$0xff] }
  0x16   : > { %1666 = vmatpush.bf16.msra.mxu2 %v1660_v7  ;;  %1667 = vmatpush.bf16.msra.mxu3 %v1660_v7  ;;  %v1638_v26 = vld [vmem:[%s1732_s23 + $0xf0] sm:$0xff]  ;;  %v1651_v27 = vld [vmem:[%s1732_s23 + $0x158] sm:$0xff]  ;;  %v1613_v28 = vld [vmem:[%s1732_s23 + $0x28] sm:$0xff] }
  0x17   : > { %v1626_v29 = vld [vmem:[%s1732_s23 + $0x90] sm:$0xff]  ;;  %v1639_v30 = vld [vmem:[%s1732_s23 + $0xf8] sm:$0xff]  ;;  %v1652_v31 = vld [vmem:[%s1732_s23 + $0x160] sm:$0xff] }
  0x18   : > { %1554 = vmatmul.msk.bf16.vlgmr.msra.gmra.mxu0 %vm551_vm2, %v1608_v8  ;;  %1567 = vmatmul.msk.bf16.vlgmr.msra.gmra.mxu1 %vm551_vm2, %v1621_v9  ;;  %v1614_v32 = vld [vmem:[%s1732_s23 + $0x30] sm:$0xff]  ;;  %v1627_v33 = vld [vmem:[%s1732_s23 + $0x98] sm:$0xff]  ;;  %v1640_v34 = vld [vmem:[%s1732_s23 + $0x100] sm:$0xff] }
  0x19   : > { %1580 = vmatmul.msk.bf16.vlgmr.msra.gmra.mxu2 %vm551_vm2, %v1634_v10  ;;  %1593 = vmatmul.msk.bf16.vlgmr.msra.gmra.mxu3 %vm551_vm2, %v1647_v11  ;;  %v1653_v35 = vld [vmem:[%s1732_s23 + $0x168] sm:$0xff]  ;;  %v1615_v36 = vld [vmem:[%s1732_s23 + $0x38] sm:$0xff]  ;;  %v1628_v37 = vld [vmem:[%s1732_s23 + $0xa0] sm:$0xff] }
  0x1a   : > { %v1641_v38 = vld [vmem:[%s1732_s23 + $0x108] sm:$0xff]  ;;  %v1654_v39 = vld [vmem:[%s1732_s23 + $0x170] sm:$0xff]  ;;  %v1616_v40 = vld [vmem:[%s1732_s23 + $0x40] sm:$0xff] }
  0x1b   : > { %v1629_v41 = vld [vmem:[%s1732_s23 + $0xa8] sm:$0xff]  ;;  %v1642_v44 = vld [vmem:[%s1732_s23 + $0x110] sm:$0xff]  ;;  %v1655_v45 = vld [vmem:[%s1732_s23 + $0x178] sm:$0xff] }
  0x1c   : > { %v1617_v1 = vld [vmem:[%s1732_s23 + $0x48] sm:$0xff]  ;;  %v1630_v2 = vld [vmem:[%s1732_s23 + $0xb0] sm:$0xff]  ;;  %v1643_v6 = vld [vmem:[%s1732_s23 + $0x118] sm:$0xff] }
  0x1d   : > { %v1656_v7 = vld [vmem:[%s1732_s23 + $0x180] sm:$0xff] }
  0x28   : > { %1555 = vmatmul.msk.bf16.gmra.mxu0 %vm551_vm2, %v1609_v12  ;;  %1568 = vmatmul.msk.bf16.gmra.mxu1 %vm551_vm2, %v1622_v13 }
  0x29   : > { %1581 = vmatmul.msk.bf16.gmra.mxu2 %vm551_vm2, %v1635_v14  ;;  %1594 = vmatmul.msk.bf16.gmra.mxu3 %vm551_vm2, %v1648_v15 }
  0x38   : > { %1556 = vmatmul.msk.bf16.gmra.mxu0 %vm551_vm2, %v1610_v16  ;;  %1569 = vmatmul.msk.bf16.gmra.mxu1 %vm551_vm2, %v1623_v17 }
  0x39   : > { %1582 = vmatmul.msk.bf16.gmra.mxu2 %vm551_vm2, %v1636_v18  ;;  %1595 = vmatmul.msk.bf16.gmra.mxu3 %vm551_vm2, %v1649_v19 }
  0x48   : > { %1557 = vmatmul.msk.bf16.gmra.mxu0 %vm551_vm2, %v1611_v20  ;;  %1570 = vmatmul.msk.bf16.gmra.mxu1 %vm551_vm2, %v1624_v21 }
  0x49   : > { %1583 = vmatmul.msk.bf16.gmra.mxu2 %vm551_vm2, %v1637_v22  ;;  %1596 = vmatmul.msk.bf16.gmra.mxu3 %vm551_vm2, %v1650_v23 }
  0x58   : > { %1558 = vmatmul.msk.bf16.gmra.mxu0 %vm551_vm2, %v1612_v24  ;;  %1571 = vmatmul.msk.bf16.gmra.mxu1 %vm551_vm2, %v1625_v25 }
  0x59   : > { %1584 = vmatmul.msk.bf16.gmra.mxu2 %vm551_vm2, %v1638_v26  ;;  %1597 = vmatmul.msk.bf16.gmra.mxu3 %vm551_vm2, %v1651_v27 }
  0x68   : > { %1559 = vmatmul.msk.bf16.gmra.mxu0 %vm551_vm2, %v1613_v28  ;;  %1572 = vmatmul.msk.bf16.gmra.mxu1 %vm551_vm2, %v1626_v29 }
  0x69   : > { %1585 = vmatmul.msk.bf16.gmra.mxu2 %vm551_vm2, %v1639_v30  ;;  %1598 = vmatmul.msk.bf16.gmra.mxu3 %vm551_vm2, %v1652_v31 }
  0x78   : > { %1560 = vmatmul.msk.bf16.gmra.mxu0 %vm551_vm2, %v1614_v32  ;;  %1573 = vmatmul.msk.bf16.gmra.mxu1 %vm551_vm2, %v1627_v33  ;;  %v1618_v33 = vld [vmem:[%s1732_s23 + $0x50] sm:$0xff] }
  0x79   : > { %1586 = vmatmul.msk.bf16.gmra.mxu2 %vm551_vm2, %v1640_v34  ;;  %1599 = vmatmul.msk.bf16.gmra.mxu3 %vm551_vm2, %v1653_v35  ;;  %v1631_v34 = vld [vmem:[%s1732_s23 + $0xb8] sm:$0xff] }
  0x88   : > { %1561 = vmatmul.msk.bf16.gmra.mxu0 %vm551_vm2, %v1615_v36  ;;  %1574 = vmatmul.msk.bf16.gmra.mxu1 %vm551_vm2, %v1628_v37 }
  0x89   : > { %1587 = vmatmul.msk.bf16.gmra.mxu2 %vm551_vm2, %v1641_v38  ;;  %1600 = vmatmul.msk.bf16.gmra.mxu3 %vm551_vm2, %v1654_v39  ;;  %v1644_v38 = vld [vmem:[%s1732_s23 + $0x120] sm:$0xff]  ;;  %v1657_v39 = vld [vmem:[%s1732_s23 + $0x188] sm:$0xff] }
  0x95   : > { %v724_v42 = vpop.f32.mrf.mxu0  ;;  %v789_v43 = vpop.f32.mrf.mxu1 }
  0x96   : > { %v985_v46 = vsel %vm984_vm3, %v724_v42, -inf  ;;  %v986_v47 = vsel %vm984_vm3, %v789_v43, -inf }
  0x97   : > { %v987_v48 = vmax.f32 %v985_v46, %v986_v47 }
  0x98   : > { %1562 = vmatmul.msk.bf16.gmra.mxu0 %vm551_vm2, %v1616_v40  ;;  %1575 = vmatmul.msk.bf16.gmra.mxu1 %vm551_vm2, %v1629_v41 }
  0x99   : > { %1588 = vmatmul.msk.bf16.gmra.mxu2 %vm551_vm2, %v1642_v44  ;;  %1601 = vmatmul.msk.bf16.gmra.mxu3 %vm551_vm2, %v1655_v45 }
  0x9c   : > { %v854_v49 = vpop.f32.mrf.mxu2  ;;  %v919_v50 = vpop.f32.mrf.mxu3 }
  0x9d   : > { %v988_v51 = vsel %vm984_vm3, %v854_v49, -inf  ;;  %v990_v52 = vsel %vm984_vm3, %v919_v50, -inf  ;;  %v726_v53 = vpop.f32.mrf.mxu0  ;;  %v791_v54 = vpop.f32.mrf.mxu1 }
  0x9e   : > { %v989_v55 = vmax.f32 %v987_v48, %v988_v51  ;;  %v992_v58 = vsel %vm984_vm3, %v726_v53, -inf  ;;  %v993_v59 = vsel %vm984_vm3, %v791_v54, -inf }
  0x9f   : > { %v994_v62 = vmax.f32 %v992_v58, %v993_v59 }
  0xa0   : > { %v991_v57 = vmax.f32 %v989_v55, %v990_v52 }
  0xa2   : > { %v1171_v60 = vadd.f32 %v1813_v56, %v991_v57 }
  0xa4   : > { %v1197_v61 = vmax.f32 %v1171_v60, 0.0  ;;  %v856_v63 = vpop.f32.mrf.mxu2  ;;  %v921_v0 = vpop.f32.mrf.mxu3 }
  0xa5   : > { %v995_v3 = vsel %vm984_vm3, %v856_v63, -inf  ;;  %v729_v4 = vpop.f32.mrf.mxu0  ;;  %v794_v5 = vpop.f32.mrf.mxu1  ;;  %v997_v10 = vsel %vm984_vm3, %v921_v0, -inf }
  0xa6   : > { %v1223_v8 = vpack.c.bf16 %v1197_v61, %v1197_v61  ;;  %v996_v9 = vmax.f32 %v994_v62, %v995_v3  ;;  %v999_v11 = vsel %vm984_vm3, %v729_v4, -inf  ;;  %v1000_v12 = vsel %vm984_vm3, %v794_v5, -inf  ;;  %v1632_v3 = vld [vmem:[%s1732_s23 + $0xc0] sm:$0xff] }
  0xa7   : > { %v1001_v15 = vmax.f32 %v999_v11, %v1000_v12 }
  0xa8   : > { %1250 = vst.msk [vmem:[%s1824_s29] sm:$0xf] %vm1249_vm4, %v1223_v8  ;;  %v998_v13 = vmax.f32 %v996_v9, %v997_v10  ;;  %1563 = vmatmul.msk.bf16.gmra.mxu0 %vm551_vm2, %v1617_v1  ;;  %1576 = vmatmul.msk.bf16.gmra.mxu1 %vm551_vm2, %v1630_v2  ;;  %v1619_v2 = vld [vmem:[%s1732_s23 + $0x58] sm:$0xff]  ;;  %v1658_v8 = vld [vmem:[%s1732_s23 + $0x190] sm:$0xff] }
  0xa9   : > { %1589 = vmatmul.msk.bf16.gmra.mxu2 %vm551_vm2, %v1643_v6  ;;  %1602 = vmatmul.msk.bf16.gmra.mxu3 %vm551_vm2, %v1656_v7  ;;  %v1645_v7 = vld [vmem:[%s1732_s23 + $0x128] sm:$0xff] }
  0xaa   : > { %v1172_v14 = vadd.f32 %v1813_v56, %v998_v13 }
  0xac   : > { %v1198_v16 = vmax.f32 %v1172_v14, 0.0  ;;  %v859_v17 = vpop.f32.mrf.mxu2  ;;  %v924_v18 = vpop.f32.mrf.mxu3 }
  0xad   : > { %v1002_v19 = vsel %vm984_vm3, %v859_v17, -inf  ;;  %v1004_v20 = vsel %vm984_vm3, %v924_v18, -inf  ;;  %v731_v21 = vpop.f32.mrf.mxu0  ;;  %v796_v22 = vpop.f32.mrf.mxu1 }
  0xae   : > { %v1224_v23 = vpack.c.bf16 %v1198_v16, %v1198_v16  ;;  %v1003_v24 = vmax.f32 %v1001_v15, %v1002_v19  ;;  %v1006_v26 = vsel %vm984_vm3, %v731_v21, -inf  ;;  %v1007_v27 = vsel %vm984_vm3, %v796_v22, -inf }
  0xaf   : > { %v1008_v30 = vmax.f32 %v1006_v26, %v1007_v27 }
  0xb0   : > { %1251 = vst.msk [vmem:[%s1824_s29 + $0x4] sm:$0xf] %vm1249_vm4, %v1224_v23  ;;  %v1005_v25 = vmax.f32 %v1003_v24, %v1004_v20 }
  0xb2   : > { %v1173_v28 = vadd.f32 %v1813_v56, %v1005_v25 }
  0xb4   : > { %v1199_v29 = vmax.f32 %v1173_v28, 0.0  ;;  %v861_v31 = vpop.f32.mrf.mxu2  ;;  %v926_v32 = vpop.f32.mrf.mxu3 }
  0xb5   : > { %v1009_v35 = vsel %vm984_vm3, %v861_v31, -inf  ;;  %v734_v36 = vpop.f32.mrf.mxu0  ;;  %v799_v37 = vpop.f32.mrf.mxu1  ;;  %v1011_v42 = vsel %vm984_vm3, %v926_v32, -inf }
  0xb6   : > { %v1225_v40 = vpack.c.bf16 %v1199_v29, %v1199_v29  ;;  %v1010_v41 = vmax.f32 %v1008_v30, %v1009_v35  ;;  %v1013_v43 = vsel %vm984_vm3, %v734_v36, -inf  ;;  %v1014_v44 = vsel %vm984_vm3, %v799_v37, -inf  ;;  %v1633_v35 = vld [vmem:[%s1732_s23 + $0xc8] sm:$0xff] }
  0xb7   : > { %v1015_v47 = vmax.f32 %v1013_v43, %v1014_v44 }
  0xb8   : > { %1252 = vst.msk [vmem:[%s1824_s29 + $0x8] sm:$0xf] %vm1249_vm4, %v1225_v40  ;;  %v1012_v45 = vmax.f32 %v1010_v41, %v1011_v42  ;;  %1564 = vmatmul.msk.bf16.gmra.mxu0 %vm551_vm2, %v1618_v33  ;;  %1577 = vmatmul.msk.bf16.gmra.mxu1 %vm551_vm2, %v1631_v34  ;;  %v1620_v34 = vld [vmem:[%s1732_s23 + $0x60] sm:$0xff]  ;;  %v1659_v40 = vld [vmem:[%s1732_s23 + $0x198] sm:$0xff] }
  0xb9   : > { %1590 = vmatmul.msk.bf16.gmra.mxu2 %vm551_vm2, %v1644_v38  ;;  %1603 = vmatmul.msk.bf16.gmra.mxu3 %vm551_vm2, %v1657_v39  ;;  %v1646_v39 = vld [vmem:[%s1732_s23 + $0x130] sm:$0xff] }
  0xba   : > { %v1174_v46 = vadd.f32 %v1813_v56, %v1012_v45 }
  0xbc   : > { %v1200_v48 = vmax.f32 %v1174_v46, 0.0  ;;  %v864_v49 = vpop.f32.mrf.mxu2  ;;  %v929_v50 = vpop.f32.mrf.mxu3 }
  0xbd   : > { %v1016_v51 = vsel %vm984_vm3, %v864_v49, -inf  ;;  %v1018_v52 = vsel %vm984_vm3, %v929_v50, -inf  ;;  %v736_v53 = vpop.f32.mrf.mxu0  ;;  %v801_v54 = vpop.f32.mrf.mxu1 }
  0xbe   : > { %v1226_v55 = vpack.c.bf16 %v1200_v48, %v1200_v48  ;;  %v1017_v57 = vmax.f32 %v1015_v47, %v1016_v51  ;;  %v1020_v59 = vsel %vm984_vm3, %v736_v53, -inf  ;;  %v1021_v60 = vsel %vm984_vm3, %v801_v54, -inf }
  0xbf   : > { %v1022_v63 = vmax.f32 %v1020_v59, %v1021_v60 }
  0xc0   : > { %1253 = vst.msk [vmem:[%s1824_s29 + $0xc] sm:$0xf] %vm1249_vm4, %v1226_v55  ;;  %v1019_v58 = vmax.f32 %v1017_v57, %v1018_v52 }
  0xc2   : > { %v1175_v61 = vadd.f32 %v1813_v56, %v1019_v58 }
  0xc4   : > { %v1201_v62 = vmax.f32 %v1175_v61, 0.0  ;;  %v866_v0 = vpop.f32.mrf.mxu2  ;;  %v931_v1 = vpop.f32.mrf.mxu3 }
  0xc5   : > { %v1023_v4 = vsel %vm984_vm3, %v866_v0, -inf  ;;  %v739_v5 = vpop.f32.mrf.mxu0  ;;  %v804_v6 = vpop.f32.mrf.mxu1  ;;  %v1025_v11 = vsel %vm984_vm3, %v931_v1, -inf }
  0xc6   : > { %v1227_v9 = vpack.c.bf16 %v1201_v62, %v1201_v62  ;;  %v1024_v10 = vmax.f32 %v1022_v63, %v1023_v4  ;;  %v1027_v12 = vsel %vm984_vm3, %v739_v5, -inf  ;;  %v1028_v13 = vsel %vm984_vm3, %v804_v6, -inf }
  0xc7   : > { %v1029_v16 = vmax.f32 %v1027_v12, %v1028_v13 }
  0xc8   : > { %1254 = vst.msk [vmem:[%s1824_s29 + $0x10] sm:$0xf] %vm1249_vm4, %v1227_v9  ;;  %v1026_v14 = vmax.f32 %v1024_v10, %v1025_v11  ;;  %1565 = vmatmul.msk.bf16.gmra.mxu0 %vm551_vm2, %v1619_v2  ;;  %1578 = vmatmul.msk.bf16.gmra.mxu1 %vm551_vm2, %v1632_v3 }
  0xc9   : > { %1591 = vmatmul.msk.bf16.gmra.mxu2 %vm551_vm2, %v1645_v7  ;;  %1604 = vmatmul.msk.bf16.gmra.mxu3 %vm551_vm2, %v1658_v8 }
  0xca   : > { %v1176_v15 = vadd.f32 %v1813_v56, %v1026_v14 }
  0xcc   : > { %v1202_v17 = vmax.f32 %v1176_v15, 0.0  ;;  %v869_v18 = vpop.f32.mrf.mxu2  ;;  %v934_v19 = vpop.f32.mrf.mxu3 }
  0xcd   : > { %v1030_v20 = vsel %vm984_vm3, %v869_v18, -inf  ;;  %v1032_v21 = vsel %vm984_vm3, %v934_v19, -inf  ;;  %v741_v22 = vpop.f32.mrf.mxu0  ;;  %v806_v23 = vpop.f32.mrf.mxu1 }
  0xce   : > { %v1228_v24 = vpack.c.bf16 %v1202_v17, %v1202_v17  ;;  %v1031_v25 = vmax.f32 %v1029_v16, %v1030_v20  ;;  %v1034_v27 = vsel %vm984_vm3, %v741_v22, -inf  ;;  %v1035_v28 = vsel %vm984_vm3, %v806_v23, -inf }
  0xcf   : > { %v1036_v31 = vmax.f32 %v1034_v27, %v1035_v28 }
  0xd0   : > { %1255 = vst.msk [vmem:[%s1824_s29 + $0x14] sm:$0xf] %vm1249_vm4, %v1228_v24  ;;  %v1033_v26 = vmax.f32 %v1031_v25, %v1032_v21 }
  0xd2   : > { %v1177_v29 = vadd.f32 %v1813_v56, %v1033_v26 }
  0xd4   : > { %v1203_v30 = vmax.f32 %v1177_v29, 0.0  ;;  %v871_v32 = vpop.f32.mrf.mxu2  ;;  %v936_v33 = vpop.f32.mrf.mxu3 }
  0xd5   : > { %v1037_v36 = vsel %vm984_vm3, %v871_v32, -inf  ;;  %v744_v37 = vpop.f32.mrf.mxu0  ;;  %v809_v38 = vpop.f32.mrf.mxu1  ;;  %v1039_v43 = vsel %vm984_vm3, %v936_v33, -inf }
  0xd6   : > { %v1229_v41 = vpack.c.bf16 %v1203_v30, %v1203_v30  ;;  %v1038_v42 = vmax.f32 %v1036_v31, %v1037_v36  ;;  %v1041_v44 = vsel %vm984_vm3, %v744_v37, -inf  ;;  %v1042_v45 = vsel %vm984_vm3, %v809_v38, -inf }
  0xd7   : > { %v1043_v48 = vmax.f32 %v1041_v44, %v1042_v45 }
  0xd8   : > { %1256 = vst.msk [vmem:[%s1824_s29 + $0x18] sm:$0xf] %vm1249_vm4, %v1229_v41  ;;  %v1040_v46 = vmax.f32 %v1038_v42, %v1039_v43  ;;  %1566 = vmatmul.msk.bf16.gmra.mxu0 %vm551_vm2, %v1620_v34  ;;  %1579 = vmatmul.msk.bf16.gmra.mxu1 %vm551_vm2, %v1633_v35 }
  0xd9   : > { %1592 = vmatmul.msk.bf16.gmra.mxu2 %vm551_vm2, %v1646_v39  ;;  %1605 = vmatmul.msk.bf16.gmra.mxu3 %vm551_vm2, %v1659_v40 }
  0xda   : > { %v1178_v47 = vadd.f32 %v1813_v56, %v1040_v46 }
  0xdc   : > { %v1204_v49 = vmax.f32 %v1178_v47, 0.0  ;;  %v874_v50 = vpop.f32.mrf.mxu2  ;;  %v939_v51 = vpop.f32.mrf.mxu3 }
  0xdd   : > { %v1044_v52 = vsel %vm984_vm3, %v874_v50, -inf  ;;  %v1046_v53 = vsel %vm984_vm3, %v939_v51, -inf  ;;  %v746_v54 = vpop.f32.mrf.mxu0  ;;  %v811_v55 = vpop.f32.mrf.mxu1 }
  0xde   : > { %v1230_v57 = vpack.c.bf16 %v1204_v49, %v1204_v49  ;;  %v1045_v58 = vmax.f32 %v1043_v48, %v1044_v52  ;;  %v1048_v60 = vsel %vm984_vm3, %v746_v54, -inf  ;;  %v1049_v61 = vsel %vm984_vm3, %v811_v55, -inf }
  0xdf   : > { %v1050_v0 = vmax.f32 %v1048_v60, %v1049_v61 }
  0xe0   : > { %1257 = vst.msk [vmem:[%s1824_s29 + $0x1c] sm:$0xf] %vm1249_vm4, %v1230_v57  ;;  %v1047_v59 = vmax.f32 %v1045_v58, %v1046_v53 }
  0xe2   : > { %v1179_v62 = vadd.f32 %v1813_v56, %v1047_v59 }
  0xe4   : > { %v1205_v63 = vmax.f32 %v1179_v62, 0.0  ;;  %v876_v1 = vpop.f32.mrf.mxu2  ;;  %v941_v2 = vpop.f32.mrf.mxu3 }
  0xe5   : > { %v1051_v3 = vsel %vm984_vm3, %v876_v1, -inf  ;;  %v749_v4 = vpop.f32.mrf.mxu0  ;;  %v814_v5 = vpop.f32.mrf.mxu1  ;;  %v1053_v8 = vsel %vm984_vm3, %v941_v2, -inf }
  0xe6   : > { %v1231_v6 = vpack.c.bf16 %v1205_v63, %v1205_v63  ;;  %v1052_v7 = vmax.f32 %v1050_v0, %v1051_v3  ;;  %v1055_v9 = vsel %vm984_vm3, %v749_v4, -inf  ;;  %v1056_v10 = vsel %vm984_vm3, %v814_v5, -inf }
  0xe7   : > { %v1057_v13 = vmax.f32 %v1055_v9, %v1056_v10 }
  0xe8   : > { %1258 = vst.msk [vmem:[%s1824_s29 + $0x20] sm:$0xf] %vm1249_vm4, %v1231_v6  ;;  %v1054_v11 = vmax.f32 %v1052_v7, %v1053_v8 }
  0xea   : > { %v1180_v12 = vadd.f32 %v1813_v56, %v1054_v11 }
  0xec   : > { %v1206_v14 = vmax.f32 %v1180_v12, 0.0  ;;  %v879_v15 = vpop.f32.mrf.mxu2  ;;  %v944_v16 = vpop.f32.mrf.mxu3 }
  0xed   : > { %v1058_v17 = vsel %vm984_vm3, %v879_v15, -inf  ;;  %v1060_v18 = vsel %vm984_vm3, %v944_v16, -inf  ;;  %v751_v19 = vpop.f32.mrf.mxu0  ;;  %v816_v20 = vpop.f32.mrf.mxu1 }
  0xee   : > { %v1232_v21 = vpack.c.bf16 %v1206_v14, %v1206_v14  ;;  %v1059_v22 = vmax.f32 %v1057_v13, %v1058_v17  ;;  %v1062_v24 = vsel %vm984_vm3, %v751_v19, -inf  ;;  %v1063_v25 = vsel %vm984_vm3, %v816_v20, -inf }
  0xef   : > { %v1064_v28 = vmax.f32 %v1062_v24, %v1063_v25 }
  0xf0   : > { %1259 = vst.msk [vmem:[%s1824_s29 + $0x24] sm:$0xf] %vm1249_vm4, %v1232_v21  ;;  %v1061_v23 = vmax.f32 %v1059_v22, %v1060_v18 }
  0xf2   : > { %v1181_v26 = vadd.f32 %v1813_v56, %v1061_v23 }
  0xf4   : > { %v1207_v27 = vmax.f32 %v1181_v26, 0.0  ;;  %v881_v29 = vpop.f32.mrf.mxu2  ;;  %v946_v30 = vpop.f32.mrf.mxu3 }
  0xf5   : > { %v1065_v31 = vsel %vm984_vm3, %v881_v29, -inf  ;;  %v754_v32 = vpop.f32.mrf.mxu0  ;;  %v819_v33 = vpop.f32.mrf.mxu1  ;;  %v1067_v36 = vsel %vm984_vm3, %v946_v30, -inf }
  0xf6   : > { %v1233_v34 = vpack.c.bf16 %v1207_v27, %v1207_v27  ;;  %v1066_v35 = vmax.f32 %v1064_v28, %v1065_v31  ;;  %v1069_v37 = vsel %vm984_vm3, %v754_v32, -inf  ;;  %v1070_v38 = vsel %vm984_vm3, %v819_v33, -inf }
  0xf7   : > { %v1071_v41 = vmax.f32 %v1069_v37, %v1070_v38 }
  0xf8   : > { %1260 = vst.msk [vmem:[%s1824_s29 + $0x28] sm:$0xf] %vm1249_vm4, %v1233_v34  ;;  %v1068_v39 = vmax.f32 %v1066_v35, %v1067_v36 }
  0xfa   : > { %v1182_v40 = vadd.f32 %v1813_v56, %v1068_v39 }
  0xfc   : > { %v1208_v42 = vmax.f32 %v1182_v40, 0.0  ;;  %v884_v43 = vpop.f32.mrf.mxu2  ;;  %v949_v44 = vpop.f32.mrf.mxu3 }
  0xfd   : > { %v1072_v45 = vsel %vm984_vm3, %v884_v43, -inf  ;;  %v1074_v46 = vsel %vm984_vm3, %v949_v44, -inf  ;;  %v756_v47 = vpop.f32.mrf.mxu0  ;;  %v821_v48 = vpop.f32.mrf.mxu1 }
  0xfe   : > { %v1234_v49 = vpack.c.bf16 %v1208_v42, %v1208_v42  ;;  %v1073_v50 = vmax.f32 %v1071_v41, %v1072_v45  ;;  %v1076_v52 = vsel %vm984_vm3, %v756_v47, -inf  ;;  %v1077_v53 = vsel %vm984_vm3, %v821_v48, -inf }
  0xff   : > { %v1078_v57 = vmax.f32 %v1076_v52, %v1077_v53 }
 0x100   : > { %1261 = vst.msk [vmem:[%s1824_s29 + $0x2c] sm:$0xf] %vm1249_vm4, %v1234_v49  ;;  %v1075_v51 = vmax.f32 %v1073_v50, %v1074_v46 }
 0x102   : > { %v1183_v54 = vadd.f32 %v1813_v56, %v1075_v51 }
 0x104   : > { %v1209_v55 = vmax.f32 %v1183_v54, 0.0  ;;  %v886_v58 = vpop.f32.mrf.mxu2  ;;  %v951_v59 = vpop.f32.mrf.mxu3 }
 0x105   : > { %v1079_v60 = vsel %vm984_vm3, %v886_v58, -inf  ;;  %v759_v61 = vpop.f32.mrf.mxu0  ;;  %v824_v62 = vpop.f32.mrf.mxu1  ;;  %v1081_v1 = vsel %vm984_vm3, %v951_v59, -inf }
 0x106   : > { %v1235_v63 = vpack.c.bf16 %v1209_v55, %v1209_v55  ;;  %v1080_v0 = vmax.f32 %v1078_v57, %v1079_v60  ;;  %v1083_v2 = vsel %vm984_vm3, %v759_v61, -inf  ;;  %v1084_v3 = vsel %vm984_vm3, %v824_v62, -inf }
 0x107   : > { %v1085_v6 = vmax.f32 %v1083_v2, %v1084_v3 }
 0x108   : > { %1262 = vst.msk [vmem:[%s1824_s29 + $0x30] sm:$0xf] %vm1249_vm4, %v1235_v63  ;;  %v1082_v4 = vmax.f32 %v1080_v0, %v1081_v1 }
 0x10a   : > { %v1184_v5 = vadd.f32 %v1813_v56, %v1082_v4 }
 0x10c   : > { %v1210_v7 = vmax.f32 %v1184_v5, 0.0  ;;  %v889_v8 = vpop.f32.mrf.mxu2  ;;  %v954_v9 = vpop.f32.mrf.mxu3 }
 0x10d   : > { %v1086_v10 = vsel %vm984_vm3, %v889_v8, -inf  ;;  %v1088_v11 = vsel %vm984_vm3, %v954_v9, -inf  ;;  %v761_v12 = vpop.f32.mrf.mxu0  ;;  %v826_v13 = vpop.f32.mrf.mxu1 }
 0x10e   : > { %v1236_v14 = vpack.c.bf16 %v1210_v7, %v1210_v7  ;;  %v1087_v15 = vmax.f32 %v1085_v6, %v1086_v10  ;;  %v1090_v17 = vsel %vm984_vm3, %v761_v12, -inf  ;;  %v1091_v18 = vsel %vm984_vm3, %v826_v13, -inf }
 0x10f   : > { %v1092_v21 = vmax.f32 %v1090_v17, %v1091_v18 }
 0x110   : > { %1263 = vst.msk [vmem:[%s1824_s29 + $0x34] sm:$0xf] %vm1249_vm4, %v1236_v14  ;;  %v1089_v16 = vmax.f32 %v1087_v15, %v1088_v11 }
 0x112   : > { %v1185_v19 = vadd.f32 %v1813_v56, %v1089_v16 }
 0x114   : > { %v1211_v20 = vmax.f32 %v1185_v19, 0.0  ;;  %v891_v22 = vpop.f32.mrf.mxu2  ;;  %v956_v23 = vpop.f32.mrf.mxu3 }
 0x115   : > { %v1093_v24 = vsel %vm984_vm3, %v891_v22, -inf  ;;  %v764_v25 = vpop.f32.mrf.mxu0  ;;  %v829_v26 = vpop.f32.mrf.mxu1  ;;  %v1095_v29 = vsel %vm984_vm3, %v956_v23, -inf }
 0x116   : > { %v1237_v27 = vpack.c.bf16 %v1211_v20, %v1211_v20  ;;  %v1094_v28 = vmax.f32 %v1092_v21, %v1093_v24  ;;  %v1097_v30 = vsel %vm984_vm3, %v764_v25, -inf  ;;  %v1098_v31 = vsel %vm984_vm3, %v829_v26, -inf }
 0x117   : > { %v1099_v34 = vmax.f32 %v1097_v30, %v1098_v31 }
 0x118   : > { %1264 = vst.msk [vmem:[%s1824_s29 + $0x38] sm:$0xf] %vm1249_vm4, %v1237_v27  ;;  %v1096_v32 = vmax.f32 %v1094_v28, %v1095_v29 }
 0x11a   : > { %v1186_v33 = vadd.f32 %v1813_v56, %v1096_v32 }
 0x11c   : > { %v1212_v35 = vmax.f32 %v1186_v33, 0.0  ;;  %v894_v36 = vpop.f32.mrf.mxu2  ;;  %v959_v37 = vpop.f32.mrf.mxu3 }
 0x11d   : > { %v1100_v38 = vsel %vm984_vm3, %v894_v36, -inf  ;;  %v1102_v39 = vsel %vm984_vm3, %v959_v37, -inf  ;;  %v766_v40 = vpop.f32.mrf.mxu0  ;;  %v831_v41 = vpop.f32.mrf.mxu1 }
 0x11e   : > { %v1238_v42 = vpack.c.bf16 %v1212_v35, %v1212_v35  ;;  %v1101_v43 = vmax.f32 %v1099_v34, %v1100_v38  ;;  %v1104_v45 = vsel %vm984_vm3, %v766_v40, -inf  ;;  %v1105_v46 = vsel %vm984_vm3, %v831_v41, -inf }
 0x11f   : > { %v1106_v49 = vmax.f32 %v1104_v45, %v1105_v46 }
 0x120   : > { %1265 = vst.msk [vmem:[%s1824_s29 + $0x3c] sm:$0xf] %vm1249_vm4, %v1238_v42  ;;  %v1103_v44 = vmax.f32 %v1101_v43, %v1102_v39 }
 0x122   : > { %v1187_v47 = vadd.f32 %v1813_v56, %v1103_v44 }
 0x124   : > { %v1213_v48 = vmax.f32 %v1187_v47, 0.0  ;;  %v896_v50 = vpop.f32.mrf.mxu2  ;;  %v961_v51 = vpop.f32.mrf.mxu3 }
 0x125   : > { %v1107_v52 = vsel %vm984_vm3, %v896_v50, -inf  ;;  %v769_v53 = vpop.f32.mrf.mxu0  ;;  %v834_v54 = vpop.f32.mrf.mxu1  ;;  %v1109_v58 = vsel %vm984_vm3, %v961_v51, -inf }
 0x126   : > { %v1239_v55 = vpack.c.bf16 %v1213_v48, %v1213_v48  ;;  %v1108_v57 = vmax.f32 %v1106_v49, %v1107_v52  ;;  %v1111_v59 = vsel %vm984_vm3, %v769_v53, -inf  ;;  %v1112_v60 = vsel %vm984_vm3, %v834_v54, -inf }
 0x127   : > { %v1113_v63 = vmax.f32 %v1111_v59, %v1112_v60 }
 0x128   : > { %1266 = vst.msk [vmem:[%s1824_s29 + $0x40] sm:$0xf] %vm1249_vm4, %v1239_v55  ;;  %v1110_v61 = vmax.f32 %v1108_v57, %v1109_v58 }
 0x12a   : > { %v1188_v62 = vadd.f32 %v1813_v56, %v1110_v61 }
 0x12c   : > { %v1214_v0 = vmax.f32 %v1188_v62, 0.0  ;;  %v899_v1 = vpop.f32.mrf.mxu2  ;;  %v964_v2 = vpop.f32.mrf.mxu3 }
 0x12d   : > { %v1114_v3 = vsel %vm984_vm3, %v899_v1, -inf  ;;  %v1116_v4 = vsel %vm984_vm3, %v964_v2, -inf  ;;  %v771_v5 = vpop.f32.mrf.mxu0  ;;  %v836_v6 = vpop.f32.mrf.mxu1 }
 0x12e   : > { %v1240_v7 = vpack.c.bf16 %v1214_v0, %v1214_v0  ;;  %v1115_v8 = vmax.f32 %v1113_v63, %v1114_v3  ;;  %v1118_v10 = vsel %vm984_vm3, %v771_v5, -inf  ;;  %v1119_v11 = vsel %vm984_vm3, %v836_v6, -inf }
 0x12f   : > { %v1120_v14 = vmax.f32 %v1118_v10, %v1119_v11 }
 0x130   : > { %1267 = vst.msk [vmem:[%s1824_s29 + $0x44] sm:$0xf] %vm1249_vm4, %v1240_v7  ;;  %v1117_v9 = vmax.f32 %v1115_v8, %v1116_v4 }
 0x132   : > { %v1189_v12 = vadd.f32 %v1813_v56, %v1117_v9 }
 0x134   : > { %v1215_v13 = vmax.f32 %v1189_v12, 0.0  ;;  %v901_v15 = vpop.f32.mrf.mxu2  ;;  %v966_v16 = vpop.f32.mrf.mxu3 }
 0x135   : > { %v1121_v17 = vsel %vm984_vm3, %v901_v15, -inf  ;;  %v774_v18 = vpop.f32.mrf.mxu0  ;;  %v839_v19 = vpop.f32.mrf.mxu1  ;;  %v1123_v22 = vsel %vm984_vm3, %v966_v16, -inf }
 0x136   : > { %v1241_v20 = vpack.c.bf16 %v1215_v13, %v1215_v13  ;;  %v1122_v21 = vmax.f32 %v1120_v14, %v1121_v17  ;;  %v1125_v23 = vsel %vm984_vm3, %v774_v18, -inf  ;;  %v1126_v24 = vsel %vm984_vm3, %v839_v19, -inf }
 0x137   : > { %v1127_v27 = vmax.f32 %v1125_v23, %v1126_v24 }
 0x138   : > { %1268 = vst.msk [vmem:[%s1824_s29 + $0x48] sm:$0xf] %vm1249_vm4, %v1241_v20  ;;  %v1124_v25 = vmax.f32 %v1122_v21, %v1123_v22 }
 0x13a   : > { %v1190_v26 = vadd.f32 %v1813_v56, %v1124_v25 }
 0x13c   : > { %v1216_v28 = vmax.f32 %v1190_v26, 0.0  ;;  %v904_v29 = vpop.f32.mrf.mxu2  ;;  %v969_v30 = vpop.f32.mrf.mxu3 }
 0x13d   : > { %v1128_v31 = vsel %vm984_vm3, %v904_v29, -inf  ;;  %v1130_v32 = vsel %vm984_vm3, %v969_v30, -inf  ;;  %v776_v33 = vpop.f32.mrf.mxu0  ;;  %v841_v34 = vpop.f32.mrf.mxu1 }
 0x13e   : > { %v1242_v35 = vpack.c.bf16 %v1216_v28, %v1216_v28  ;;  %v1129_v36 = vmax.f32 %v1127_v27, %v1128_v31  ;;  %v1132_v38 = vsel %vm984_vm3, %v776_v33, -inf  ;;  %v1133_v39 = vsel %vm984_vm3, %v841_v34, -inf }
 0x13f   : > { %v1134_v42 = vmax.f32 %v1132_v38, %v1133_v39 }
 0x140   : > { %1269 = vst.msk [vmem:[%s1824_s29 + $0x4c] sm:$0xf] %vm1249_vm4, %v1242_v35  ;;  %v1131_v37 = vmax.f32 %v1129_v36, %v1130_v32 }
 0x142   : > { %v1191_v40 = vadd.f32 %v1813_v56, %v1131_v37 }
 0x144   : > { %v1217_v41 = vmax.f32 %v1191_v40, 0.0  ;;  %v906_v43 = vpop.f32.mrf.mxu2  ;;  %v971_v44 = vpop.f32.mrf.mxu3 }
 0x145   : > { %v1135_v45 = vsel %vm984_vm3, %v906_v43, -inf  ;;  %v779_v46 = vpop.f32.mrf.mxu0  ;;  %v844_v47 = vpop.f32.mrf.mxu1  ;;  %v1137_v50 = vsel %vm984_vm3, %v971_v44, -inf }
 0x146   : > { %v1243_v48 = vpack.c.bf16 %v1217_v41, %v1217_v41  ;;  %v1136_v49 = vmax.f32 %v1134_v42, %v1135_v45  ;;  %v1139_v51 = vsel %vm984_vm3, %v779_v46, -inf  ;;  %v1140_v52 = vsel %vm984_vm3, %v844_v47, -inf }
 0x147   : > { %v1141_v55 = vmax.f32 %v1139_v51, %v1140_v52 }
 0x148   : > { %1270 = vst.msk [vmem:[%s1824_s29 + $0x50] sm:$0xf] %vm1249_vm4, %v1243_v48  ;;  %v1138_v53 = vmax.f32 %v1136_v49, %v1137_v50 }
 0x14a   : > { %v1192_v54 = vadd.f32 %v1813_v56, %v1138_v53 }
 0x14c   : > { %v1218_v57 = vmax.f32 %v1192_v54, 0.0  ;;  %v909_v58 = vpop.f32.mrf.mxu2  ;;  %v974_v59 = vpop.f32.mrf.mxu3 }
 0x14d   : > { %v1142_v60 = vsel %vm984_vm3, %v909_v58, -inf  ;;  %v1144_v61 = vsel %vm984_vm3, %v974_v59, -inf  ;;  %v781_v62 = vpop.f32.mrf.mxu0  ;;  %v846_v63 = vpop.f32.mrf.mxu1 }
 0x14e   : > { %v1244_v0 = vpack.c.bf16 %v1218_v57, %v1218_v57  ;;  %v1143_v1 = vmax.f32 %v1141_v55, %v1142_v60  ;;  %v1146_v3 = vsel %vm984_vm3, %v781_v62, -inf  ;;  %v1147_v4 = vsel %vm984_vm3, %v846_v63, -inf }
 0x14f   : > { %v1148_v7 = vmax.f32 %v1146_v3, %v1147_v4 }
 0x150   : > { %1271 = vst.msk [vmem:[%s1824_s29 + $0x54] sm:$0xf] %vm1249_vm4, %v1244_v0  ;;  %v1145_v2 = vmax.f32 %v1143_v1, %v1144_v61 }
 0x152   : > { %v1193_v5 = vadd.f32 %v1813_v56, %v1145_v2 }
 0x154   : > { %v1219_v6 = vmax.f32 %v1193_v5, 0.0  ;;  %v911_v8 = vpop.f32.mrf.mxu2  ;;  %v976_v9 = vpop.f32.mrf.mxu3 }
 0x155   : > { %v1149_v10 = vsel %vm984_vm3, %v911_v8, -inf  ;;  %v784_v11 = vpop.f32.mrf.mxu0  ;;  %v849_v12 = vpop.f32.mrf.mxu1  ;;  %v1151_v15 = vsel %vm984_vm3, %v976_v9, -inf }
 0x156   : > { %v1245_v13 = vpack.c.bf16 %v1219_v6, %v1219_v6  ;;  %v1150_v14 = vmax.f32 %v1148_v7, %v1149_v10  ;;  %v1153_v16 = vsel %vm984_vm3, %v784_v11, -inf  ;;  %v1154_v17 = vsel %vm984_vm3, %v849_v12, -inf }
 0x157   : > { %v1155_v20 = vmax.f32 %v1153_v16, %v1154_v17 }
 0x158   : > { %1272 = vst.msk [vmem:[%s1824_s29 + $0x58] sm:$0xf] %vm1249_vm4, %v1245_v13  ;;  %v1152_v18 = vmax.f32 %v1150_v14, %v1151_v15 }
 0x15a   : > { %v1194_v19 = vadd.f32 %v1813_v56, %v1152_v18 }
 0x15c   : > { %v1220_v21 = vmax.f32 %v1194_v19, 0.0  ;;  %v914_v22 = vpop.f32.mrf.mxu2  ;;  %v979_v23 = vpop.f32.mrf.mxu3 }
 0x15d   : > { %v1156_v24 = vsel %vm984_vm3, %v914_v22, -inf  ;;  %v1158_v25 = vsel %vm984_vm3, %v979_v23, -inf  ;;  %v786_v28 = vpop.f32.mrf.mxu0  ;;  %v851_v29 = vpop.f32.mrf.mxu1 }
 0x15e   : > { %v1246_v26 = vpack.c.bf16 %v1220_v21, %v1220_v21  ;;  %v1157_v27 = vmax.f32 %v1155_v20, %v1156_v24  ;;  %v1160_v31 = vsel %vm984_vm3, %v786_v28, -inf  ;;  %v1161_v32 = vsel %vm984_vm3, %v851_v29, -inf }
 0x15f   : > { %v1162_v35 = vmax.f32 %v1160_v31, %v1161_v32 }
 0x160   : > { %1273 = vst.msk [vmem:[%s1824_s29 + $0x5c] sm:$0xf] %vm1249_vm4, %v1246_v26  ;;  %v1159_v30 = vmax.f32 %v1157_v27, %v1158_v25 }
 0x162   : > { %v1195_v33 = vadd.f32 %v1813_v56, %v1159_v30 }
 0x164   : > { %v1221_v34 = vmax.f32 %v1195_v33, 0.0  ;;  %v916_v36 = vpop.f32.mrf.mxu2  ;;  %v981_v37 = vpop.f32.mrf.mxu3 }
 0x165   : > { %v1163_v38 = vsel %vm984_vm3, %v916_v36, -inf  ;;  %v1165_v41 = vsel %vm984_vm3, %v981_v37, -inf }
 0x166   : > { %v1247_v39 = vpack.c.bf16 %v1221_v34, %v1221_v34  ;;  %v1164_v40 = vmax.f32 %v1162_v35, %v1163_v38 }
 0x168   : > { %1274 = vst.msk [vmem:[%s1824_s29 + $0x60] sm:$0xf] %vm1249_vm4, %v1247_v39  ;;  %v1166_v42 = vmax.f32 %v1164_v40, %v1165_v41 }
 0x16a   : > { %v1196_v43 = vadd.f32 %v1813_v56, %v1166_v42 }
 0x16c   : > { %v1222_v44 = vmax.f32 %v1196_v43, 0.0 }
 0x16e   : > { %v1248_v45 = vpack.c.bf16 %v1222_v44, %v1222_v44 }
 0x170   : > { %1275 = vst.msk [vmem:[%s1824_s29 + $0x64] sm:$0xf] %vm1249_vm4, %v1248_v45 }
 0x171 PF: > { %s13_s12 = sadd.s32 1, %s1686_s12  }
 0x172   : > { %p10_p4 = scmp.ge.s32.totalorder %s13_s12, 4  }
 0x174   :  { %12 = sbr.rel (!%p10_p4) target bundleno = 1 (0x1), region = 62 }

// kernel: _lambda_.5
= control target key start
LH: loop header
LB: loop body
LE: loop exit
PB: predicated region body
PF: predicated region fallthrough
CT: control target
= control target key end

     0   :  { %s2980_s12 = smov 0   ;;  %s3788_s0 = inlined_call_operand.vmem [shape: bf16[2,4,64,800], index: 0, kind: input, shape index: {}]   ;;  %s3789_s1 = inlined_call_operand.vmem [shape: bf16[800,64], index: 1, kind: input, shape index: {}]   ;;  %s3790_s2 = inlined_call_operand.vmem [shape: f32[1,1,64], index: 2, kind: input, shape index: {}]   ;;  %s3791_s3 = inlined_call_operand.vmem [shape: bf16[2,64,64], index: 3, kind: output, shape index: {}]  }
   0x1 LB: > { %s2081_s13 = sadd.s32 4294967295, %s2958_s12   ;;  %p2085_p0 = scmp.ge.s32.totalorder %s2958_s12, 1  ;;  %s2958_s12 = sphi %s2980_s12, %s13_s12  }
   0x2   : > { %p137_p1 = scmp.lt.s32.totalorder %s2958_s12, 3 }
   0x4   : > { %p138_p2 = pnand %p2085_p0, %p137_p1 }
   0x5   : > { %p161_p3 = scmp.lt.s32.totalorder (!%p138_p2), %s2081_s13, 1 }
   0x6   : > { %141 = sbr.rel (%p138_p2) target bundleno = 633 (0x279), region = 32 }
   0xb   : > { %v2875_v0 = vld [vmem:[%s3789_s1 + $0x38] sm:$0xff]  ;;  %v2874_v3 = vld [vmem:[%s3789_s1 + $0x30] sm:$0xff]  ;;  %v2873_v6 = vld [vmem:[%s3789_s1 + $0x28] sm:$0xff]  ;;  %s3793_s13 = smov (!%p161_p3, %s2081_s13), 1  ;;  %vm1260_vm0 = vcmask 261120   ;;  %vm1932_vm1 = vcmask 523264  }
   0xc   : > { %v2994_v1 = vld [vmem:[%s3789_s1 + $0x78] sm:$0xff]  ;;  %1309 = vmatpush.bf16.msra.mxu0 %v2875_v0  ;;  %2918 = vmatpush.bf16.msra.mxu3 %v2875_v0  ;;  %v3009_v4 = vld [vmem:[%s3789_s1 + $0x70] sm:$0xff]  ;;  %v3024_v7 = vld [vmem:[%s3789_s1 + $0x68] sm:$0xff]  ;;  %s2942_s21 = smul.u32 896, %s3793_s13  ;;  %vm2017_vm2 = vcmask 519168  }
   0xd   : > { %v2999_v2 = vld [vmem:[%s3789_s1 + $0xb8] sm:$0xff]  ;;  %1398 = vmatpush.bf16.msra.mxu1 %v2994_v1  ;;  %v3014_v5 = vld [vmem:[%s3789_s1 + $0xb0] sm:$0xff]  ;;  %v3029_v8 = vld [vmem:[%s3789_s1 + $0xa8] sm:$0xff] }
   0xe   : > { %1487 = vmatpush.bf16.msra.mxu2 %v2999_v2  ;;  %v2872_v9 = vld [vmem:[%s3789_s1 + $0x20] sm:$0xff]  ;;  %v2871_v12 = vld [vmem:[%s3789_s1 + $0x18] sm:$0xff]  ;;  %v2870_v15 = vld [vmem:[%s3789_s1 + $0x10] sm:$0xff]  ;;  %s3089_s30 = scalar_lea.vmem %s3788_s0, %s2942_s21  ;;  %s2755_s21 = sshll.u32 %s3793_s13, 5 }
   0xf   : > { %v3041_v10 = vld [vmem:[%s3789_s1 + $0x60] sm:$0xff]  ;;  %v3060_v13 = vld [vmem:[%s3789_s1 + $0x58] sm:$0xff]  ;;  %v3076_v16 = vld [vmem:[%s3789_s1 + $0x50] sm:$0xff]  ;;  %s3740_s24 = scalar_lea.vmem %s3791_s3, %s2755_s21 }
  0x10   : > { %1310 = vmatpush.bf16.msra.mxu0 %v2874_v3  ;;  %2919 = vmatpush.bf16.msra.mxu3 %v2874_v3  ;;  %v3046_v11 = vld [vmem:[%s3789_s1 + $0xa0] sm:$0xff]  ;;  %v3065_v14 = vld [vmem:[%s3789_s1 + $0x98] sm:$0xff]  ;;  %v3081_v17 = vld [vmem:[%s3789_s1 + $0x90] sm:$0xff] }
  0x11   : > { %1399 = vmatpush.bf16.msra.mxu1 %v3009_v4  ;;  %v2869_v18 = vld [vmem:[%s3789_s1 + $0x8] sm:$0xff]  ;;  %v2868_v21 = vld [vmem:[%s3789_s1] sm:$0xff]  ;;  %v2759_v25 = vld [vmem:[%s3089_s30 + $0x18] sm:$0xf0] }
  0x12   : > { %1488 = vmatpush.bf16.msra.mxu2 %v3014_v5  ;;  %v3096_v19 = vld [vmem:[%s3789_s1 + $0x48] sm:$0xff]  ;;  %v3109_v22 = vld [vmem:[%s3789_s1 + $0x40] sm:$0xff]  ;;  %v2843_v27 = vld [vmem:[%s3089_s30 + $0x2b8] sm:$0xf0] }
  0x13   : > { %v3101_v20 = vld [vmem:[%s3789_s1 + $0x88] sm:$0xff]  ;;  %v3114_v23 = vld [vmem:[%s3789_s1 + $0x80] sm:$0xff]  ;;  %v2907_v37 = vld [vmem:[%s3789_s1 + $0x138] sm:$0xff] }
  0x14   : > { %1311 = vmatpush.bf16.msra.mxu0 %v2873_v6  ;;  %2920 = vmatpush.bf16.msra.mxu3 %v2873_v6  ;;  %v2091_v24 = vld [vmem:[%s3089_s30] sm:$0xf]  ;;  %v2756_v28 = vld [vmem:[%s3089_s30 + $0x4] sm:$0xf]  ;;  %v2099_v30 = vld [vmem:[%s3089_s30 + $0x8] sm:$0xf] }
  0x15   : > { %1400 = vmatpush.bf16.msra.mxu1 %v3024_v7  ;;  %v2427_v26 = vld [vmem:[%s3089_s30 + $0x2a0] sm:$0xf]  ;;  %v2760_v31 = vld [vmem:[%s3089_s30 + $0x20] sm:$0xf0]  ;;  %v2917_v32 = vld [vmem:[%s3789_s1 + $0x188] sm:$0xff]  ;;  %v2092_v33 = vor.u32 %v2759_v25, %v2091_v24 }
  0x16   : > { %1489 = vmatpush.bf16.msra.mxu2 %v3029_v8  ;;  %v2093_v29 = vld [vmem:[%s3089_s30 + $0x1c] sm:$0xf0]  ;;  %v2428_v34 = vor.u32 %v2843_v27, %v2427_v26  ;;  %v2100_v36 = vor.u32 %v2760_v31, %v2099_v30  ;;  %v2915_v38 = vld [vmem:[%s3789_s1 + $0x178] sm:$0xff]  ;;  %v2906_v39 = vld [vmem:[%s3789_s1 + $0x130] sm:$0xff] }
  0x17   : > { %v2096_v35 = vor.u32 %v2756_v28, %v2093_v29  ;;  %v2914_v40 = vld [vmem:[%s3789_s1 + $0x170] sm:$0xff]  ;;  %v2119_v41 = vld [vmem:[%s3089_s30 + $0x38] sm:$0xf]  ;;  %v2763_v45 = vld [vmem:[%s3089_s30 + $0x3c] sm:$0xf] }
  0x18   : > { %1312 = vmatpush.bf16.msra.mxu0 %v2872_v9  ;;  %2921 = vmatpush.bf16.msra.mxu3 %v2872_v9  ;;  %v2766_v42 = vld [vmem:[%s3089_s30 + $0x50] sm:$0xf0]  ;;  %v2455_v43 = vld [vmem:[%s3089_s30 + $0x2d8] sm:$0xf]  ;;  %v2127_v47 = vld [vmem:[%s3089_s30 + $0x40] sm:$0xf] }
  0x19   : > { %1401 = vmatpush.bf16.msra.mxu1 %v3041_v10  ;;  %v2850_v44 = vld [vmem:[%s3089_s30 + $0x2f0] sm:$0xf0]  ;;  %v2121_v46 = vld [vmem:[%s3089_s30 + $0x54] sm:$0xf0]  ;;  %v2767_v48 = vld [vmem:[%s3089_s30 + $0x58] sm:$0xf0]  ;;  %v2120_v49 = vor.u32 %v2766_v42, %v2119_v41 }
  0x1a   : > { %1490 = vmatpush.bf16.msra.mxu2 %v3046_v11  ;;  %v2456_v50 = vor.u32 %v2850_v44, %v2455_v43  ;;  %v2124_v51 = vor.u32 %v2763_v45, %v2121_v46  ;;  %v2128_v52 = vor.u32 %v2767_v48, %v2127_v47  ;;  %v2905_v53 = vld [vmem:[%s3789_s1 + $0x128] sm:$0xff]  ;;  %v2147_v55 = vld [vmem:[%s3089_s30 + $0x70] sm:$0xf]  ;;  %v2770_v59 = vld [vmem:[%s3089_s30 + $0x74] sm:$0xf] }
  0x1b   : > { %v2913_v54 = vld [vmem:[%s3789_s1 + $0x168] sm:$0xff]  ;;  %v2483_v57 = vld [vmem:[%s3089_s30 + $0x310] sm:$0xf]  ;;  %v2155_v61 = vld [vmem:[%s3089_s30 + $0x78] sm:$0xf] }
  0x1c   : > { %1313 = vmatpush.bf16.msra.mxu0 %v2871_v12  ;;  %2922 = vmatpush.bf16.msra.mxu3 %v2871_v12  ;;  %v2773_v56 = vld [vmem:[%s3089_s30 + $0x88] sm:$0xf0]  ;;  %v2149_v60 = vld [vmem:[%s3089_s30 + $0x8c] sm:$0xf0]  ;;  %v2774_v62 = vld [vmem:[%s3089_s30 + $0x90] sm:$0xf0] }
  0x1d   : > { %1402 = vmatpush.bf16.msra.mxu1 %v3060_v13  ;;  %v2857_v58 = vld [vmem:[%s3089_s30 + $0x328] sm:$0xf0]  ;;  %v2148_v63 = vor.u32 %v2773_v56, %v2147_v55  ;;  %v2156_v3 = vor.u32 %v2774_v62, %v2155_v61  ;;  %v2780_v6 = vld [vmem:[%s3089_s30 + $0xc0] sm:$0xf0]  ;;  %v2177_v12 = vld [vmem:[%s3089_s30 + $0xc4] sm:$0xf0] }
  0x1e   : > { %1491 = vmatpush.bf16.msra.mxu2 %v3065_v14  ;;  %v2484_v0 = vor.u32 %v2857_v58, %v2483_v57  ;;  %v2864_v9 = vld [vmem:[%s3089_s30 + $0x360] sm:$0xf0]  ;;  %v2429_v24 = vld [vmem:[%s3089_s30 + $0x2bc] sm:$0xf0]  ;;  %v2211_v26 = vld [vmem:[%s3089_s30 + $0xe8] sm:$0xf] }
  0x1f   : > { %v2205_v25 = vld [vmem:[%s3089_s30 + $0xfc] sm:$0xf0]  ;;  %v2788_v27 = vld [vmem:[%s3089_s30 + $0x100] sm:$0xf0]  ;;  %v2911_v31 = vld [vmem:[%s3789_s1 + $0x158] sm:$0xff] }
  0x20   : > { %1314 = vmatpush.bf16.msra.mxu0 %v2870_v15  ;;  %2923 = vmatpush.bf16.msra.mxu3 %v2870_v15  ;;  %v2781_v15 = vld [vmem:[%s3089_s30 + $0xc8] sm:$0xf0]  ;;  %v2212_v30 = vor.u32 %v2788_v27, %v2211_v26  ;;  %v2259_v44 = vld [vmem:[%s3089_s30 + $0x150] sm:$0xf]  ;;  %v2798_v46 = vld [vmem:[%s3089_s30 + $0x154] sm:$0xf] }
  0x21   : > { %1403 = vmatpush.bf16.msra.mxu1 %v3076_v16  ;;  %v2801_v45 = vld [vmem:[%s3089_s30 + $0x168] sm:$0xf0]  ;;  %v2854_v47 = vld [vmem:[%s3089_s30 + $0x314] sm:$0xf]  ;;  %v2485_v48 = vld [vmem:[%s3089_s30 + $0x32c] sm:$0xf0] }
  0x22   : > { %1492 = vmatpush.bf16.msra.mxu2 %v3081_v17  ;;  %v2899_v56 = vld [vmem:[%s3789_s1 + $0xf8] sm:$0xff]  ;;  %v2902_v57 = vld [vmem:[%s3789_s1 + $0x110] sm:$0xff]  ;;  %v2808_v61 = vld [vmem:[%s3089_s30 + $0x1a0] sm:$0xf0] }
  0x23   : > { %v2910_v58 = vld [vmem:[%s3789_s1 + $0x150] sm:$0xff]  ;;  %v2805_v62 = vld [vmem:[%s3089_s30 + $0x18c] sm:$0xf] }
  0x24   : > { %1315 = vmatpush.bf16.msra.mxu0 %v2869_v18  ;;  %2924 = vmatpush.bf16.msra.mxu3 %v2869_v18 }
  0x25   : > { %1404 = vmatpush.bf16.msra.mxu1 %v3096_v19 }
  0x26   : > { %1493 = vmatpush.bf16.msra.mxu2 %v3101_v20 }
  0x28   : > { %1316 = vmatpush.bf16.msra.mxu0 %v2868_v21  ;;  %2925 = vmatpush.bf16.msra.mxu3 %v2868_v21  ;;  %v2784_v21 = vld [vmem:[%s3089_s30 + $0xe4] sm:$0xf] }
  0x29   : > { %1405 = vmatpush.bf16.msra.mxu1 %v3109_v22 }
  0x2a   : > { %1494 = vmatpush.bf16.msra.mxu2 %v3114_v23 }
  0x2b   : > { %1317 = vmatmul.bf16.vlgmr.msra.gmra.mxu0 %v2092_v33  ;;  %1377 = vmatmul.bf16.vlgmr.msra.gmra.mxu3 %v2428_v34  ;;  %v2794_v33 = vld [vmem:[%s3089_s30 + $0x130] sm:$0xf0]  ;;  %v2791_v34 = vld [vmem:[%s3089_s30 + $0x11c] sm:$0xf] }
  0x2c   : > { %2926 = vmatpush.bf16.msrb.mxu3 %v2994_v1  ;;  %1406 = vmatmul.bf16.vlgmr.msra.gmra.mxu1 %v2096_v35  ;;  %v2152_v1 = vor.u32 %v2770_v59, %v2149_v60  ;;  %v2847_v35 = vld [vmem:[%s3089_s30 + $0x2dc] sm:$0xf]  ;;  %v2898_v59 = vld [vmem:[%s3789_s1 + $0xf0] sm:$0xff]  ;;  %v2287_v60 = vld [vmem:[%s3089_s30 + $0x188] sm:$0xf] }
  0x2d   : > { %1495 = vmatmul.bf16.vlgmr.msra.gmra.mxu2 %v2100_v36  ;;  %1665 = vmatpush.bf16.msrb.mxu0 %v2907_v37  ;;  %v2457_v36 = vld [vmem:[%s3089_s30 + $0x2f4] sm:$0xf0] }
  0x2e   : > { %1849 = vmatpush.bf16.msrb.mxu2 %v2917_v32  ;;  %1754 = vmatpush.bf16.msrb.mxu1 %v2915_v38  ;;  %v2231_v32 = vld [vmem:[%s3089_s30 + $0x118] sm:$0xf]  ;;  %v2239_v38 = vld [vmem:[%s3089_s30 + $0x120] sm:$0xf]  ;;  %v2460_v41 = vor.u32 %v2847_v35, %v2457_v36  ;;  %v2822_v36 = vld [vmem:[%s3089_s30 + $0x210] sm:$0xf0] }
  0x2f   : > { %v2233_v37 = vld [vmem:[%s3089_s30 + $0x134] sm:$0xf0] }
  0x30   : > { %2927 = vmatpush.bf16.msrb.mxu3 %v3009_v4  ;;  %v2175_v4 = vld [vmem:[%s3089_s30 + $0xa8] sm:$0xf]  ;;  %v2236_v42 = vor.u32 %v2791_v34, %v2233_v37  ;;  %v2894_v34 = vld [vmem:[%s3789_s1 + $0xd0] sm:$0xff]  ;;  %v2343_v35 = vld [vmem:[%s3089_s30 + $0x1f8] sm:$0xf] }
  0x31   : > { %1666 = vmatpush.bf16.msrb.mxu0 %v2906_v39  ;;  %v2795_v39 = vld [vmem:[%s3089_s30 + $0x138] sm:$0xf0] }
  0x32   : > { %1755 = vmatpush.bf16.msrb.mxu1 %v2914_v40  ;;  %v2232_v40 = vor.u32 %v2794_v33, %v2231_v32  ;;  %v2240_v43 = vor.u32 %v2795_v39, %v2239_v38  ;;  %v2819_v37 = vld [vmem:[%s3089_s30 + $0x1fc] sm:$0xf]  ;;  %v2463_v38 = vld [vmem:[%s3089_s30 + $0x2e0] sm:$0xf] }
  0x33   : > { %v2851_v39 = vld [vmem:[%s3089_s30 + $0x2f8] sm:$0xf0] }
  0x34   : > { %2928 = vmatpush.bf16.msrb.mxu3 %v3024_v7  ;;  %v2511_v7 = vld [vmem:[%s3089_s30 + $0x348] sm:$0xf] }
  0x35   : > { %1667 = vmatpush.bf16.msrb.mxu0 %v2905_v53  ;;  %v2488_v53 = vor.u32 %v2854_v47, %v2485_v48 }
  0x36   : > { %1756 = vmatpush.bf16.msrb.mxu1 %v2913_v54 }
  0x38   : > { %2929 = vmatpush.bf16.msrb.mxu3 %v3041_v10  ;;  %v2777_v10 = vld [vmem:[%s3089_s30 + $0xac] sm:$0xf] }
  0x39   : > { %v2180_v18 = vor.u32 %v2777_v10, %v2177_v12  ;;  %v2897_v12 = vld [vmem:[%s3789_s1 + $0xe8] sm:$0xff] }
  0x3b   : > { %1322 = vmatmul.bf16.gmra.mxu0 %v2120_v49  ;;  %1382 = vmatmul.bf16.gmra.mxu3 %v2456_v50  ;;  %v2261_v49 = vld [vmem:[%s3089_s30 + $0x16c] sm:$0xf0]  ;;  %v2267_v50 = vld [vmem:[%s3089_s30 + $0x158] sm:$0xf] }
  0x3c   : > { %2930 = vmatpush.bf16.msrb.mxu3 %v3060_v13  ;;  %1411 = vmatmul.bf16.gmra.mxu1 %v2124_v51  ;;  %v2183_v13 = vld [vmem:[%s3089_s30 + $0xb0] sm:$0xf]  ;;  %v2802_v51 = vld [vmem:[%s3089_s30 + $0x170] sm:$0xf0]  ;;  %v2264_v54 = vor.u32 %v2798_v46, %v2261_v49  ;;  %v2464_v46 = vor.u32 %v2851_v39, %v2463_v38 }
  0x3d   : > { %1500 = vmatmul.bf16.gmra.mxu2 %v2128_v52  ;;  %v2260_v52 = vor.u32 %v2801_v45, %v2259_v44  ;;  %v2268_v55 = vor.u32 %v2802_v51, %v2267_v50  ;;  %v2344_v45 = vor.u32 %v2822_v36, %v2343_v35 }
  0x40   : > { %2931 = vmatpush.bf16.msrb.mxu3 %v3076_v16  ;;  %v2512_v16 = vor.u32 %v2864_v9, %v2511_v7 }
  0x44   : > { %2932 = vmatpush.bf16.msrb.mxu3 %v3096_v19  ;;  %v2787_v19 = vld [vmem:[%s3089_s30 + $0xf8] sm:$0xf0] }
  0x48   : > { %2933 = vmatpush.bf16.msrb.mxu3 %v3109_v22  ;;  %v2840_v22 = vld [vmem:[%s3089_s30 + $0x2a4] sm:$0xf] }
  0x49   : > { %v2432_v29 = vor.u32 %v2840_v22, %v2429_v24 }
  0x4b   : > { %1327 = vmatmul.bf16.gmra.mxu0 %v2148_v63  ;;  %1387 = vmatmul.bf16.gmra.mxu3 %v2484_v0  ;;  %v2861_v63 = vld [vmem:[%s3089_s30 + $0x34c] sm:$0xf]  ;;  %v2513_v0 = vld [vmem:[%s3089_s30 + $0x364] sm:$0xf0] }
  0x4c   : > { %2934 = vmatpush.bf16.msra.mxu3 %v2999_v2  ;;  %1416 = vmatmul.bf16.gmra.mxu1 %v2152_v1  ;;  %v2176_v2 = vor.u32 %v2780_v6, %v2175_v4  ;;  %v2289_v1 = vld [vmem:[%s3089_s30 + $0x1a4] sm:$0xf0]  ;;  %v2809_v4 = vld [vmem:[%s3089_s30 + $0x1a8] sm:$0xf0]  ;;  %v2288_v6 = vor.u32 %v2808_v61, %v2287_v60  ;;  %v2516_v7 = vor.u32 %v2861_v63, %v2513_v0  ;;  %v2371_v63 = vld [vmem:[%s3089_s30 + $0x230] sm:$0xf] }
  0x4d   : > { %1505 = vmatmul.bf16.gmra.mxu2 %v2156_v3  ;;  %v2295_v3 = vld [vmem:[%s3089_s30 + $0x190] sm:$0xf]  ;;  %v2292_v9 = vor.u32 %v2805_v62, %v2289_v1  ;;  %v2892_v62 = vld [vmem:[%s3789_s1 + $0xc0] sm:$0xff]  ;;  %v2829_v0 = vld [vmem:[%s3089_s30 + $0x248] sm:$0xf0] }
  0x4e   : > { %v2296_v10 = vor.u32 %v2809_v4, %v2295_v3  ;;  %v2826_v1 = vld [vmem:[%s3089_s30 + $0x234] sm:$0xf]  ;;  %v2491_v3 = vld [vmem:[%s3089_s30 + $0x318] sm:$0xf] }
  0x4f   : > { %v2858_v4 = vld [vmem:[%s3089_s30 + $0x330] sm:$0xf0] }
  0x50   : > { %2935 = vmatpush.bf16.msra.mxu3 %v3014_v5  ;;  %v2184_v5 = vor.u32 %v2781_v15, %v2183_v13  ;;  %v2896_v13 = vld [vmem:[%s3789_s1 + $0xe0] sm:$0xff]  ;;  %v2901_v15 = vld [vmem:[%s3789_s1 + $0x108] sm:$0xff] }
  0x54   : > { %2936 = vmatpush.bf16.msra.mxu3 %v3029_v8  ;;  %v2904_v8 = vld [vmem:[%s3789_s1 + $0x120] sm:$0xff] }
  0x55   : > { %1668 = vmatpush.bf16.msrb.mxu0 %v2904_v8  ;;  %v2435_v8 = vld [vmem:[%s3089_s30 + $0x2a8] sm:$0xf] }
  0x58   : > { %2937 = vmatpush.bf16.msra.mxu3 %v3046_v11  ;;  %v2912_v11 = vld [vmem:[%s3789_s1 + $0x160] sm:$0xff] }
  0x59   : > { %1757 = vmatpush.bf16.msrb.mxu1 %v2912_v11  ;;  %v2844_v11 = vld [vmem:[%s3089_s30 + $0x2c0] sm:$0xf0] }
  0x5a   : > { %v2436_v24 = vor.u32 %v2844_v11, %v2435_v8 }
  0x5b   : > { %1332 = vmatmul.bf16.gmra.mxu0 %v2176_v2  ;;  %1392 = vmatmul.bf16.gmra.mxu3 %v2512_v16  ;;  %v2909_v2 = vld [vmem:[%s3789_s1 + $0x148] sm:$0xff]  ;;  %v2315_v16 = vld [vmem:[%s3089_s30 + $0x1c0] sm:$0xf] }
  0x5c   : > { %2938 = vmatpush.bf16.msra.mxu3 %v3065_v14  ;;  %1421 = vmatmul.bf16.gmra.mxu1 %v2180_v18  ;;  %v2203_v14 = vld [vmem:[%s3089_s30 + $0xe0] sm:$0xf]  ;;  %v2815_v18 = vld [vmem:[%s3089_s30 + $0x1d8] sm:$0xf0] }
  0x5d   : > { %1510 = vmatmul.bf16.gmra.mxu2 %v2184_v5  ;;  %v2204_v28 = vor.u32 %v2787_v19, %v2203_v14  ;;  %1758 = vmatpush.bf16.msrb.mxu1 %v2911_v31  ;;  %v2812_v5 = vld [vmem:[%s3089_s30 + $0x1c4] sm:$0xf]  ;;  %v2317_v14 = vld [vmem:[%s3089_s30 + $0x1dc] sm:$0xf0]  ;;  %v2323_v19 = vld [vmem:[%s3089_s30 + $0x1c8] sm:$0xf]  ;;  %v2316_v22 = vor.u32 %v2815_v18, %v2315_v16 }
  0x5e   : > { %v2320_v26 = vor.u32 %v2812_v5, %v2317_v14 }
  0x60   : > { %2939 = vmatpush.bf16.msra.mxu3 %v3081_v17  ;;  %v2208_v17 = vor.u32 %v2784_v21, %v2205_v25  ;;  %v2816_v21 = vld [vmem:[%s3089_s30 + $0x1e0] sm:$0xf0] }
  0x61   : > { %1759 = vmatpush.bf16.msrb.mxu1 %v2910_v58  ;;  %v2324_v27 = vor.u32 %v2816_v21, %v2323_v19 }
  0x64   : > { %2940 = vmatpush.bf16.msra.mxu3 %v3101_v20  ;;  %v2916_v20 = vld [vmem:[%s3789_s1 + $0x180] sm:$0xff] }
  0x65   : > { %1850 = vmatpush.bf16.msrb.mxu2 %v2916_v20  ;;  %1760 = vmatpush.bf16.msrb.mxu1 %v2909_v2 }
  0x68   : > { %2941 = vmatpush.bf16.msra.mxu3 %v3114_v23  ;;  %v2903_v23 = vld [vmem:[%s3789_s1 + $0x118] sm:$0xff] }
  0x69   : > { %1669 = vmatpush.bf16.msrb.mxu0 %v2903_v23 }
  0x6b   : > { %1337 = vmatmul.bf16.gmra.mxu0 %v2204_v28  ;;  %1466 = vmatmul.bf16.vlgmr.msrb.gmra.mxu3 %v2432_v29 }
  0x6c   : > { %1426 = vmatmul.bf16.gmra.mxu1 %v2208_v17  ;;  %1576 = vmatpush.bf16.msrb.mxu3 %v2899_v56  ;;  %v2895_v17 = vld [vmem:[%s3789_s1 + $0xd8] sm:$0xff] }
  0x6d   : > { %1515 = vmatmul.bf16.gmra.mxu2 %v2212_v30  ;;  %1670 = vmatpush.bf16.msrb.mxu0 %v2902_v57 }
  0x70   : > { %1577 = vmatpush.bf16.msrb.mxu3 %v2898_v59 }
  0x71   : > { %1671 = vmatpush.bf16.msrb.mxu0 %v2901_v15  ;;  %v2492_v15 = vor.u32 %v2858_v4, %v2491_v3 }
  0x74   : > { %1578 = vmatpush.bf16.msrb.mxu3 %v2897_v12 }
  0x78   : > { %1579 = vmatpush.bf16.msrb.mxu3 %v2896_v13  ;;  %v2372_v13 = vor.u32 %v2829_v0, %v2371_v63 }
  0x7b   : > { %1342 = vmatmul.bf16.gmra.mxu0 %v2232_v40  ;;  %1471 = vmatmul.bf16.gmra.mxu3 %v2460_v41  ;;  %v2345_v40 = vld [vmem:[%s3089_s30 + $0x214] sm:$0xf0]  ;;  %v2351_v41 = vld [vmem:[%s3089_s30 + $0x200] sm:$0xf] }
  0x7c   : > { %1431 = vmatmul.bf16.gmra.mxu1 %v2236_v42  ;;  %1580 = vmatpush.bf16.msrb.mxu3 %v2895_v17  ;;  %v2823_v42 = vld [vmem:[%s3089_s30 + $0x218] sm:$0xf0]  ;;  %v2348_v49 = vor.u32 %v2819_v37, %v2345_v40  ;;  %v2865_v17 = vld [vmem:[%s3089_s30 + $0x368] sm:$0xf0] }
  0x7d   : > { %1520 = vmatmul.bf16.gmra.mxu2 %v2240_v43  ;;  %v2352_v50 = vor.u32 %v2823_v42, %v2351_v41 }
  0x80   : > { %1581 = vmatpush.bf16.msrb.mxu3 %v2894_v34 }
  0x8b   : > { %1347 = vmatmul.bf16.gmra.mxu0 %v2260_v52  ;;  %1476 = vmatmul.bf16.gmra.mxu3 %v2488_v53  ;;  %v2893_v53 = vld [vmem:[%s3789_s1 + $0xc8] sm:$0xff] }
  0x8c   : > { %1436 = vmatmul.bf16.gmra.mxu1 %v2264_v54  ;;  %v2900_v54 = vld [vmem:[%s3789_s1 + $0x100] sm:$0xff]  ;;  %1582 = vmatpush.bf16.msrb.mxu3 %v2893_v53  ;;  %v2107_v53 = vld [vmem:[%s3089_s30 + $0x10] sm:$0xf] }
  0x8d   : > { %1525 = vmatmul.bf16.gmra.mxu2 %v2268_v55  ;;  %v2908_v55 = vld [vmem:[%s3789_s1 + $0x140] sm:$0xff]  ;;  %1672 = vmatpush.bf16.msrb.mxu0 %v2900_v54  ;;  %v2761_v54 = vld [vmem:[%s3089_s30 + $0x28] sm:$0xf0] }
  0x8e   : > { %1761 = vmatpush.bf16.msrb.mxu1 %v2908_v55  ;;  %v2115_v55 = vld [vmem:[%s3089_s30 + $0x18] sm:$0xf]  ;;  %v2108_v0 = vor.u32 %v2761_v54, %v2107_v53  ;;  %v2775_v53 = vld [vmem:[%s3089_s30 + $0x98] sm:$0xf0]  ;;  %v2171_v54 = vld [vmem:[%s3089_s30 + $0x88] sm:$0xf] }
  0x90   : > { %1583 = vmatpush.bf16.msrb.mxu3 %v2892_v62 }
  0x9b   : > { %1352 = vmatmul.bf16.gmra.mxu0 %v2288_v6  ;;  %1481 = vmatmul.bf16.gmra.mxu3 %v2516_v7  ;;  %v2373_v6 = vld [vmem:[%s3089_s30 + $0x24c] sm:$0xf0]  ;;  %v2379_v7 = vld [vmem:[%s3089_s30 + $0x238] sm:$0xf] }
  0x9c   : > { %1441 = vmatmul.bf16.gmra.mxu1 %v2292_v9  ;;  %v2830_v9 = vld [vmem:[%s3089_s30 + $0x250] sm:$0xf0]  ;;  %v2376_v18 = vor.u32 %v2826_v1, %v2373_v6 }
  0x9d   : > { %1530 = vmatmul.bf16.gmra.mxu2 %v2296_v10  ;;  %v2380_v5 = vor.u32 %v2830_v9, %v2379_v7 }
  0xa8   : > { %v1318_v25 = vpop.f32.mrf.mxu0 }
  0xa9   : > { %v1407_v28 = vpop.f32.mrf.mxu1 }
  0xaa   : > { %v1408_v29 = vadd.f32 %v1407_v28, %v1318_v25  ;;  %v2833_v28 = vld [vmem:[%s3089_s30 + $0x26c] sm:$0xf] }
  0xab   : > { %1357 = vmatmul.bf16.gmra.mxu0 %v2316_v22  ;;  %1555 = vmatmul.bf16.vlgmr.msra.gmra.mxu3 %v2436_v24 }
  0xac   : > { %1446 = vmatmul.bf16.gmra.mxu1 %v2320_v26  ;;  %v2399_v26 = vld [vmem:[%s3089_s30 + $0x268] sm:$0xf] }
  0xad   : > { %1535 = vmatmul.bf16.gmra.mxu2 %v2324_v27  ;;  %v2836_v27 = vld [vmem:[%s3089_s30 + $0x280] sm:$0xf0] }
  0xae   : > { %v3271_v30 = vpop.f32.mrf.mxu3  ;;  %v2400_v35 = vor.u32 %v2836_v27, %v2399_v26  ;;  %v2769_v26 = vld [vmem:[%s3089_s30 + $0x68] sm:$0xf0] }
  0xaf   : > { %v2765_v27 = vld [vmem:[%s3089_s30 + $0x4c] sm:$0xf] }
  0xb0   : > { %v1496_v20 = vpop.f32.mrf.mxu2  ;;  %v1320_v31 = vpop.f32.mrf.mxu0 }
  0xb1   : > { %v3273_v23 = vadd.f32 %v1496_v20, %v1408_v29  ;;  %v1409_v32 = vpop.f32.mrf.mxu1  ;;  %v2519_v29 = vld [vmem:[%s3089_s30 + $0x350] sm:$0xf]  ;;  %v2401_v20 = vld [vmem:[%s3089_s30 + $0x284] sm:$0xf0] }
  0xb2   : > { %v1410_v33 = vadd.f32 %v1409_v32, %v1320_v31  ;;  %v2407_v31 = vld [vmem:[%s3089_s30 + $0x270] sm:$0xf]  ;;  %v2837_v32 = vld [vmem:[%s3089_s30 + $0x288] sm:$0xf0]  ;;  %v2520_v36 = vor.u32 %v2865_v17, %v2519_v29  ;;  %v2404_v39 = vor.u32 %v2833_v28, %v2401_v20  ;;  %v2137_v28 = vld [vmem:[%s3089_s30 + $0x64] sm:$0xf0] }
  0xb3   : > { %v2408_v40 = vor.u32 %v2837_v32, %v2407_v31 }
  0xb6   : > { %v3286_v43 = vpop.f32.mrf.mxu3 }
  0xb8   : > { %v1498_v44 = vpop.f32.mrf.mxu2  ;;  %v1323_v48 = vpop.f32.mrf.mxu0 }
  0xb9   : > { %v3288_v47 = vadd.f32 %v1498_v44, %v1410_v33  ;;  %v1412_v51 = vpop.f32.mrf.mxu1 }
  0xba   : > { %v1413_v52 = vadd.f32 %v1412_v51, %v1323_v48  ;;  %v2757_v51 = vld [vmem:[%s3089_s30 + $0xc] sm:$0xf] }
  0xbb   : > { %1362 = vmatmul.bf16.gmra.mxu0 %v2344_v45  ;;  %1560 = vmatmul.bf16.gmra.mxu3 %v2464_v46 }
  0xbc   : > { %1451 = vmatmul.bf16.gmra.mxu1 %v2348_v49 }
  0xbd   : > { %1540 = vmatmul.bf16.gmra.mxu2 %v2352_v50 }
  0xbe   : > { %v3299_v56 = vpop.f32.mrf.mxu3 }
  0xc0   : > { %v1501_v57 = vpop.f32.mrf.mxu2  ;;  %v1325_v59 = vpop.f32.mrf.mxu0 }
  0xc1   : > { %v3301_v58 = vadd.f32 %v1501_v57, %v1413_v52  ;;  %v1414_v60 = vpop.f32.mrf.mxu1  ;;  %v2101_v52 = vld [vmem:[%s3089_s30 + $0x24] sm:$0xf0]  ;;  %v2762_v57 = vld [vmem:[%s3089_s30 + $0x30] sm:$0xf0] }
  0xc2   : > { %v1415_v61 = vadd.f32 %v1414_v60, %v1325_v59  ;;  %v2758_v59 = vld [vmem:[%s3089_s30 + $0x14] sm:$0xf]  ;;  %v2109_v60 = vld [vmem:[%s3089_s30 + $0x2c] sm:$0xf0]  ;;  %v2104_v63 = vor.u32 %v2757_v51, %v2101_v52  ;;  %v2116_v4 = vor.u32 %v2762_v57, %v2115_v55  ;;  %v2157_v51 = vld [vmem:[%s3089_s30 + $0x94] sm:$0xf0] }
  0xc3   : > { %v2112_v6 = vor.u32 %v2758_v59, %v2109_v60  ;;  %v2163_v52 = vld [vmem:[%s3089_s30 + $0x80] sm:$0xf]  ;;  %v2776_v55 = vld [vmem:[%s3089_s30 + $0xa0] sm:$0xf0] }
  0xc4   : > { %v2772_v57 = vld [vmem:[%s3089_s30 + $0x84] sm:$0xf]  ;;  %v2165_v59 = vld [vmem:[%s3089_s30 + $0x9c] sm:$0xf0] }
  0xc6   : > { %v3314_v10 = vpop.f32.mrf.mxu3 }
  0xc8   : > { %v1503_v12 = vpop.f32.mrf.mxu2  ;;  %v1328_v16 = vpop.f32.mrf.mxu0 }
  0xc9   : > { %v3316_v2 = vadd.f32 %v1503_v12, %v1415_v61  ;;  %v1417_v8 = vpop.f32.mrf.mxu1 }
  0xca   : > { %v1418_v11 = vadd.f32 %v1417_v8, %v1328_v16 }
  0xcb   : > { %1367 = vmatmul.bf16.gmra.mxu0 %v2372_v13  ;;  %1565 = vmatmul.bf16.gmra.mxu3 %v2492_v15 }
  0xcc   : > { %1456 = vmatmul.bf16.gmra.mxu1 %v2376_v18 }
  0xcd   : > { %1545 = vmatmul.bf16.gmra.mxu2 %v2380_v5 }
  0xce   : > { %v3318_v14 = vpop.f32.mrf.mxu3 }
  0xd0   : > { %v1506_v19 = vpop.f32.mrf.mxu2  ;;  %v1330_v22 = vpop.f32.mrf.mxu0 }
  0xd1   : > { %v3320_v21 = vadd.f32 %v1506_v19, %v1418_v11  ;;  %v1419_v24 = vpop.f32.mrf.mxu1  ;;  %v2764_v11 = vld [vmem:[%s3089_s30 + $0x44] sm:$0xf]  ;;  %v2129_v19 = vld [vmem:[%s3089_s30 + $0x5c] sm:$0xf0] }
  0xd2   : > { %v1420_v25 = vadd.f32 %v1419_v24, %v1330_v22  ;;  %v2135_v22 = vld [vmem:[%s3089_s30 + $0x48] sm:$0xf]  ;;  %v2768_v24 = vld [vmem:[%s3089_s30 + $0x60] sm:$0xf0]  ;;  %v2132_v20 = vor.u32 %v2764_v11, %v2129_v19 }
  0xd3   : > { %v2136_v31 = vor.u32 %v2768_v24, %v2135_v22  ;;  %v2778_v22 = vld [vmem:[%s3089_s30 + $0xb4] sm:$0xf]  ;;  %v2185_v24 = vld [vmem:[%s3089_s30 + $0xcc] sm:$0xf0] }
  0xd6   : > { %v3330_v33 = vpop.f32.mrf.mxu3 }
  0xd8   : > { %v1508_v34 = vpop.f32.mrf.mxu2  ;;  %v1333_v38 = vpop.f32.mrf.mxu0 }
  0xd9   : > { %v3332_v37 = vadd.f32 %v1508_v34, %v1420_v25  ;;  %v1422_v41 = vpop.f32.mrf.mxu1  ;;  %v2143_v25 = vld [vmem:[%s3089_s30 + $0x50] sm:$0xf] }
  0xda   : > { %v1423_v42 = vadd.f32 %v1422_v41, %v1333_v38 }
  0xdb   : > { %1372 = vmatmul.bf16.gmra.mxu0 %v2400_v35  ;;  %1570 = vmatmul.bf16.gmra.mxu3 %v2520_v36  ;;  %v2144_v35 = vor.u32 %v2769_v26, %v2143_v25  ;;  %v2140_v36 = vor.u32 %v2765_v27, %v2137_v28  ;;  %v2191_v25 = vld [vmem:[%s3089_s30 + $0xb8] sm:$0xf]  ;;  %v2782_v26 = vld [vmem:[%s3089_s30 + $0xd0] sm:$0xf0]  ;;  %v2199_v27 = vld [vmem:[%s3089_s30 + $0xc0] sm:$0xf] }
  0xdc   : > { %1461 = vmatmul.bf16.gmra.mxu1 %v2404_v39  ;;  %v2783_v28 = vld [vmem:[%s3089_s30 + $0xd8] sm:$0xf0] }
  0xdd   : > { %1550 = vmatmul.bf16.gmra.mxu2 %v2408_v40 }
  0xde   : > { %v3334_v44 = vpop.f32.mrf.mxu3 }
  0xe0   : > { %v1511_v45 = vpop.f32.mrf.mxu2  ;;  %v1335_v48 = vpop.f32.mrf.mxu0 }
  0xe1   : > { %v3336_v46 = vadd.f32 %v1511_v45, %v1423_v42  ;;  %v1424_v49 = vpop.f32.mrf.mxu1 }
  0xe2   : > { %v1425_v50 = vadd.f32 %v1424_v49, %v1335_v48 }
  0xe6   : > { %v3346_v61 = vpop.f32.mrf.mxu3 }
  0xe8   : > { %v1513_v62 = vpop.f32.mrf.mxu2  ;;  %v1338_v3 = vpop.f32.mrf.mxu0 }
  0xe9   : > { %v3348_v1 = vadd.f32 %v1513_v62, %v1425_v50  ;;  %v1427_v7 = vpop.f32.mrf.mxu1  ;;  %v2771_v50 = vld [vmem:[%s3089_s30 + $0x7c] sm:$0xf] }
  0xea   : > { %v1428_v9 = vadd.f32 %v1427_v7, %v1338_v3  ;;  %v2168_v7 = vor.u32 %v2772_v57, %v2165_v59  ;;  %v2219_v57 = vld [vmem:[%s3089_s30 + $0xf0] sm:$0xf]  ;;  %v2789_v59 = vld [vmem:[%s3089_s30 + $0x108] sm:$0xf0] }
  0xeb   : > { %1584 = vmatmul.bf16.vlgmr.msrb.gmra.mxu3 %v2104_v63  ;;  %1673 = vmatmul.bf16.vlgmr.msrb.gmra.mxu0 %v2108_v0  ;;  %v2160_v63 = vor.u32 %v2771_v50, %v2157_v51  ;;  %v2164_v0 = vor.u32 %v2775_v53, %v2163_v52 }
  0xec   : > { %1762 = vmatmul.bf16.vlgmr.msrb.gmra.mxu1 %v2112_v6  ;;  %v2172_v6 = vor.u32 %v2776_v55, %v2171_v54  ;;  %v2785_v54 = vld [vmem:[%s3089_s30 + $0xec] sm:$0xf]  ;;  %v2213_v55 = vld [vmem:[%s3089_s30 + $0x104] sm:$0xf0] }
  0xed   : > { %2737 = vmatmul.msk.bf16.vlgmr.msrb.gmra.mxu2 %vm1260_vm0, %v2116_v4 }
  0xee   : > { %v1467_v12 = vpop.f32.mrf.mxu3 }
  0xef   : > { %v3352_v13 = vadd.f32 %v1467_v12, %v3271_v30 }
  0xf0   : > { %v1516_v15 = vpop.f32.mrf.mxu2  ;;  %v1340_v18 = vpop.f32.mrf.mxu0 }
  0xf1   : > { %v3354_v16 = vadd.f32 %v1516_v15, %v1428_v9  ;;  %v1429_v5 = vpop.f32.mrf.mxu1 }
  0xf2   : > { %v1430_v8 = vadd.f32 %v1429_v5, %v1340_v18 }
  0xf6   : > { %v1469_v29 = vpop.f32.mrf.mxu3 }
  0xf7   : > { %v3365_v17 = vadd.f32 %v1469_v29, %v3286_v43  ;;  %v2779_v29 = vld [vmem:[%s3089_s30 + $0xbc] sm:$0xf] }
  0xf8   : > { %v1518_v30 = vpop.f32.mrf.mxu2  ;;  %v1343_v34 = vpop.f32.mrf.mxu0 }
  0xf9   : > { %v3367_v32 = vadd.f32 %v1518_v30, %v1430_v8  ;;  %v1432_v38 = vpop.f32.mrf.mxu1  ;;  %v2193_v30 = vld [vmem:[%s3089_s30 + $0xd4] sm:$0xf0] }
  0xfa   : > { %v1433_v39 = vadd.f32 %v1432_v38, %v1343_v34  ;;  %v2188_v34 = vor.u32 %v2778_v22, %v2185_v24 }
  0xfb   : > { %1589 = vmatmul.bf16.gmra.mxu3 %v2132_v20  ;;  %1678 = vmatmul.bf16.gmra.mxu0 %v2136_v31 }
  0xfc   : > { %1767 = vmatmul.bf16.gmra.mxu1 %v2140_v36 }
  0xfd   : > { %2738 = vmatmul.msk.bf16.gmra.mxu2 %vm1260_vm0, %v2144_v35  ;;  %v2192_v35 = vor.u32 %v2782_v26, %v2191_v25 }
  0xfe   : > { %v1472_v43 = vpop.f32.mrf.mxu3 }
  0xff   : > { %v3371_v40 = vadd.f32 %v1472_v43, %v3299_v56  ;;  %v2196_v43 = vor.u32 %v2779_v29, %v2193_v30  ;;  %v2792_v29 = vld [vmem:[%s3089_s30 + $0x124] sm:$0xf]  ;;  %v2241_v30 = vld [vmem:[%s3089_s30 + $0x13c] sm:$0xf0] }
 0x100   : > { %v1521_v41 = vpop.f32.mrf.mxu2  ;;  %v1345_v45 = vpop.f32.mrf.mxu0 }
 0x101   : > { %v3373_v42 = vadd.f32 %v1521_v41, %v1433_v39  ;;  %v1434_v48 = vpop.f32.mrf.mxu1  ;;  %v2200_v39 = vor.u32 %v2783_v28, %v2199_v27 }
 0x102   : > { %v1435_v49 = vadd.f32 %v1434_v48, %v1345_v45 }
 0x106   : > { %v1474_v60 = vpop.f32.mrf.mxu3 }
 0x107   : > { %v3384_v62 = vadd.f32 %v1474_v60, %v3314_v10  ;;  %v2227_v60 = vld [vmem:[%s3089_s30 + $0xf8] sm:$0xf] }
 0x108   : > { %v1523_v56 = vpop.f32.mrf.mxu2  ;;  %v1348_v4 = vpop.f32.mrf.mxu0 }
 0x109   : > { %v3386_v3 = vadd.f32 %v1523_v56, %v1435_v49  ;;  %v1437_v9 = vpop.f32.mrf.mxu1  ;;  %v2790_v56 = vld [vmem:[%s3089_s30 + $0x110] sm:$0xf0] }
 0x10a   : > { %v1438_v12 = vadd.f32 %v1437_v9, %v1348_v4  ;;  %v2220_v9 = vor.u32 %v2789_v59, %v2219_v57 }
 0x10b   : > { %1594 = vmatmul.bf16.gmra.mxu3 %v2160_v63  ;;  %1683 = vmatmul.bf16.gmra.mxu0 %v2164_v0  ;;  %v2786_v63 = vld [vmem:[%s3089_s30 + $0xf4] sm:$0xf]  ;;  %v2221_v0 = vld [vmem:[%s3089_s30 + $0x10c] sm:$0xf0] }
 0x10c   : > { %1772 = vmatmul.bf16.gmra.mxu1 %v2168_v7  ;;  %v2216_v7 = vor.u32 %v2785_v54, %v2213_v55 }
 0x10d   : > { %2739 = vmatmul.msk.bf16.gmra.mxu2 %vm1260_vm0, %v2172_v6 }
 0x10e   : > { %v1477_v10 = vpop.f32.mrf.mxu3 }
 0x10f   : > { %v3390_v15 = vadd.f32 %v1477_v10, %v3318_v14 }
 0x110   : > { %v1526_v18 = vpop.f32.mrf.mxu2  ;;  %v1350_v8 = vpop.f32.mrf.mxu0 }
 0x111   : > { %v3392_v5 = vadd.f32 %v1526_v18, %v1438_v12  ;;  %v1439_v11 = vpop.f32.mrf.mxu1  ;;  %v2228_v18 = vor.u32 %v2790_v56, %v2227_v60 }
 0x112   : > { %v1440_v19 = vadd.f32 %v1439_v11, %v1350_v8  ;;  %v2224_v8 = vor.u32 %v2786_v63, %v2221_v0 }
 0x116   : > { %v1479_v20 = vpop.f32.mrf.mxu3 }
 0x117   : > { %v3403_v31 = vadd.f32 %v1479_v20, %v3330_v33  ;;  %v2247_v20 = vld [vmem:[%s3089_s30 + $0x128] sm:$0xf] }
 0x118   : > { %v1528_v14 = vpop.f32.mrf.mxu2  ;;  %v1353_v38 = vpop.f32.mrf.mxu0 }
 0x119   : > { %v3405_v36 = vadd.f32 %v1528_v14, %v1440_v19  ;;  %v1442_v41 = vpop.f32.mrf.mxu1  ;;  %v2796_v14 = vld [vmem:[%s3089_s30 + $0x140] sm:$0xf0] }
 0x11a   : > { %v1443_v45 = vadd.f32 %v1442_v41, %v1353_v38  ;;  %v2793_v38 = vld [vmem:[%s3089_s30 + $0x12c] sm:$0xf] }
 0x11b   : > { %1599 = vmatmul.bf16.gmra.mxu3 %v2188_v34  ;;  %1688 = vmatmul.bf16.gmra.mxu0 %v2192_v35  ;;  %v2255_v34 = vld [vmem:[%s3089_s30 + $0x130] sm:$0xf]  ;;  %v2797_v35 = vld [vmem:[%s3089_s30 + $0x148] sm:$0xf0] }
 0x11c   : > { %1777 = vmatmul.bf16.gmra.mxu1 %v2196_v43 }
 0x11d   : > { %2740 = vmatmul.msk.bf16.gmra.mxu2 %vm1260_vm0, %v2200_v39  ;;  %v2249_v39 = vld [vmem:[%s3089_s30 + $0x144] sm:$0xf0] }
 0x11e   : > { %v1482_v33 = vpop.f32.mrf.mxu3 }
 0x11f   : > { %v3409_v48 = vadd.f32 %v1482_v33, %v3334_v44  ;;  %v2248_v33 = vor.u32 %v2796_v14, %v2247_v20 }
 0x120   : > { %v1531_v49 = vpop.f32.mrf.mxu2  ;;  %v1355_v51 = vpop.f32.mrf.mxu0 }
 0x121   : > { %v3411_v50 = vadd.f32 %v1531_v49, %v1443_v45  ;;  %v1444_v52 = vpop.f32.mrf.mxu1 }
 0x122   : > { %v1445_v53 = vadd.f32 %v1444_v52, %v1355_v51  ;;  %v2256_v52 = vor.u32 %v2797_v35, %v2255_v34 }
 0x126   : > { %v1484_v4 = vpop.f32.mrf.mxu3 }
 0x127   : > { %v3422_v6 = vadd.f32 %v1484_v4, %v3346_v61  ;;  %v2799_v4 = vld [vmem:[%s3089_s30 + $0x15c] sm:$0xf] }
 0x128   : > { %v1533_v44 = vpop.f32.mrf.mxu2  ;;  %v1358_v10 = vpop.f32.mrf.mxu0 }
 0x129   : > { %v3424_v12 = vadd.f32 %v1533_v44, %v1445_v53  ;;  %v1447_v11 = vpop.f32.mrf.mxu1  ;;  %v2252_v53 = vor.u32 %v2793_v38, %v2249_v39  ;;  %v2269_v44 = vld [vmem:[%s3089_s30 + $0x174] sm:$0xf0] }
 0x12a   : > { %v1448_v19 = vadd.f32 %v1447_v11, %v1358_v10  ;;  %v2283_v10 = vld [vmem:[%s3089_s30 + $0x168] sm:$0xf]  ;;  %v2277_v11 = vld [vmem:[%s3089_s30 + $0x17c] sm:$0xf0] }
 0x12b   : > { %1604 = vmatmul.bf16.gmra.mxu3 %v2216_v7  ;;  %1693 = vmatmul.bf16.gmra.mxu0 %v2220_v9  ;;  %v2275_v7 = vld [vmem:[%s3089_s30 + $0x160] sm:$0xf]  ;;  %v2803_v9 = vld [vmem:[%s3089_s30 + $0x178] sm:$0xf0] }
 0x12c   : > { %1782 = vmatmul.bf16.gmra.mxu1 %v2224_v8  ;;  %v2800_v8 = vld [vmem:[%s3089_s30 + $0x164] sm:$0xf] }
 0x12d   : > { %2741 = vmatmul.msk.bf16.gmra.mxu2 %vm1260_vm0, %v2228_v18  ;;  %v2804_v18 = vld [vmem:[%s3089_s30 + $0x180] sm:$0xf0] }
 0x12e   : > { %v1556_v61 = vpop.f32.mrf.mxu3 }
 0x12f   : > { %v3428_v24 = vadd.f32 %v1556_v61, %v3352_v13  ;;  %v2244_v13 = vor.u32 %v2792_v29, %v2241_v30  ;;  %v2284_v29 = vor.u32 %v2804_v18, %v2283_v10  ;;  %v2280_v30 = vor.u32 %v2800_v8, %v2277_v11 }
 0x130   : > { %v1536_v22 = vpop.f32.mrf.mxu2  ;;  %v1360_v26 = vpop.f32.mrf.mxu0 }
 0x131   : > { %v3430_v25 = vadd.f32 %v1536_v22, %v1448_v19  ;;  %v1449_v27 = vpop.f32.mrf.mxu1 }
 0x132   : > { %v1450_v28 = vadd.f32 %v1449_v27, %v1360_v26  ;;  %v2276_v26 = vor.u32 %v2803_v9, %v2275_v7 }
 0x136   : > { %v1558_v43 = vpop.f32.mrf.mxu3 }
 0x137   : > { %v3441_v45 = vadd.f32 %v1558_v43, %v3365_v17 }
 0x138   : > { %v1538_v41 = vpop.f32.mrf.mxu2  ;;  %v1363_v51 = vpop.f32.mrf.mxu0 }
 0x139   : > { %v3443_v49 = vadd.f32 %v1538_v41, %v1450_v28  ;;  %v1452_v54 = vpop.f32.mrf.mxu1 }
 0x13a   : > { %v1453_v55 = vadd.f32 %v1452_v54, %v1363_v51  ;;  %v2303_v51 = vld [vmem:[%s3089_s30 + $0x198] sm:$0xf]  ;;  %v2811_v54 = vld [vmem:[%s3089_s30 + $0x1b8] sm:$0xf0] }
 0x13b   : > { %1609 = vmatmul.bf16.gmra.mxu3 %v2244_v13  ;;  %1698 = vmatmul.bf16.gmra.mxu0 %v2248_v33  ;;  %v2806_v13 = vld [vmem:[%s3089_s30 + $0x194] sm:$0xf]  ;;  %v2297_v33 = vld [vmem:[%s3089_s30 + $0x1ac] sm:$0xf0] }
 0x13c   : > { %1787 = vmatmul.bf16.gmra.mxu1 %v2252_v53  ;;  %v2311_v53 = vld [vmem:[%s3089_s30 + $0x1a0] sm:$0xf] }
 0x13d   : > { %2742 = vmatmul.msk.bf16.gmra.mxu2 %vm1260_vm0, %v2256_v52  ;;  %v2810_v52 = vld [vmem:[%s3089_s30 + $0x1b0] sm:$0xf0]  ;;  %v2312_v7 = vor.u32 %v2811_v54, %v2311_v53 }
 0x13e   : > { %v1561_v17 = vpop.f32.mrf.mxu3 }
 0x13f   : > { %v3447_v59 = vadd.f32 %v1561_v17, %v3371_v40  ;;  %v2272_v40 = vor.u32 %v2799_v4, %v2269_v44  ;;  %v2305_v17 = vld [vmem:[%s3089_s30 + $0x1b4] sm:$0xf0] }
 0x140   : > { %v1541_v57 = vpop.f32.mrf.mxu2  ;;  %v1365_v56 = vpop.f32.mrf.mxu0 }
 0x141   : > { %v3449_v60 = vadd.f32 %v1541_v57, %v1453_v55  ;;  %v1454_v63 = vpop.f32.mrf.mxu1  ;;  %v2807_v55 = vld [vmem:[%s3089_s30 + $0x19c] sm:$0xf] }
 0x142   : > { %v1455_v0 = vadd.f32 %v1454_v63, %v1365_v56  ;;  %v2308_v9 = vor.u32 %v2807_v55, %v2305_v17 }
 0x146   : > { %v1563_v19 = vpop.f32.mrf.mxu3 }
 0x147   : > { %v3460_v22 = vadd.f32 %v1563_v19, %v3384_v62 }
 0x148   : > { %v1543_v61 = vpop.f32.mrf.mxu2  ;;  %v1368_v28 = vpop.f32.mrf.mxu0 }
 0x149   : > { %v3462_v27 = vadd.f32 %v1543_v61, %v1455_v0  ;;  %v1457_v20 = vpop.f32.mrf.mxu1  ;;  %v2304_v0 = vor.u32 %v2810_v52, %v2303_v51 }
 0x14a   : > { %v1458_v14 = vadd.f32 %v1457_v20, %v1368_v28  ;;  %v2813_v28 = vld [vmem:[%s3089_s30 + $0x1cc] sm:$0xf] }
 0x14b   : > { %1614 = vmatmul.bf16.gmra.mxu3 %v2272_v40  ;;  %1703 = vmatmul.bf16.gmra.mxu0 %v2276_v26  ;;  %v2817_v20 = vld [vmem:[%s3089_s30 + $0x1e8] sm:$0xf0] }
 0x14c   : > { %1792 = vmatmul.bf16.gmra.mxu1 %v2280_v30  ;;  %v2331_v30 = vld [vmem:[%s3089_s30 + $0x1d0] sm:$0xf] }
 0x14d   : > { %2743 = vmatmul.msk.bf16.gmra.mxu2 %vm1260_vm0, %v2284_v29  ;;  %v2325_v29 = vld [vmem:[%s3089_s30 + $0x1e4] sm:$0xf0] }
 0x14e   : > { %v1566_v62 = vpop.f32.mrf.mxu3 }
 0x14f   : > { %v3466_v35 = vadd.f32 %v1566_v62, %v3390_v15  ;;  %v2300_v15 = vor.u32 %v2806_v13, %v2297_v33  ;;  %v2818_v62 = vld [vmem:[%s3089_s30 + $0x1f0] sm:$0xf0]  ;;  %v2332_v33 = vor.u32 %v2817_v20, %v2331_v30 }
 0x150   : > { %v1546_v34 = vpop.f32.mrf.mxu2  ;;  %v1370_v39 = vpop.f32.mrf.mxu0 }
 0x151   : > { %v3468_v38 = vadd.f32 %v1546_v34, %v1458_v14  ;;  %v1459_v43 = vpop.f32.mrf.mxu1  ;;  %v2339_v14 = vld [vmem:[%s3089_s30 + $0x1d8] sm:$0xf]  ;;  %v2814_v34 = vld [vmem:[%s3089_s30 + $0x1d4] sm:$0xf] }
 0x152   : > { %v1460_v41 = vadd.f32 %v1459_v43, %v1370_v39  ;;  %v2333_v39 = vld [vmem:[%s3089_s30 + $0x1ec] sm:$0xf0]  ;;  %v2340_v53 = vor.u32 %v2818_v62, %v2339_v14 }
 0x153   : > { %v2336_v54 = vor.u32 %v2814_v34, %v2333_v39 }
 0x156   : > { %v1568_v57 = vpop.f32.mrf.mxu3 }
 0x157   : > { %v3479_v63 = vadd.f32 %v1568_v57, %v3403_v31 }
 0x158   : > { %v1548_v56 = vpop.f32.mrf.mxu2  ;;  %v1373_v44 = vpop.f32.mrf.mxu0 }
 0x159   : > { %v3481_v4 = vadd.f32 %v1548_v56, %v1460_v41  ;;  %v1462_v10 = vpop.f32.mrf.mxu1 }
 0x15a   : > { %v1463_v18 = vadd.f32 %v1462_v10, %v1373_v44  ;;  %v2359_v10 = vld [vmem:[%s3089_s30 + $0x208] sm:$0xf] }
 0x15b   : > { %1619 = vmatmul.bf16.gmra.mxu3 %v2300_v15  ;;  %1708 = vmatmul.bf16.gmra.mxu0 %v2304_v0 }
 0x15c   : > { %1797 = vmatmul.bf16.gmra.mxu1 %v2308_v9  ;;  %v2353_v9 = vld [vmem:[%s3089_s30 + $0x21c] sm:$0xf0] }
 0x15d   : > { %2744 = vmatmul.msk.bf16.gmra.mxu2 %vm1260_vm0, %v2312_v7  ;;  %v2820_v7 = vld [vmem:[%s3089_s30 + $0x204] sm:$0xf] }
 0x15e   : > { %v1571_v31 = vpop.f32.mrf.mxu3 }
 0x15f   : > { %v3485_v11 = vadd.f32 %v1571_v31, %v3409_v48  ;;  %v2328_v48 = vor.u32 %v2813_v28, %v2325_v29  ;;  %v2367_v31 = vld [vmem:[%s3089_s30 + $0x210] sm:$0xf] }
 0x160   : > { %v1551_v8 = vpop.f32.mrf.mxu2  ;;  %v1375_v61 = vpop.f32.mrf.mxu0 }
 0x161   : > { %v3487_v19 = vadd.f32 %v1551_v8, %v1463_v18  ;;  %v1464_v40 = vpop.f32.mrf.mxu1  ;;  %v2824_v18 = vld [vmem:[%s3089_s30 + $0x220] sm:$0xf0] }
 0x162   : > { %v1465_v26 = vadd.f32 %v1464_v40, %v1375_v61  ;;  %v2825_v61 = vld [vmem:[%s3089_s30 + $0x228] sm:$0xf0]  ;;  %v2360_v20 = vor.u32 %v2824_v18, %v2359_v10  ;;  %v2389_v10 = vld [vmem:[%s3089_s30 + $0x25c] sm:$0xf0] }
 0x163   : > { %v2821_v40 = vld [vmem:[%s3089_s30 + $0x20c] sm:$0xf]  ;;  %v2368_v62 = vor.u32 %v2825_v61, %v2367_v31 }
 0x166   : > { %v1573_v43 = vpop.f32.mrf.mxu3 }
 0x167   : > { %v3498_v13 = vadd.f32 %v1573_v43, %v3422_v6 }
 0x168   : > { %v1553_v41 = vpop.f32.mrf.mxu2  ;;  %v1674_v52 = vpop.f32.mrf.mxu0 }
 0x169   : > { %v3500_v51 = vadd.f32 %v1553_v41, %v1465_v26  ;;  %v1763_v55 = vpop.f32.mrf.mxu1  ;;  %v2361_v26 = vld [vmem:[%s3089_s30 + $0x224] sm:$0xf0] }
 0x16a   : > { %v2364_v34 = vor.u32 %v2821_v40, %v2361_v26 }
 0x16b   : > { %1624 = vmatmul.bf16.gmra.mxu3 %v2328_v48  ;;  %1713 = vmatmul.bf16.gmra.mxu0 %v2332_v33 }
 0x16c   : > { %1802 = vmatmul.bf16.gmra.mxu1 %v2336_v54 }
 0x16d   : > { %2745 = vmatmul.msk.bf16.gmra.mxu2 %vm1260_vm0, %v2340_v53 }
 0x16e   : > { %v1585_v6 = vpop.f32.mrf.mxu3 }
 0x16f   : > { %v1586_v17 = vadd.f32 %v1585_v6, %v3273_v23  ;;  %v2356_v23 = vor.u32 %v2820_v7, %v2353_v9  ;;  %v2832_v7 = vld [vmem:[%s3089_s30 + $0x260] sm:$0xf0] }
 0x170   : > { %v1852_v57 = vpop.f32.mrf.mxu2  ;;  %v1676_v56 = vpop.f32.mrf.mxu0  ;;  %v2828_v9 = vld [vmem:[%s3089_s30 + $0x244] sm:$0xf] }
 0x171   : > { %v1675_v15 = vadd.f32 %v1674_v52, %v1586_v17  ;;  %v1765_v0 = vpop.f32.mrf.mxu1  ;;  %v2827_v17 = vld [vmem:[%s3089_s30 + $0x23c] sm:$0xf] }
 0x173   : > { %v1764_v44 = vadd.f32 %v1763_v55, %v1675_v15  ;;  %v2831_v15 = vld [vmem:[%s3089_s30 + $0x258] sm:$0xf0] }
 0x175   : > { %v3509_v8 = vadd.f32 %v1852_v57, %v1764_v44  ;;  %v2381_v57 = vld [vmem:[%s3089_s30 + $0x254] sm:$0xf0] }
 0x176   : > { %v1587_v28 = vpop.f32.mrf.mxu3 }
 0x177   : > { %v1588_v29 = vadd.f32 %v1587_v28, %v3288_v47 }
 0x178   : > { %v1854_v30 = vpop.f32.mrf.mxu2  ;;  %v1679_v14 = vpop.f32.mrf.mxu0 }
 0x179   : > { %v1677_v39 = vadd.f32 %v1676_v56, %v1588_v29  ;;  %v1768_v43 = vpop.f32.mrf.mxu1  ;;  %v2387_v56 = vld [vmem:[%s3089_s30 + $0x240] sm:$0xf]  ;;  %v2392_v29 = vor.u32 %v2828_v9, %v2389_v10 }
 0x17a   : > { %v2388_v40 = vor.u32 %v2831_v15, %v2387_v56  ;;  %v2417_v56 = vld [vmem:[%s3089_s30 + $0x294] sm:$0xf0] }
 0x17b   : > { %v1766_v41 = vadd.f32 %v1765_v0, %v1677_v39  ;;  %1629 = vmatmul.bf16.gmra.mxu3 %v2356_v23  ;;  %1718 = vmatmul.bf16.gmra.mxu0 %v2360_v20  ;;  %v2395_v0 = vld [vmem:[%s3089_s30 + $0x248] sm:$0xf] }
 0x17c   : > { %1807 = vmatmul.bf16.gmra.mxu1 %v2364_v34  ;;  %v2396_v28 = vor.u32 %v2832_v7, %v2395_v0 }
 0x17d   : > { %2746 = vmatmul.msk.bf16.gmra.mxu2 %vm1260_vm0, %v2368_v62  ;;  %v3516_v47 = vadd.f32 %v1854_v30, %v1766_v41 }
 0x17e   : > { %v1590_v48 = vpop.f32.mrf.mxu3 }
 0x17f   : > { %v1591_v33 = vadd.f32 %v1590_v48, %v3301_v58  ;;  %v2384_v58 = vor.u32 %v2827_v17, %v2381_v57  ;;  %v2839_v17 = vld [vmem:[%s3089_s30 + $0x298] sm:$0xf0] }
 0x180   : > { %v1857_v52 = vpop.f32.mrf.mxu2  ;;  %v1681_v53 = vpop.f32.mrf.mxu0  ;;  %v2835_v57 = vld [vmem:[%s3089_s30 + $0x27c] sm:$0xf] }
 0x181   : > { %v1680_v54 = vadd.f32 %v1679_v14, %v1591_v33  ;;  %v1770_v55 = vpop.f32.mrf.mxu1  ;;  %v2834_v33 = vld [vmem:[%s3089_s30 + $0x274] sm:$0xf] }
 0x183   : > { %v1769_v6 = vadd.f32 %v1768_v43, %v1680_v54  ;;  %v2838_v54 = vld [vmem:[%s3089_s30 + $0x290] sm:$0xf0] }
 0x185   : > { %v3524_v44 = vadd.f32 %v1857_v52, %v1769_v6  ;;  %v2409_v52 = vld [vmem:[%s3089_s30 + $0x28c] sm:$0xf0] }
 0x186   : > { %v1592_v18 = vpop.f32.mrf.mxu3 }
 0x187   : > { %v1593_v31 = vadd.f32 %v1592_v18, %v3316_v2 }
 0x188   : > { %v1859_v61 = vpop.f32.mrf.mxu2  ;;  %v1684_v26 = vpop.f32.mrf.mxu0 }
 0x189   : > { %v1682_v30 = vadd.f32 %v1681_v53, %v1593_v31  ;;  %v1773_v23 = vpop.f32.mrf.mxu1  ;;  %v2415_v53 = vld [vmem:[%s3089_s30 + $0x278] sm:$0xf]  ;;  %v2420_v31 = vor.u32 %v2835_v57, %v2417_v56 }
 0x18a   : > { %v2416_v9 = vor.u32 %v2838_v54, %v2415_v53  ;;  %v2445_v53 = vld [vmem:[%s3089_s30 + $0x2cc] sm:$0xf0] }
 0x18b   : > { %v1771_v20 = vadd.f32 %v1770_v55, %v1682_v30  ;;  %1634 = vmatmul.bf16.gmra.mxu3 %v2384_v58  ;;  %1723 = vmatmul.bf16.gmra.mxu0 %v2388_v40  ;;  %v2423_v55 = vld [vmem:[%s3089_s30 + $0x280] sm:$0xf] }
 0x18c   : > { %1812 = vmatmul.bf16.gmra.mxu1 %v2392_v29  ;;  %v2424_v18 = vor.u32 %v2839_v17, %v2423_v55 }
 0x18d   : > { %2747 = vmatmul.msk.bf16.gmra.mxu2 %vm1260_vm0, %v2396_v28  ;;  %v3531_v2 = vadd.f32 %v1859_v61, %v1771_v20 }
 0x18e   : > { %v1595_v14 = vpop.f32.mrf.mxu3 }
 0x18f   : > { %v1596_v62 = vadd.f32 %v1595_v14, %v3320_v21  ;;  %v2412_v21 = vor.u32 %v2834_v33, %v2409_v52  ;;  %v2846_v33 = vld [vmem:[%s3089_s30 + $0x2d0] sm:$0xf0] }
 0x190   : > { %v1862_v34 = vpop.f32.mrf.mxu2  ;;  %v1686_v39 = vpop.f32.mrf.mxu0  ;;  %v2842_v52 = vld [vmem:[%s3089_s30 + $0x2b4] sm:$0xf] }
 0x191   : > { %v1685_v43 = vadd.f32 %v1684_v26, %v1596_v62  ;;  %v1775_v41 = vpop.f32.mrf.mxu1  ;;  %v2841_v62 = vld [vmem:[%s3089_s30 + $0x2ac] sm:$0xf] }
 0x193   : > { %v1774_v48 = vadd.f32 %v1773_v23, %v1685_v43  ;;  %v2845_v43 = vld [vmem:[%s3089_s30 + $0x2c8] sm:$0xf0] }
 0x195   : > { %v3539_v6 = vadd.f32 %v1862_v34, %v1774_v48  ;;  %v2437_v34 = vld [vmem:[%s3089_s30 + $0x2c4] sm:$0xf0] }
 0x196   : > { %v1597_v15 = vpop.f32.mrf.mxu3 }
 0x197   : > { %v1598_v0 = vadd.f32 %v1597_v15, %v3332_v37 }
 0x198   : > { %v1864_v7 = vpop.f32.mrf.mxu2  ;;  %v1689_v10 = vpop.f32.mrf.mxu0 }
 0x199   : > { %v1687_v61 = vadd.f32 %v1686_v39, %v1598_v0  ;;  %v1778_v58 = vpop.f32.mrf.mxu1  ;;  %v2443_v39 = vld [vmem:[%s3089_s30 + $0x2b0] sm:$0xf]  ;;  %v2448_v0 = vor.u32 %v2842_v52, %v2445_v53 }
 0x19a   : > { %v2444_v57 = vor.u32 %v2845_v43, %v2443_v39  ;;  %v2473_v39 = vld [vmem:[%s3089_s30 + $0x304] sm:$0xf0]  ;;  %v3574_v43 = vsel %vm1932_vm1, %v3509_v8, -inf }
 0x19b   : > { %v1776_v40 = vadd.f32 %v1775_v41, %v1687_v61  ;;  %1639 = vmatmul.bf16.gmra.mxu3 %v2412_v21  ;;  %1728 = vmatmul.bf16.gmra.mxu0 %v2416_v9  ;;  %v2451_v41 = vld [vmem:[%s3089_s30 + $0x2b8] sm:$0xf] }
 0x19c   : > { %1817 = vmatmul.bf16.gmra.mxu1 %v2420_v31  ;;  %v2452_v15 = vor.u32 %v2846_v33, %v2451_v41 }
 0x19d   : > { %2748 = vmatmul.msk.bf16.gmra.mxu2 %vm1260_vm0, %v2424_v18  ;;  %v3546_v37 = vadd.f32 %v1864_v7, %v1776_v40 }
 0x19e   : > { %v1600_v26 = vpop.f32.mrf.mxu3 }
 0x19f   : > { %v1601_v28 = vadd.f32 %v1600_v26, %v3336_v46  ;;  %v2440_v46 = vor.u32 %v2841_v62, %v2437_v34  ;;  %v2853_v62 = vld [vmem:[%s3089_s30 + $0x308] sm:$0xf0] }
 0x1a0   : > { %v1867_v29 = vpop.f32.mrf.mxu2  ;;  %v1691_v30 = vpop.f32.mrf.mxu0  ;;  %v2849_v34 = vld [vmem:[%s3089_s30 + $0x2ec] sm:$0xf] }
 0x1a1   : > { %v1690_v23 = vadd.f32 %v1689_v10, %v1601_v28  ;;  %v1780_v20 = vpop.f32.mrf.mxu1  ;;  %v2848_v28 = vld [vmem:[%s3089_s30 + $0x2e4] sm:$0xf] }
 0x1a3   : > { %v1779_v14 = vadd.f32 %v1778_v58, %v1690_v23  ;;  %v2852_v23 = vld [vmem:[%s3089_s30 + $0x300] sm:$0xf0] }
 0x1a5   : > { %v3554_v48 = vadd.f32 %v1867_v29, %v1779_v14  ;;  %v2465_v29 = vld [vmem:[%s3089_s30 + $0x2fc] sm:$0xf0] }
 0x1a6   : > { %v1602_v54 = vpop.f32.mrf.mxu3  ;;  %v2468_v53 = vor.u32 %v2848_v28, %v2465_v29  ;;  %v2493_v28 = vld [vmem:[%s3089_s30 + $0x334] sm:$0xf0]  ;;  %v2499_v29 = vld [vmem:[%s3089_s30 + $0x320] sm:$0xf] }
 0x1a7   : > { %v1603_v55 = vadd.f32 %v1602_v54, %v3348_v1 }
 0x1a8   : > { %v1869_v17 = vpop.f32.mrf.mxu2  ;;  %v1694_v56 = vpop.f32.mrf.mxu0 }
 0x1a9   : > { %v1692_v7 = vadd.f32 %v1691_v30, %v1603_v55  ;;  %v1783_v21 = vpop.f32.mrf.mxu1  ;;  %v2471_v30 = vld [vmem:[%s3089_s30 + $0x2e8] sm:$0xf] }
 0x1aa   : > { %v2472_v54 = vor.u32 %v2852_v23, %v2471_v30  ;;  %v2507_v30 = vld [vmem:[%s3089_s30 + $0x328] sm:$0xf] }
 0x1ab   : > { %v1781_v9 = vadd.f32 %v1780_v20, %v1692_v7  ;;  %1644 = vmatmul.bf16.gmra.mxu3 %v2440_v46  ;;  %1733 = vmatmul.bf16.gmra.mxu0 %v2444_v57  ;;  %v2479_v20 = vld [vmem:[%s3089_s30 + $0x2f0] sm:$0xf]  ;;  %v2476_v57 = vor.u32 %v2849_v34, %v2473_v39  ;;  %v3585_v7 = vsel %vm1932_vm1, %v3516_v47, -inf  ;;  %v2859_v47 = vld [vmem:[%s3089_s30 + $0x338] sm:$0xf0] }
 0x1ac   : > { %1822 = vmatmul.bf16.gmra.mxu1 %v2448_v0  ;;  %v2480_v46 = vor.u32 %v2853_v62, %v2479_v20  ;;  %v2860_v20 = vld [vmem:[%s3089_s30 + $0x340] sm:$0xf0]  ;;  %v2501_v62 = vld [vmem:[%s3089_s30 + $0x33c] sm:$0xf0] }
 0x1ad   : > { %2749 = vmatmul.msk.bf16.gmra.mxu2 %vm1260_vm0, %v2452_v15  ;;  %v3561_v1 = vadd.f32 %v1869_v17, %v1781_v9 }
 0x1ae   : > { %v1605_v10 = vpop.f32.mrf.mxu3 }
 0x1af   : > { %v1606_v18 = vadd.f32 %v1605_v10, %v3354_v16 }
 0x1b0   : > { %v1872_v31 = vpop.f32.mrf.mxu2  ;;  %v1696_v61 = vpop.f32.mrf.mxu0 }
 0x1b1   : > { %v1695_v58 = vadd.f32 %v1694_v56, %v1606_v18  ;;  %v1785_v40 = vpop.f32.mrf.mxu1 }
 0x1b3   : > { %v1784_v26 = vadd.f32 %v1783_v21, %v1695_v58 }
 0x1b5   : > { %v1873_v14 = vadd.f32 %v1872_v31, %v1784_v26  ;;  %v2855_v26 = vld [vmem:[%s3089_s30 + $0x31c] sm:$0xf] }
 0x1b6   : > { %v1607_v16 = vpop.f32.mrf.mxu3 }
 0x1b7   : > { %v3577_v41 = vsel %vm1932_vm1, %v1873_v14, -inf  ;;  %v1608_v33 = vadd.f32 %v1607_v16, %v3367_v32  ;;  %v2856_v14 = vld [vmem:[%s3089_s30 + $0x324] sm:$0xf] }
 0x1b8   : > { %v1874_v52 = vpop.f32.mrf.mxu2  ;;  %v1935_v55 = vmax.f32 %v3574_v43, %v3577_v41  ;;  %v1699_v17 = vpop.f32.mrf.mxu0 }
 0x1b9   : > { %v1697_v56 = vadd.f32 %v1696_v61, %v1608_v33  ;;  %v1788_v15 = vpop.f32.mrf.mxu1 }
 0x1bb   : > { %v1786_v0 = vadd.f32 %v1785_v40, %v1697_v56  ;;  %1649 = vmatmul.bf16.gmra.mxu3 %v2468_v53  ;;  %1738 = vmatmul.bf16.gmra.mxu0 %v2472_v54  ;;  %v2500_v53 = vor.u32 %v2859_v47, %v2499_v29  ;;  %v2521_v29 = vld [vmem:[%s3089_s30 + $0x36c] sm:$0xf0]  ;;  %v2527_v47 = vld [vmem:[%s3089_s30 + $0x358] sm:$0xf] }
 0x1bc   : > { %1827 = vmatmul.bf16.gmra.mxu1 %v2476_v57  ;;  %v2504_v57 = vor.u32 %v2856_v14, %v2501_v62  ;;  %v2863_v14 = vld [vmem:[%s3089_s30 + $0x35c] sm:$0xf]  ;;  %v2529_v62 = vld [vmem:[%s3089_s30 + $0x374] sm:$0xf0] }
 0x1bd   : > { %2750 = vmatmul.msk.bf16.gmra.mxu2 %vm1260_vm0, %v2480_v46  ;;  %v1875_v32 = vadd.f32 %v1874_v52, %v1786_v0  ;;  %v2496_v52 = vor.u32 %v2855_v26, %v2493_v28  ;;  %v2508_v46 = vor.u32 %v2860_v20, %v2507_v30  ;;  %v2862_v28 = vld [vmem:[%s3089_s30 + $0x354] sm:$0xf]  ;;  %v2535_v30 = vld [vmem:[%s3089_s30 + $0x360] sm:$0xf]  ;;  %v2867_v20 = vld [vmem:[%s3089_s30 + $0x378] sm:$0xf0] }
 0x1be   : > { %v1610_v8 = vpop.f32.mrf.mxu3 }
 0x1bf   : > { %v3588_v21 = vsel %vm1932_vm1, %v1875_v32, -inf  ;;  %v1611_v9 = vadd.f32 %v1610_v8, %v3373_v42  ;;  %v3603_v42 = vsel %vm1932_vm1, %v3524_v44, -inf  ;;  %v3614_v32 = vsel %vm1932_vm1, %v3531_v2, -inf  ;;  %v2866_v2 = vld [vmem:[%s3089_s30 + $0x370] sm:$0xf0] }
 0x1c0   : > { %v1877_v10 = vpop.f32.mrf.mxu2  ;;  %v1942_v18 = vmax.f32 %v3585_v7, %v3588_v21  ;;  %v1701_v31 = vpop.f32.mrf.mxu0 }
 0x1c1   : > { %v1700_v61 = vadd.f32 %v1699_v17, %v1611_v9  ;;  %v1790_v58 = vpop.f32.mrf.mxu1 }
 0x1c3   : > { %v1789_v40 = vadd.f32 %v1788_v15, %v1700_v61 }
 0x1c5   : > { %v1878_v23 = vadd.f32 %v1877_v10, %v1789_v40 }
 0x1c6   : > { %v1612_v34 = vpop.f32.mrf.mxu3 }
 0x1c7   : > { %v3606_v39 = vsel %vm1932_vm1, %v1878_v23, -inf  ;;  %v1613_v16 = vadd.f32 %v1612_v34, %v3386_v3 }
 0x1c8   : > { %v1879_v33 = vpop.f32.mrf.mxu2  ;;  %v1949_v54 = vmax.f32 %v3603_v42, %v3606_v39  ;;  %v1704_v17 = vpop.f32.mrf.mxu0 }
 0x1c9   : > { %v1702_v56 = vadd.f32 %v1701_v31, %v1613_v16  ;;  %v1793_v15 = vpop.f32.mrf.mxu1 }
 0x1cb   : > { %v1791_v0 = vadd.f32 %v1790_v58, %v1702_v56  ;;  %1654 = vmatmul.bf16.gmra.mxu3 %v2496_v52  ;;  %1743 = vmatmul.bf16.gmra.mxu0 %v2500_v53  ;;  %v2524_v53 = vor.u32 %v2862_v28, %v2521_v29  ;;  %v2536_v56 = vor.u32 %v2867_v20, %v2535_v30 }
 0x1cc   : > { %1832 = vmatmul.bf16.gmra.mxu1 %v2504_v57 }
 0x1cd   : > { %2751 = vmatmul.msk.bf16.gmra.mxu2 %vm1260_vm0, %v2508_v46  ;;  %v1880_v3 = vadd.f32 %v1879_v33, %v1791_v0 }
 0x1ce   : > { %v1615_v44 = vpop.f32.mrf.mxu3 }
 0x1cf   : > { %v3617_v8 = vsel %vm1932_vm1, %v1880_v3, -inf  ;;  %v1616_v9 = vadd.f32 %v1615_v44, %v3392_v5  ;;  %v3632_v5 = vsel %vm1932_vm1, %v3539_v6, -inf }
 0x1d0   : > { %v1882_v10 = vpop.f32.mrf.mxu2  ;;  %v1956_v31 = vmax.f32 %v3614_v32, %v3617_v8  ;;  %v1706_v61 = vpop.f32.mrf.mxu0 }
 0x1d1   : > { %v1705_v58 = vadd.f32 %v1704_v17, %v1616_v9  ;;  %v1795_v40 = vpop.f32.mrf.mxu1  ;;  %v2528_v17 = vor.u32 %v2866_v2, %v2527_v47 }
 0x1d3   : > { %v1794_v26 = vadd.f32 %v1793_v15, %v1705_v58  ;;  %v2532_v15 = vor.u32 %v2863_v14, %v2529_v62 }
 0x1d5   : > { %v1883_v23 = vadd.f32 %v1882_v10, %v1794_v26 }
 0x1d6   : > { %v1617_v34 = vpop.f32.mrf.mxu3 }
 0x1d7   : > { %v3635_v16 = vsel %vm1932_vm1, %v1883_v23, -inf  ;;  %v1618_v33 = vadd.f32 %v1617_v34, %v3405_v36  ;;  %v3643_v36 = vsel %vm1932_vm1, %v3546_v37, -inf  ;;  %v3653_v23 = vsel %vm1932_vm1, %v3554_v48, -inf }
 0x1d8   : > { %v1884_v52 = vpop.f32.mrf.mxu2  ;;  %v1963_v46 = vmax.f32 %v3632_v5, %v3635_v16  ;;  %v1709_v57 = vpop.f32.mrf.mxu0 }
 0x1d9   : > { %v1707_v0 = vadd.f32 %v1706_v61, %v1618_v33  ;;  %v1798_v3 = vpop.f32.mrf.mxu1 }
 0x1db   : > { %v1796_v44 = vadd.f32 %v1795_v40, %v1707_v0  ;;  %1659 = vmatmul.bf16.gmra.mxu3 %v2524_v53  ;;  %1748 = vmatmul.bf16.gmra.mxu0 %v2528_v17 }
 0x1dc   : > { %1837 = vmatmul.bf16.gmra.mxu1 %v2532_v15 }
 0x1dd   : > { %2752 = vmatmul.msk.bf16.gmra.mxu2 %vm1260_vm0, %v2536_v56  ;;  %v1885_v6 = vadd.f32 %v1884_v52, %v1796_v44 }
 0x1de   : > { %v1620_v9 = vpop.f32.mrf.mxu3 }
 0x1df   : > { %v3646_v10 = vsel %vm1932_vm1, %v1885_v6, -inf  ;;  %v1621_v58 = vadd.f32 %v1620_v9, %v3411_v50 }
 0x1e0   : > { %v1887_v26 = vpop.f32.mrf.mxu2  ;;  %v1970_v61 = vmax.f32 %v3643_v36, %v3646_v10  ;;  %v1711_v40 = vpop.f32.mrf.mxu0 }
 0x1e1   : > { %v1710_v28 = vadd.f32 %v1709_v57, %v1621_v58  ;;  %v1800_v29 = vpop.f32.mrf.mxu1  ;;  %v3663_v57 = vsel %vm1932_vm1, %v3561_v1, -inf }
 0x1e3   : > { %v1799_v47 = vadd.f32 %v1798_v3, %v1710_v28 }
 0x1e5   : > { %v1888_v2 = vadd.f32 %v1887_v26, %v1799_v47 }
 0x1e6   : > { %v1622_v30 = vpop.f32.mrf.mxu3 }
 0x1e7   : > { %v3656_v37 = vsel %vm1932_vm1, %v1888_v2, -inf  ;;  %v1623_v20 = vadd.f32 %v1622_v30, %v3424_v12 }
 0x1e8   : > { %v1889_v50 = vpop.f32.mrf.mxu2  ;;  %v1977_v14 = vmax.f32 %v3653_v23, %v3656_v37  ;;  %v1714_v62 = vpop.f32.mrf.mxu0 }
 0x1e9   : > { %v1712_v34 = vadd.f32 %v1711_v40, %v1623_v20  ;;  %v1803_v33 = vpop.f32.mrf.mxu1 }
 0x1eb   : > { %v1801_v52 = vadd.f32 %v1800_v29, %v1712_v34 }
 0x1ed   : > { %v1890_v53 = vadd.f32 %v1889_v50, %v1801_v52 }
 0x1ee   : > { %v1625_v17 = vpop.f32.mrf.mxu3 }
 0x1ef   : > { %v3666_v48 = vsel %vm1932_vm1, %v1890_v53, -inf  ;;  %v1626_v56 = vadd.f32 %v1625_v17, %v3430_v25 }
 0x1f0   : > { %v1892_v12 = vpop.f32.mrf.mxu2  ;;  %v1984_v15 = vmax.f32 %v3663_v57, %v3666_v48  ;;  %v1716_v0 = vpop.f32.mrf.mxu0 }
 0x1f1   : > { %v1715_v3 = vadd.f32 %v1714_v62, %v1626_v56  ;;  %v1805_v44 = vpop.f32.mrf.mxu1 }
 0x1f3   : > { %v1804_v6 = vadd.f32 %v1803_v33, %v1715_v3 }
 0x1f5   : > { %v1893_v9 = vadd.f32 %v1892_v12, %v1804_v6 }
 0x1f6   : > { %v1627_v58 = vpop.f32.mrf.mxu3 }
 0x1f7   : > { %v1936_v26 = vsel %vm1932_vm1, %v1893_v9, -inf  ;;  %v1628_v1 = vadd.f32 %v1627_v58, %v3443_v49 }
 0x1f8   : > { %v1894_v40 = vpop.f32.mrf.mxu2  ;;  %v3676_v28 = vmax.f32 %v1935_v55, %v1936_v26  ;;  %v1719_v25 = vpop.f32.mrf.mxu0 }
 0x1f9   : > { %v1717_v29 = vadd.f32 %v1716_v0, %v1628_v1  ;;  %v1808_v47 = vpop.f32.mrf.mxu1 }
 0x1fb   : > { %v1806_v2 = vadd.f32 %v1805_v44, %v1717_v29 }
 0x1fd   : > { %v1895_v30 = vadd.f32 %v1894_v40, %v1806_v2 }
 0x1fe   : > { %v1630_v20 = vpop.f32.mrf.mxu3 }
 0x1ff   : > { %v1943_v50 = vsel %vm1932_vm1, %v1895_v30, -inf  ;;  %v1631_v62 = vadd.f32 %v1630_v20, %v3449_v60 }
 0x200   : > { %v1897_v34 = vpop.f32.mrf.mxu2  ;;  %v3683_v49 = vmax.f32 %v1942_v18, %v1943_v50  ;;  %v1721_v33 = vpop.f32.mrf.mxu0 }
 0x201   : > { %v1720_v43 = vadd.f32 %v1719_v25, %v1631_v62  ;;  %v1810_v41 = vpop.f32.mrf.mxu1 }
 0x203   : > { %v1809_v55 = vadd.f32 %v1808_v47, %v1720_v43 }
 0x205   : > { %v1898_v52 = vadd.f32 %v1897_v34, %v1809_v55 }
 0x206   : > { %v1632_v53 = vpop.f32.mrf.mxu3 }
 0x207   : > { %v1950_v17 = vsel %vm1932_vm1, %v1898_v52, -inf  ;;  %v1633_v56 = vadd.f32 %v1632_v53, %v3462_v27 }
 0x208   : > { %v1899_v12 = vpop.f32.mrf.mxu2  ;;  %v3690_v60 = vmax.f32 %v1949_v54, %v1950_v17  ;;  %v1724_v0 = vpop.f32.mrf.mxu0 }
 0x209   : > { %v1722_v7 = vadd.f32 %v1721_v33, %v1633_v56  ;;  %v1813_v21 = vpop.f32.mrf.mxu1 }
 0x20b   : > { %v1811_v18 = vadd.f32 %v1810_v41, %v1722_v7 }
 0x20d   : > { %v1900_v3 = vadd.f32 %v1899_v12, %v1811_v18 }
 0x20e   : > { %v1635_v44 = vpop.f32.mrf.mxu3 }
 0x20f   : > { %v1957_v6 = vsel %vm1932_vm1, %v1900_v3, -inf  ;;  %v1636_v9 = vadd.f32 %v1635_v44, %v3468_v38  ;;  %v3730_v44 = vld [vmem:[%s3790_s2] ss:$0 sm:$0xff] }
 0x210   : > { %v1902_v58 = vpop.f32.mrf.mxu2  ;;  %v3697_v27 = vmax.f32 %v1956_v31, %v1957_v6  ;;  %v1726_v26 = vpop.f32.mrf.mxu0 }
 0x211   : > { %v1725_v42 = vadd.f32 %v1724_v0, %v1636_v9  ;;  %v1815_v39 = vpop.f32.mrf.mxu1 }
 0x213   : > { %v1814_v54 = vadd.f32 %v1813_v21, %v1725_v42 }
 0x215   : > { %v1903_v1 = vadd.f32 %v1902_v58, %v1814_v54 }
 0x216   : > { %v1637_v40 = vpop.f32.mrf.mxu3 }
 0x217   : > { %v1964_v25 = vsel %vm1932_vm1, %v1903_v1, -inf  ;;  %v1638_v29 = vadd.f32 %v1637_v40, %v3481_v4 }
 0x218   : > { %v1904_v47 = vpop.f32.mrf.mxu2  ;;  %v3704_v38 = vmax.f32 %v1963_v46, %v1964_v25  ;;  %v1729_v2 = vpop.f32.mrf.mxu0 }
 0x219   : > { %v1727_v32 = vadd.f32 %v1726_v26, %v1638_v29  ;;  %v1818_v8 = vpop.f32.mrf.mxu1 }
 0x21b   : > { %v1816_v31 = vadd.f32 %v1815_v39, %v1727_v32 }
 0x21d   : > { %v1905_v30 = vadd.f32 %v1904_v47, %v1816_v31 }
 0x21e   : > { %v1640_v20 = vpop.f32.mrf.mxu3 }
 0x21f   : > { %v1971_v50 = vsel %vm1932_vm1, %v1905_v30, -inf  ;;  %v1641_v62 = vadd.f32 %v1640_v20, %v3487_v19 }
 0x220   : > { %v1907_v34 = vpop.f32.mrf.mxu2  ;;  %v3711_v4 = vmax.f32 %v1970_v61, %v1971_v50  ;;  %v1731_v33 = vpop.f32.mrf.mxu0 }
 0x221   : > { %v1730_v5 = vadd.f32 %v1729_v2, %v1641_v62  ;;  %v1820_v16 = vpop.f32.mrf.mxu1 }
 0x223   : > { %v1819_v46 = vadd.f32 %v1818_v8, %v1730_v5 }
 0x225   : > { %v1908_v43 = vadd.f32 %v1907_v34, %v1819_v46 }
 0x226   : > { %v1642_v41 = vpop.f32.mrf.mxu3 }
 0x227   : > { %v1978_v55 = vsel %vm1932_vm1, %v1908_v43, -inf  ;;  %v1643_v52 = vadd.f32 %v1642_v41, %v3500_v51 }
 0x228   : > { %v1909_v53 = vpop.f32.mrf.mxu2  ;;  %v3718_v19 = vmax.f32 %v1977_v14, %v1978_v55  ;;  %v1734_v17 = vpop.f32.mrf.mxu0 }
 0x229   : > { %v1732_v36 = vadd.f32 %v1731_v33, %v1643_v52  ;;  %v1823_v10 = vpop.f32.mrf.mxu1 }
 0x22b   : > { %v1821_v61 = vadd.f32 %v1820_v16, %v1732_v36 }
 0x22d   : > { %v1910_v56 = vadd.f32 %v1909_v53, %v1821_v61 }
 0x22e   : > { %v1645_v12 = vpop.f32.mrf.mxu3 }
 0x22f   : > { %v1985_v0 = vsel %vm1932_vm1, %v1910_v56, -inf  ;;  %v1646_v7 = vadd.f32 %v1645_v12, %v3428_v24 }
 0x230   : > { %v1912_v21 = vpop.f32.mrf.mxu2  ;;  %v3725_v51 = vmax.f32 %v1984_v15, %v1985_v0  ;;  %v1736_v23 = vpop.f32.mrf.mxu0 }
 0x231   : > { %v1735_v37 = vadd.f32 %v1734_v17, %v1646_v7  ;;  %v1825_v14 = vpop.f32.mrf.mxu1 }
 0x233   : > { %v1824_v18 = vadd.f32 %v1823_v10, %v1735_v37 }
 0x235   : > { %v1913_v3 = vadd.f32 %v1912_v21, %v1824_v18 }
 0x236   : > { %v1647_v6 = vpop.f32.mrf.mxu3 }
 0x237   : > { %v1938_v24 = vsel %vm1932_vm1, %v1913_v3, -inf  ;;  %v1648_v9 = vadd.f32 %v1647_v6, %v3441_v45 }
 0x238   : > { %v1914_v58 = vpop.f32.mrf.mxu2  ;;  %v1939_v57 = vmax.f32 %v3676_v28, %v1938_v24  ;;  %v1739_v48 = vpop.f32.mrf.mxu0 }
 0x239   : > { %v1737_v15 = vadd.f32 %v1736_v23, %v1648_v9  ;;  %v1828_v26 = vpop.f32.mrf.mxu1 }
 0x23a   : > { %v1993_v42 = vadd.f32 %v3730_v44, %v1939_v57 }
 0x23b   : > { %v1826_v39 = vadd.f32 %v1825_v14, %v1737_v15 }
 0x23c   : > { %v2001_v54 = vmax.f32 %v1993_v42, 0.0 }
 0x23d   : > { %v1915_v1 = vadd.f32 %v1914_v58, %v1826_v39 }
 0x23e   : > { %v2009_v45 = vpack.c.bf16 %v2001_v54, %v2001_v54  ;;  %v1650_v40 = vpop.f32.mrf.mxu3 }
 0x23f   : > { %v1945_v28 = vsel %vm1932_vm1, %v1915_v1, -inf  ;;  %v1651_v25 = vadd.f32 %v1650_v40, %v3447_v59 }
 0x240   : > { %v1917_v29 = vpop.f32.mrf.mxu2  ;;  %2018 = vst.msk [vmem:[%s3740_s24] sm:$0xf] %vm2017_vm2, %v2009_v45  ;;  %v1946_v47 = vmax.f32 %v3683_v49, %v1945_v28  ;;  %v1741_v2 = vpop.f32.mrf.mxu0 }
 0x241   : > { %v1740_v32 = vadd.f32 %v1739_v48, %v1651_v25  ;;  %v1830_v31 = vpop.f32.mrf.mxu1 }
 0x242   : > { %v1994_v8 = vadd.f32 %v3730_v44, %v1946_v47 }
 0x243   : > { %v1829_v30 = vadd.f32 %v1828_v26, %v1740_v32 }
 0x244   : > { %v2002_v20 = vmax.f32 %v1994_v8, 0.0 }
 0x245   : > { %v1918_v50 = vadd.f32 %v1917_v29, %v1829_v30 }
 0x246   : > { %v2010_v62 = vpack.c.bf16 %v2002_v20, %v2002_v20  ;;  %v1652_v34 = vpop.f32.mrf.mxu3 }
 0x247   : > { %v1952_v33 = vsel %vm1932_vm1, %v1918_v50, -inf  ;;  %v1653_v59 = vadd.f32 %v1652_v34, %v3460_v22 }
 0x248   : > { %v1919_v5 = vpop.f32.mrf.mxu2  ;;  %2019 = vst.msk [vmem:[%s3740_s24 + $0x4] sm:$0xf] %vm2017_vm2, %v2010_v62  ;;  %v1953_v49 = vmax.f32 %v3690_v60, %v1952_v33  ;;  %v1744_v43 = vpop.f32.mrf.mxu0 }
 0x249   : > { %v1742_v16 = vadd.f32 %v1741_v2, %v1653_v59  ;;  %v1833_v52 = vpop.f32.mrf.mxu1 }
 0x24a   : > { %v1995_v46 = vadd.f32 %v3730_v44, %v1953_v49 }
 0x24b   : > { %v1831_v41 = vadd.f32 %v1830_v31, %v1742_v16 }
 0x24c   : > { %v2003_v55 = vmax.f32 %v1995_v46, 0.0 }
 0x24d   : > { %v1920_v53 = vadd.f32 %v1919_v5, %v1831_v41 }
 0x24e   : > { %v2011_v17 = vpack.c.bf16 %v2003_v55, %v2003_v55  ;;  %v1655_v36 = vpop.f32.mrf.mxu3 }
 0x24f   : > { %v1959_v10 = vsel %vm1932_vm1, %v1920_v53, -inf  ;;  %v1656_v22 = vadd.f32 %v1655_v36, %v3466_v35 }
 0x250   : > { %v1922_v61 = vpop.f32.mrf.mxu2  ;;  %2020 = vst.msk [vmem:[%s3740_s24 + $0x8] sm:$0xf] %vm2017_vm2, %v2011_v17  ;;  %v1960_v60 = vmax.f32 %v3697_v27, %v1959_v10  ;;  %v1746_v21 = vpop.f32.mrf.mxu0 }
 0x251   : > { %v1745_v56 = vadd.f32 %v1744_v43, %v1656_v22  ;;  %v1835_v14 = vpop.f32.mrf.mxu1 }
 0x252   : > { %v1996_v12 = vadd.f32 %v3730_v44, %v1960_v60 }
 0x253   : > { %v1834_v0 = vadd.f32 %v1833_v52, %v1745_v56 }
 0x254   : > { %v2004_v7 = vmax.f32 %v1996_v12, 0.0 }
 0x255   : > { %v1923_v23 = vadd.f32 %v1922_v61, %v1834_v0 }
 0x256   : > { %v2012_v37 = vpack.c.bf16 %v2004_v7, %v2004_v7  ;;  %v1657_v18 = vpop.f32.mrf.mxu3 }
 0x257   : > { %v1966_v3 = vsel %vm1932_vm1, %v1923_v23, -inf  ;;  %v1658_v35 = vadd.f32 %v1657_v18, %v3479_v63 }
 0x258   : > { %2021 = vst.msk [vmem:[%s3740_s24 + $0xc] sm:$0xf] %vm2017_vm2, %v2012_v37  ;;  %v1967_v6 = vmax.f32 %v3704_v38, %v1966_v3  ;;  %v1924_v27 = vpop.f32.mrf.mxu2  ;;  %v1749_v26 = vpop.f32.mrf.mxu0 }
 0x259   : > { %v1747_v24 = vadd.f32 %v1746_v21, %v1658_v35  ;;  %v1838_v38 = vpop.f32.mrf.mxu1 }
 0x25a   : > { %v1997_v9 = vadd.f32 %v3730_v44, %v1967_v6 }
 0x25b   : > { %v1836_v58 = vadd.f32 %v1835_v14, %v1747_v24 }
 0x25c   : > { %v2005_v57 = vmax.f32 %v1997_v9, 0.0 }
 0x25d   : > { %v1925_v48 = vadd.f32 %v1924_v27, %v1836_v58 }
 0x25e   : > { %v2013_v15 = vpack.c.bf16 %v2005_v57, %v2005_v57  ;;  %v1660_v42 = vpop.f32.mrf.mxu3 }
 0x25f   : > { %v1973_v39 = vsel %vm1932_vm1, %v1925_v48, -inf  ;;  %v1661_v54 = vadd.f32 %v1660_v42, %v3485_v11 }
 0x260   : > { %2022 = vst.msk [vmem:[%s3740_s24 + $0x10] sm:$0xf] %vm2017_vm2, %v2013_v15  ;;  %v1974_v63 = vmax.f32 %v3711_v4, %v1973_v39  ;;  %v1927_v40 = vpop.f32.mrf.mxu2  ;;  %v1751_v4 = vpop.f32.mrf.mxu0 }
 0x261   : > { %v1750_v1 = vadd.f32 %v1749_v26, %v1661_v54  ;;  %v1840_v20 = vpop.f32.mrf.mxu1 }
 0x262   : > { %v1998_v45 = vadd.f32 %v3730_v44, %v1974_v63 }
 0x263   : > { %v1839_v28 = vadd.f32 %v1838_v38, %v1750_v1 }
 0x264   : > { %v2006_v25 = vmax.f32 %v1998_v45, 0.0 }
 0x265   : > { %v1928_v29 = vadd.f32 %v1927_v40, %v1839_v28 }
 0x266   : > { %v2014_v47 = vpack.c.bf16 %v2006_v25, %v2006_v25  ;;  %v1662_v2 = vpop.f32.mrf.mxu3 }
 0x267   : > { %v1980_v32 = vsel %vm1932_vm1, %v1928_v29, -inf  ;;  %v1663_v8 = vadd.f32 %v1662_v2, %v3498_v13 }
 0x268   : > { %2023 = vst.msk [vmem:[%s3740_s24 + $0x14] sm:$0xf] %vm2017_vm2, %v2014_v47  ;;  %v1981_v11 = vmax.f32 %v3718_v19, %v1980_v32  ;;  %v1929_v34 = vpop.f32.mrf.mxu2 }
 0x269   : > { %v1752_v31 = vadd.f32 %v1751_v4, %v1663_v8 }
 0x26a   : > { %v1999_v30 = vadd.f32 %v3730_v44, %v1981_v11 }
 0x26b   : > { %v1841_v50 = vadd.f32 %v1840_v20, %v1752_v31 }
 0x26c   : > { %v2007_v62 = vmax.f32 %v1999_v30, 0.0 }
 0x26d   : > { %v1930_v33 = vadd.f32 %v1929_v34, %v1841_v50 }
 0x26e   : > { %v2015_v59 = vpack.c.bf16 %v2007_v62, %v2007_v62 }
 0x26f   : > { %v1987_v5 = vsel %vm1932_vm1, %v1930_v33, -inf }
 0x270   : > { %2024 = vst.msk [vmem:[%s3740_s24 + $0x18] sm:$0xf] %vm2017_vm2, %v2015_v59  ;;  %v1988_v13 = vmax.f32 %v3725_v51, %v1987_v5 }
 0x272   : > { %v2000_v49 = vadd.f32 %v3730_v44, %v1988_v13 }
 0x274   : > { %v2008_v19 = vmax.f32 %v2000_v49, 0.0 }
 0x276   : > { %v2016_v16 = vpack.c.bf16 %v2008_v19, %v2008_v19 }
 0x278   : > { %2025 = vst.msk [vmem:[%s3740_s24 + $0x1c] sm:$0xf] %vm2017_vm2, %v2016_v16 }
 0x279 PF: > { %s13_s12 = sadd.s32 1, %s2958_s12  }
 0x27a   : > { %p10_p4 = scmp.ge.s32.totalorder %s13_s12, 4  }
 0x27c   :  { %12 = sbr.rel (!%p10_p4) target bundleno = 1 (0x1), region = 62 }

// kernel: _lambda_.7
= control target key start
LH: loop header
LB: loop body
LE: loop exit
PB: predicated region body
PF: predicated region fallthrough
CT: control target
= control target key end

     0   :  { %14 = vsyncpa [#allocation3], 0  ;;  %vm917_vm0 = vcmask 523264   ;;  %s3362_s0 = inlined_call_operand.vmem [shape: bf16[2,576], index: 0, kind: input, shape index: {}]   ;;  %s3363_s1 = inlined_call_operand.vmem [shape: bf16[576,512], index: 1, kind: input, shape index: {}]   ;;  %s3364_s2 = inlined_call_operand.vmem [shape: f32[1,512], index: 2, kind: input, shape index: {}]   ;;  %s3365_s3 = inlined_call_operand.vmem [shape: f32[512,10], index: 3, kind: input, shape index: {}]   ;;  %s3366_s4 = inlined_call_operand.vmem [shape: f32[1,10], index: 4, kind: input, shape index: {}]   ;;  %s3367_s5 = inlined_call_operand.vmem [shape: s32[2,1], index: 5, kind: input, shape index: {}]   ;;  %s3368_s6 = inlined_call_operand.vmem [shape: f32[2,1], index: 6, kind: input, shape index: {}]   ;;  %s3369_s7 = inlined_call_operand.hbm [shape: f32[2,10], index: 7, kind: output, shape index: {0}]   ;;  %s3370_s8 = inlined_call_operand.hbm [shape: f32[1,1], index: 8, kind: output, shape index: {1}]  }
   0x1   :  { %v1520_v0 = vld [vmem:[%s3363_s1 + $0xe0] sm:$0xf]  ;;  %v2016_v1 = vld [vmem:[%s3363_s1 + $0xec] sm:$0xf0] }
   0x2   :  { %v1648_v2 = vld [vmem:[%s3363_s1 + $0x1e0] sm:$0xf]  ;;  %v1521_v3 = vor.u32 %v2016_v1, %v1520_v0  ;;  %v2048_v4 = vld [vmem:[%s3363_s1 + $0x1ec] sm:$0xf0] }
   0x3   :  { %v1776_v5 = vld [vmem:[%s3363_s1 + $0x2e0] sm:$0xf]  ;;  %v2080_v6 = vld [vmem:[%s3363_s1 + $0x2ec] sm:$0xf0]  ;;  %v1649_v7 = vor.u32 %v2048_v4, %v1648_v2 }
   0x4   :  { %v1777_v8 = vor.u32 %v2080_v6, %v1776_v5  ;;  %v1904_v9 = vld [vmem:[%s3363_s1 + $0x3e0] sm:$0xf]  ;;  %v2112_v10 = vld [vmem:[%s3363_s1 + $0x3ec] sm:$0xf0]  ;;  %920 = vmatpush.bf16.msra.mxu0 %v1521_v3 }
   0x5   :  { %v1504_v11 = vld [vmem:[%s3363_s1 + $0xc0] sm:$0xf]  ;;  %v1905_v12 = vor.u32 %v2112_v10, %v1904_v9  ;;  %v2012_v13 = vld [vmem:[%s3363_s1 + $0xcc] sm:$0xf0]  ;;  %933 = vmatpush.bf16.msra.mxu1 %v1649_v7 }
   0x6   :  { %v1632_v14 = vld [vmem:[%s3363_s1 + $0x1c0] sm:$0xf]  ;;  %v2044_v15 = vld [vmem:[%s3363_s1 + $0x1cc] sm:$0xf0]  ;;  %946 = vmatpush.bf16.msra.mxu2 %v1777_v8  ;;  %v1505_v16 = vor.u32 %v2012_v13, %v1504_v11 }
   0x7   :  { %v1633_v17 = vor.u32 %v2044_v15, %v1632_v14  ;;  %v1760_v18 = vld [vmem:[%s3363_s1 + $0x2c0] sm:$0xf]  ;;  %v2076_v19 = vld [vmem:[%s3363_s1 + $0x2cc] sm:$0xf0]  ;;  %959 = vmatpush.bf16.msra.mxu3 %v1905_v12 }
   0x8   :  { %v1888_v20 = vld [vmem:[%s3363_s1 + $0x3c0] sm:$0xf]  ;;  %v1761_v21 = vor.u32 %v2076_v19, %v1760_v18  ;;  %v2108_v22 = vld [vmem:[%s3363_s1 + $0x3cc] sm:$0xf0]  ;;  %921 = vmatpush.bf16.msra.mxu0 %v1505_v16 }
   0x9   :  { %v1488_v23 = vld [vmem:[%s3363_s1 + $0xa0] sm:$0xf]  ;;  %v2008_v24 = vld [vmem:[%s3363_s1 + $0xac] sm:$0xf0]  ;;  %v1889_v25 = vor.u32 %v2108_v22, %v1888_v20  ;;  %934 = vmatpush.bf16.msra.mxu1 %v1633_v17 }
   0xa   :  { %v1616_v26 = vld [vmem:[%s3363_s1 + $0x1a0] sm:$0xf]  ;;  %v2040_v27 = vld [vmem:[%s3363_s1 + $0x1ac] sm:$0xf0]  ;;  %v1489_v29 = vor.u32 %v2008_v24, %v1488_v23  ;;  %947 = vmatpush.bf16.msra.mxu2 %v1761_v21 }
   0xb   :  { %v1744_v28 = vld [vmem:[%s3363_s1 + $0x2a0] sm:$0xf]  ;;  %v2072_v30 = vld [vmem:[%s3363_s1 + $0x2ac] sm:$0xf0]  ;;  %v1617_v33 = vor.u32 %v2040_v27, %v1616_v26  ;;  %960 = vmatpush.bf16.msra.mxu3 %v1889_v25 }
   0xc   :  { %v1872_v31 = vld [vmem:[%s3363_s1 + $0x3a0] sm:$0xf]  ;;  %v2104_v32 = vld [vmem:[%s3363_s1 + $0x3ac] sm:$0xf0]  ;;  %v1745_v34 = vor.u32 %v2072_v30, %v1744_v28  ;;  %922 = vmatpush.bf16.msra.mxu0 %v1489_v29  ;;  %v2014_v30 = vld [vmem:[%s3363_s1 + $0xe4] sm:$0xf] }
   0xd   :  { %v1472_v35 = vld [vmem:[%s3363_s1 + $0x80] sm:$0xf]  ;;  %v2004_v36 = vld [vmem:[%s3363_s1 + $0x8c] sm:$0xf0]  ;;  %v1873_v38 = vor.u32 %v2104_v32, %v1872_v31  ;;  %935 = vmatpush.bf16.msra.mxu1 %v1617_v33  ;;  %v1522_v31 = vld [vmem:[%s3363_s1 + $0xf0] sm:$0xf0] }
   0xe   :  { %v1600_v37 = vld [vmem:[%s3363_s1 + $0x180] sm:$0xf]  ;;  %v2036_v39 = vld [vmem:[%s3363_s1 + $0x18c] sm:$0xf0]  ;;  %v1473_v44 = vor.u32 %v2004_v36, %v1472_v35  ;;  %948 = vmatpush.bf16.msra.mxu2 %v1745_v34  ;;  %v2046_v34 = vld [vmem:[%s3363_s1 + $0x1e4] sm:$0xf] }
   0xf   :  { %v1728_v40 = vld [vmem:[%s3363_s1 + $0x280] sm:$0xf]  ;;  %v2068_v41 = vld [vmem:[%s3363_s1 + $0x28c] sm:$0xf0]  ;;  %v1601_v45 = vor.u32 %v2036_v39, %v1600_v37  ;;  %961 = vmatpush.bf16.msra.mxu3 %v1873_v38  ;;  %v1650_v35 = vld [vmem:[%s3363_s1 + $0x1f0] sm:$0xf0] }
  0x10   :  { %v1856_v42 = vld [vmem:[%s3363_s1 + $0x380] sm:$0xf]  ;;  %v2100_v43 = vld [vmem:[%s3363_s1 + $0x38c] sm:$0xf0]  ;;  %v1729_v46 = vor.u32 %v2068_v41, %v1728_v40  ;;  %923 = vmatpush.bf16.msra.mxu0 %v1473_v44  ;;  %v2078_v38 = vld [vmem:[%s3363_s1 + $0x2e4] sm:$0xf] }
  0x11   :  { %v1456_v47 = vld [vmem:[%s3363_s1 + $0x60] sm:$0xf]  ;;  %v2000_v48 = vld [vmem:[%s3363_s1 + $0x6c] sm:$0xf0]  ;;  %v1857_v50 = vor.u32 %v2100_v43, %v1856_v42  ;;  %936 = vmatpush.bf16.msra.mxu1 %v1601_v45  ;;  %v1778_v39 = vld [vmem:[%s3363_s1 + $0x2f0] sm:$0xf0]  ;;  %v1525_v42 = vor.u32 %v2014_v30, %v1522_v31  ;;  %v1653_v43 = vor.u32 %v2046_v34, %v1650_v35 }
  0x12   :  { %v1584_v49 = vld [vmem:[%s3363_s1 + $0x160] sm:$0xf]  ;;  %v2032_v51 = vld [vmem:[%s3363_s1 + $0x16c] sm:$0xf0]  ;;  %v1457_v56 = vor.u32 %v2000_v48, %v1456_v47  ;;  %949 = vmatpush.bf16.msra.mxu2 %v1729_v46  ;;  %v2010_v46 = vld [vmem:[%s3363_s1 + $0xc4] sm:$0xf]  ;;  %v1781_v47 = vor.u32 %v2078_v38, %v1778_v39 }
  0x13   :  { %v1712_v52 = vld [vmem:[%s3363_s1 + $0x260] sm:$0xf]  ;;  %v2064_v53 = vld [vmem:[%s3363_s1 + $0x26c] sm:$0xf0]  ;;  %v1585_v57 = vor.u32 %v2032_v51, %v1584_v49  ;;  %962 = vmatpush.bf16.msra.mxu3 %v1857_v50  ;;  %v1506_v48 = vld [vmem:[%s3363_s1 + $0xd0] sm:$0xf0] }
  0x14   :  { %v1840_v54 = vld [vmem:[%s3363_s1 + $0x360] sm:$0xf]  ;;  %v2096_v55 = vld [vmem:[%s3363_s1 + $0x36c] sm:$0xf0]  ;;  %v1713_v58 = vor.u32 %v2064_v53, %v1712_v52  ;;  %924 = vmatpush.bf16.msra.mxu0 %v1457_v56  ;;  %v2042_v49 = vld [vmem:[%s3363_s1 + $0x1c4] sm:$0xf] }
  0x15   :  { %v1440_v59 = vld [vmem:[%s3363_s1 + $0x40] sm:$0xf]  ;;  %v1996_v60 = vld [vmem:[%s3363_s1 + $0x4c] sm:$0xf0]  ;;  %v1841_v62 = vor.u32 %v2096_v55, %v1840_v54  ;;  %937 = vmatpush.bf16.msra.mxu1 %v1585_v57  ;;  %v1634_v50 = vld [vmem:[%s3363_s1 + $0x1d0] sm:$0xf0] }
  0x16   :  { %v1568_v61 = vld [vmem:[%s3363_s1 + $0x140] sm:$0xf]  ;;  %v2028_v63 = vld [vmem:[%s3363_s1 + $0x14c] sm:$0xf0]  ;;  %v1441_v4 = vor.u32 %v1996_v60, %v1440_v59  ;;  %950 = vmatpush.bf16.msra.mxu2 %v1713_v58  ;;  %v2074_v51 = vld [vmem:[%s3363_s1 + $0x2c4] sm:$0xf]  ;;  %v1509_v58 = vor.u32 %v2010_v46, %v1506_v48  ;;  %v1637_v59 = vor.u32 %v2042_v49, %v1634_v50 }
  0x17   :  { %v1696_v0 = vld [vmem:[%s3363_s1 + $0x240] sm:$0xf]  ;;  %v2060_v1 = vld [vmem:[%s3363_s1 + $0x24c] sm:$0xf0]  ;;  %v1569_v5 = vor.u32 %v2028_v63, %v1568_v61  ;;  %963 = vmatpush.bf16.msra.mxu3 %v1841_v62  ;;  %v1762_v52 = vld [vmem:[%s3363_s1 + $0x2d0] sm:$0xf0] }
  0x18   :  { %v1824_v2 = vld [vmem:[%s3363_s1 + $0x340] sm:$0xf]  ;;  %v2092_v3 = vld [vmem:[%s3363_s1 + $0x34c] sm:$0xf0]  ;;  %v1697_v6 = vor.u32 %v2060_v1, %v1696_v0  ;;  %925 = vmatpush.bf16.msra.mxu0 %v1441_v4  ;;  %v2006_v56 = vld [vmem:[%s3363_s1 + $0xa4] sm:$0xf]  ;;  %v1765_v63 = vor.u32 %v2074_v51, %v1762_v52 }
  0x19   :  { %v1424_v7 = vld [vmem:[%s3363_s1 + $0x20] sm:$0xf]  ;;  %v1992_v8 = vld [vmem:[%s3363_s1 + $0x2c] sm:$0xf0]  ;;  %v1825_v10 = vor.u32 %v2092_v3, %v1824_v2  ;;  %938 = vmatpush.bf16.msra.mxu1 %v1569_v5  ;;  %v1490_v57 = vld [vmem:[%s3363_s1 + $0xb0] sm:$0xf0] }
  0x1a   :  { %v1552_v9 = vld [vmem:[%s3363_s1 + $0x120] sm:$0xf]  ;;  %v2024_v11 = vld [vmem:[%s3363_s1 + $0x12c] sm:$0xf0]  ;;  %v1425_v17 = vor.u32 %v1992_v8, %v1424_v7  ;;  %951 = vmatpush.bf16.msra.mxu2 %v1697_v6  ;;  %v2038_v0 = vld [vmem:[%s3363_s1 + $0x1a4] sm:$0xf]  ;;  %v1493_v7 = vor.u32 %v2006_v56, %v1490_v57 }
  0x1b   :  { %v1680_v12 = vld [vmem:[%s3363_s1 + $0x220] sm:$0xf]  ;;  %v2056_v13 = vld [vmem:[%s3363_s1 + $0x22c] sm:$0xf0]  ;;  %v1553_v21 = vor.u32 %v2024_v11, %v1552_v9  ;;  %964 = vmatpush.bf16.msra.mxu3 %v1825_v10  ;;  %v1618_v1 = vld [vmem:[%s3363_s1 + $0x1b0] sm:$0xf0] }
  0x1c   :  { %v1808_v14 = vld [vmem:[%s3363_s1 + $0x320] sm:$0xf]  ;;  %v2088_v15 = vld [vmem:[%s3363_s1 + $0x32c] sm:$0xf0]  ;;  %v1681_v22 = vor.u32 %v2056_v13, %v1680_v12  ;;  %926 = vmatpush.bf16.msra.mxu0 %v1425_v17  ;;  %v2070_v3 = vld [vmem:[%s3363_s1 + $0x2a4] sm:$0xf]  ;;  %v1621_v8 = vor.u32 %v2038_v0, %v1618_v1 }
  0x1d   :  { %v1408_v16 = vld [vmem:[%s3363_s1] sm:$0xf]  ;;  %v1988_v18 = vld [vmem:[%s3363_s1 + $0xc] sm:$0xf0]  ;;  %v1809_v26 = vor.u32 %v2088_v15, %v1808_v14  ;;  %939 = vmatpush.bf16.msra.mxu1 %v1553_v21  ;;  %v1746_v4 = vld [vmem:[%s3363_s1 + $0x2b0] sm:$0xf0] }
  0x1e   :  { %v1536_v19 = vld [vmem:[%s3363_s1 + $0x100] sm:$0xf]  ;;  %v2020_v20 = vld [vmem:[%s3363_s1 + $0x10c] sm:$0xf0]  ;;  %v1409_v33 = vor.u32 %v1988_v18, %v1408_v16  ;;  %952 = vmatpush.bf16.msra.mxu2 %v1681_v22  ;;  %v2002_v10 = vld [vmem:[%s3363_s1 + $0x84] sm:$0xf]  ;;  %v1749_v12 = vor.u32 %v2070_v3, %v1746_v4 }
  0x1f   :  { %v1664_v23 = vld [vmem:[%s3363_s1 + $0x200] sm:$0xf]  ;;  %v2052_v24 = vld [vmem:[%s3363_s1 + $0x20c] sm:$0xf0]  ;;  %v1537_v36 = vor.u32 %v2020_v20, %v1536_v19  ;;  %965 = vmatpush.bf16.msra.mxu3 %v1809_v26  ;;  %v1474_v11 = vld [vmem:[%s3363_s1 + $0x90] sm:$0xf0] }
  0x20   :  { %v1792_v25 = vld [vmem:[%s3363_s1 + $0x300] sm:$0xf]  ;;  %v2084_v27 = vld [vmem:[%s3363_s1 + $0x30c] sm:$0xf0]  ;;  %v1665_v37 = vor.u32 %v2052_v24, %v1664_v23  ;;  %927 = vmatpush.bf16.msra.mxu0 %v1409_v33  ;;  %v2034_v13 = vld [vmem:[%s3363_s1 + $0x184] sm:$0xf]  ;;  %v1477_v20 = vor.u32 %v2002_v10, %v1474_v11 }
  0x21   :  { %v1968_v28 = vld [vmem:[%s3363_s1 + $0x460] sm:$0xf]  ;;  %v2128_v29 = vld [vmem:[%s3363_s1 + $0x46c] sm:$0xf0]  ;;  %v1793_v40 = vor.u32 %v2084_v27, %v1792_v25  ;;  %940 = vmatpush.bf16.msra.mxu1 %v1537_v36  ;;  %v1602_v14 = vld [vmem:[%s3363_s1 + $0x190] sm:$0xf0] }
  0x22   :  { %v31_v32 = vld [vmem:[%s3362_s0] sm:$0x1f]  ;;  %v1969_v41 = vor.u32 %v2128_v29, %v1968_v28  ;;  %v2124_v45 = vld [vmem:[%s3363_s1 + $0x44c] sm:$0xf0]  ;;  %953 = vmatpush.bf16.msra.mxu2 %v1665_v37  ;;  %v1730_v16 = vld [vmem:[%s3363_s1 + $0x290] sm:$0xf0]  ;;  %v1605_v21 = vor.u32 %v2034_v13, %v1602_v14 }
  0x23   :  { %187 = vst [vmem:[#allocation1] ss:$9 sm:$0xff] %v31_v32  ;;  %v1952_v44 = vld [vmem:[%s3363_s1 + $0x440] sm:$0xf]  ;;  %966 = vmatpush.bf16.msra.mxu3 %v1793_v40  ;;  %v2120_v55 = vld [vmem:[%s3363_s1 + $0x42c] sm:$0xf0] }
  0x24   :  { %v1936_v53 = vld [vmem:[%s3363_s1 + $0x420] sm:$0xf]  ;;  %976 = vmatpush.bf16.msrb.mxu0 %v1969_v41  ;;  %v1953_v54 = vor.u32 %v2124_v45, %v1952_v44  ;;  %v2116_v9 = vld [vmem:[%s3363_s1 + $0x40c] sm:$0xf0]  ;;  %v2066_v15 = vld [vmem:[%s3363_s1 + $0x284] sm:$0xf] }
  0x25   :  { %985 = vmatpush.bf16.msrb.mxu1 %v1525_v42  ;;  %v1937_v5 = vor.u32 %v2120_v55, %v1936_v53  ;;  %v1920_v6 = vld [vmem:[%s3363_s1 + $0x400] sm:$0xf]  ;;  %v2110_v17 = vld [vmem:[%s3363_s1 + $0x3e4] sm:$0xf]  ;;  %v1906_v18 = vld [vmem:[%s3363_s1 + $0x3f0] sm:$0xf0]  ;;  %v1733_v24 = vor.u32 %v2066_v15, %v1730_v16 }
  0x26   :  { %998 = vmatpush.bf16.msrb.mxu2 %v1653_v43  ;;  %v1921_v19 = vor.u32 %v2116_v9, %v1920_v6  ;;  %v1998_v22 = vld [vmem:[%s3363_s1 + $0x64] sm:$0xf]  ;;  %v1458_v23 = vld [vmem:[%s3363_s1 + $0x70] sm:$0xf0]  ;;  %v1909_v25 = vor.u32 %v2110_v17, %v1906_v18  ;;  %v1528_v11 = vld [vmem:[%s3363_s1 + $0xe8] sm:$0xf] }
  0x27   :  { %1011 = vmatpush.bf16.msrb.mxu3 %v1781_v47  ;;  %v2030_v26 = vld [vmem:[%s3363_s1 + $0x164] sm:$0xf]  ;;  %v1586_v27 = vld [vmem:[%s3363_s1 + $0x170] sm:$0xf0]  ;;  %v1461_v32 = vor.u32 %v1998_v22, %v1458_v23  ;;  %v1656_v15 = vld [vmem:[%s3363_s1 + $0x1e8] sm:$0xf] }
  0x28   :  { %977 = vmatpush.bf16.msrb.mxu0 %v1953_v54  ;;  %v2062_v28 = vld [vmem:[%s3363_s1 + $0x264] sm:$0xf]  ;;  %v1714_v29 = vld [vmem:[%s3363_s1 + $0x270] sm:$0xf0]  ;;  %v1589_v33 = vor.u32 %v2030_v26, %v1586_v27  ;;  %v2049_v16 = vld [vmem:[%s3363_s1 + $0x1f4] sm:$0xf0] }
  0x29   :  { %986 = vmatpush.bf16.msrb.mxu1 %v1509_v58  ;;  %v2106_v30 = vld [vmem:[%s3363_s1 + $0x3c4] sm:$0xf]  ;;  %v1890_v31 = vld [vmem:[%s3363_s1 + $0x3d0] sm:$0xf0]  ;;  %v1717_v36 = vor.u32 %v2062_v28, %v1714_v29  ;;  %v1512_v26 = vld [vmem:[%s3363_s1 + $0xc8] sm:$0xf] }
  0x2a   :  { %v2496_v60 = vld [vmem:[#allocation1] sm:$0xff]  ;;  %v2498_v61 = vld [vmem:[#allocation1 + $0x12] sm:$0xff]  ;;  %v2500_v62 = vld [vmem:[#allocation1 + $0x9] sm:$0xff]  ;;  %999 = vmatpush.bf16.msrb.mxu2 %v1637_v59  ;;  %v1893_v37 = vor.u32 %v2106_v30, %v1890_v31 }
  0x2b   :  { %928 = vmatmul.bf16.vlgmr.msra.gmra.mxu0 %v2496_v60  ;;  %v2509_v2 = vld [vmem:[#allocation1 + $0x1b] sm:$0xff]  ;;  %954 = vmatmul.bf16.vlgmr.msra.gmra.mxu2 %v2498_v61  ;;  %v1994_v34 = vld [vmem:[%s3363_s1 + $0x44] sm:$0xf]  ;;  %v1442_v35 = vld [vmem:[%s3363_s1 + $0x50] sm:$0xf0] }
  0x2c   :  { %941 = vmatmul.bf16.vlgmr.msra.gmra.mxu1 %v2500_v62  ;;  %967 = vmatmul.bf16.vlgmr.msra.gmra.mxu3 %v2509_v2  ;;  %v2026_v38 = vld [vmem:[%s3363_s1 + $0x144] sm:$0xf]  ;;  %v1570_v39 = vld [vmem:[%s3363_s1 + $0x150] sm:$0xf0]  ;;  %v1445_v45 = vor.u32 %v1994_v34, %v1442_v35  ;;  %v2013_v27 = vld [vmem:[%s3363_s1 + $0xd4] sm:$0xf0] }
  0x2d   :  { %1012 = vmatpush.bf16.msrb.mxu3 %v1765_v63  ;;  %978 = vmatpush.bf16.msrb.mxu0 %v1937_v5  ;;  %v2058_v40 = vld [vmem:[%s3363_s1 + $0x244] sm:$0xf]  ;;  %v1698_v41 = vld [vmem:[%s3363_s1 + $0x250] sm:$0xf0]  ;;  %v1573_v46 = vor.u32 %v2026_v38, %v1570_v39  ;;  %v1640_v28 = vld [vmem:[%s3363_s1 + $0x1c8] sm:$0xf] }
  0x2e   :  { %987 = vmatpush.bf16.msrb.mxu1 %v1493_v7  ;;  %1000 = vmatpush.bf16.msrb.mxu2 %v1621_v8  ;;  %v2102_v42 = vld [vmem:[%s3363_s1 + $0x3a4] sm:$0xf]  ;;  %v1874_v43 = vld [vmem:[%s3363_s1 + $0x3b0] sm:$0xf0]  ;;  %v1701_v49 = vor.u32 %v2058_v40, %v1698_v41  ;;  %v2045_v29 = vld [vmem:[%s3363_s1 + $0x1d4] sm:$0xf0] }
  0x2f   :  { %v2598_v44 = vld [vmem:[#allocation1 + $0x24] sm:$0xff]  ;;  %v1426_v48 = vld [vmem:[%s3363_s1 + $0x30] sm:$0xf0]  ;;  %v1877_v50 = vor.u32 %v2102_v42, %v1874_v43  ;;  %v2009_v39 = vld [vmem:[%s3363_s1 + $0xb4] sm:$0xf0] }
  0x30   :  { %v1990_v47 = vld [vmem:[%s3363_s1 + $0x24] sm:$0xf]  ;;  %v1554_v52 = vld [vmem:[%s3363_s1 + $0x130] sm:$0xf0]  ;;  %v1496_v38 = vld [vmem:[%s3363_s1 + $0xa8] sm:$0xf] }
  0x31   :  { %1013 = vmatpush.bf16.msrb.mxu3 %v1749_v12  ;;  %979 = vmatpush.bf16.msrb.mxu0 %v1921_v19  ;;  %v2022_v51 = vld [vmem:[%s3363_s1 + $0x124] sm:$0xf]  ;;  %v1682_v54 = vld [vmem:[%s3363_s1 + $0x230] sm:$0xf0]  ;;  %v1429_v57 = vor.u32 %v1990_v47, %v1426_v48  ;;  %v2017_v12 = vld [vmem:[%s3363_s1 + $0xf4] sm:$0xf0] }
  0x32   :  { %988 = vmatpush.bf16.msrb.mxu1 %v1477_v20  ;;  %1001 = vmatpush.bf16.msrb.mxu2 %v1605_v21  ;;  %v2054_v53 = vld [vmem:[%s3363_s1 + $0x224] sm:$0xf]  ;;  %v1858_v56 = vld [vmem:[%s3363_s1 + $0x390] sm:$0xf0]  ;;  %v1557_v58 = vor.u32 %v2022_v51, %v1554_v52  ;;  %v1529_v20 = vor.u32 %v2017_v12, %v1528_v11  ;;  %v1624_v40 = vld [vmem:[%s3363_s1 + $0x1a8] sm:$0xf] }
  0x33   :  { %v2098_v55 = vld [vmem:[%s3363_s1 + $0x384] sm:$0xf]  ;;  %v1410_v63 = vld [vmem:[%s3363_s1 + $0x10] sm:$0xf0]  ;;  %v1685_v1 = vor.u32 %v2054_v53, %v1682_v54  ;;  %v2041_v41 = vld [vmem:[%s3363_s1 + $0x1b4] sm:$0xf0] }
  0x34   :  { %v1986_v59 = vld [vmem:[%s3363_s1 + $0x4] sm:$0xf]  ;;  %v1861_v3 = vor.u32 %v2098_v55, %v1858_v56  ;;  %v1538_v4 = vld [vmem:[%s3363_s1 + $0x110] sm:$0xf0]  ;;  %v1480_v51 = vld [vmem:[%s3363_s1 + $0x88] sm:$0xf] }
  0x35   :  { %1014 = vmatpush.bf16.msrb.mxu3 %v1733_v24  ;;  %1024 = vmatpush.bf16.msra.mxu0 %v1909_v25  ;;  %v2018_v0 = vld [vmem:[%s3363_s1 + $0x104] sm:$0xf]  ;;  %v1666_v6 = vld [vmem:[%s3363_s1 + $0x210] sm:$0xf0]  ;;  %v1413_v13 = vor.u32 %v1986_v59, %v1410_v63  ;;  %v1657_v24 = vor.u32 %v2049_v16, %v1656_v15  ;;  %v2005_v52 = vld [vmem:[%s3363_s1 + $0x94] sm:$0xf0] }
  0x36   :  { %989 = vmatpush.bf16.msrb.mxu1 %v1461_v32  ;;  %1002 = vmatpush.bf16.msrb.mxu2 %v1589_v33  ;;  %v2050_v5 = vld [vmem:[%s3363_s1 + $0x204] sm:$0xf]  ;;  %v1842_v8 = vld [vmem:[%s3363_s1 + $0x370] sm:$0xf0]  ;;  %v1541_v14 = vor.u32 %v2018_v0, %v1538_v4  ;;  %v1513_v32 = vor.u32 %v2013_v27, %v1512_v26  ;;  %v1608_v53 = vld [vmem:[%s3363_s1 + $0x188] sm:$0xf]  ;;  %v1481_v0 = vor.u32 %v2005_v52, %v1480_v51 }
  0x37   :  { %v2094_v7 = vld [vmem:[%s3363_s1 + $0x364] sm:$0xf]  ;;  %v1970_v10 = vld [vmem:[%s3363_s1 + $0x470] sm:$0xf0]  ;;  %v1669_v17 = vor.u32 %v2050_v5, %v1666_v6  ;;  %v2037_v54 = vld [vmem:[%s3363_s1 + $0x194] sm:$0xf0] }
  0x38   :  { %v2126_v9 = vld [vmem:[%s3363_s1 + $0x464] sm:$0xf]  ;;  %v1845_v18 = vor.u32 %v2094_v7, %v1842_v8  ;;  %v1826_v22 = vld [vmem:[%s3363_s1 + $0x350] sm:$0xf0]  ;;  %v1784_v55 = vld [vmem:[%s3363_s1 + $0x2e8] sm:$0xf] }
  0x39   :  { %1015 = vmatpush.bf16.msrb.mxu3 %v1717_v36  ;;  %1025 = vmatpush.bf16.msra.mxu0 %v1893_v37  ;;  %v1973_v19 = vor.u32 %v2126_v9, %v1970_v10  ;;  %v2090_v21 = vld [vmem:[%s3363_s1 + $0x344] sm:$0xf]  ;;  %v1954_v25 = vld [vmem:[%s3363_s1 + $0x450] sm:$0xf0]  ;;  %v1641_v36 = vor.u32 %v2045_v29, %v1640_v28  ;;  %v2081_v56 = vld [vmem:[%s3363_s1 + $0x2f4] sm:$0xf0] }
  0x3a   :  { %990 = vmatpush.bf16.msrb.mxu1 %v1445_v45  ;;  %1003 = vmatpush.bf16.msrb.mxu2 %v1573_v46  ;;  %v2122_v23 = vld [vmem:[%s3363_s1 + $0x444] sm:$0xf]  ;;  %v1829_v30 = vor.u32 %v2090_v21, %v1826_v22  ;;  %v1810_v34 = vld [vmem:[%s3363_s1 + $0x330] sm:$0xf0]  ;;  %v1497_v46 = vor.u32 %v2009_v39, %v1496_v38  ;;  %v2113_v59 = vld [vmem:[%s3363_s1 + $0x3f4] sm:$0xf0] }
  0x3b   :  { %1982 = vmatmul.msk.bf16.vlgmr.msrb.gmra.mxu0 %vm917_vm0, %v2598_v44  ;;  %v1957_v31 = vor.u32 %v2122_v23, %v1954_v25  ;;  %v2086_v33 = vld [vmem:[%s3363_s1 + $0x324] sm:$0xf]  ;;  %v1938_v37 = vld [vmem:[%s3363_s1 + $0x430] sm:$0xf0]  ;;  %v1464_v4 = vld [vmem:[%s3363_s1 + $0x68] sm:$0xf] }
  0x3c   :  { %v2118_v35 = vld [vmem:[%s3363_s1 + $0x424] sm:$0xf]  ;;  %v1813_v42 = vor.u32 %v2086_v33, %v1810_v34  ;;  %v1794_v47 = vld [vmem:[%s3363_s1 + $0x310] sm:$0xf0]  ;;  %v2001_v5 = vld [vmem:[%s3363_s1 + $0x74] sm:$0xf0] }
  0x3d   :  { %1016 = vmatpush.bf16.msrb.mxu3 %v1701_v49  ;;  %1026 = vmatpush.bf16.msra.mxu0 %v1877_v50  ;;  %v2082_v43 = vld [vmem:[%s3363_s1 + $0x304] sm:$0xf]  ;;  %v1941_v45 = vor.u32 %v2118_v35, %v1938_v37  ;;  %v1922_v49 = vld [vmem:[%s3363_s1 + $0x410] sm:$0xf0]  ;;  %v1625_v50 = vor.u32 %v2041_v41, %v1624_v40  ;;  %v1592_v6 = vld [vmem:[%s3363_s1 + $0x168] sm:$0xf] }
  0x3e   :  { %991 = vmatpush.bf16.msrb.mxu1 %v1429_v57  ;;  %1004 = vmatpush.bf16.msrb.mxu2 %v1557_v58  ;;  %v2114_v48 = vld [vmem:[%s3363_s1 + $0x404] sm:$0xf]  ;;  %v1797_v57 = vor.u32 %v2082_v43, %v1794_v47  ;;  %v1912_v58 = vld [vmem:[%s3363_s1 + $0x3e8] sm:$0xf]  ;;  %v2033_v8 = vld [vmem:[%s3363_s1 + $0x174] sm:$0xf0] }
  0x3f   :  { %v1925_v63 = vor.u32 %v2114_v48, %v1922_v49  ;;  %v1913_v7 = vor.u32 %v2113_v59, %v1912_v58  ;;  %v1768_v9 = vld [vmem:[%s3363_s1 + $0x2c8] sm:$0xf]  ;;  %v2077_v10 = vld [vmem:[%s3363_s1 + $0x2d4] sm:$0xf0] }
  0x40   :  { %v1896_v11 = vld [vmem:[%s3363_s1 + $0x3c8] sm:$0xf]  ;;  %v2109_v12 = vld [vmem:[%s3363_s1 + $0x3d4] sm:$0xf0]  ;;  %v1769_v15 = vor.u32 %v2077_v10, %v1768_v9 }
  0x41   :  { %1017 = vmatpush.bf16.msrb.mxu3 %v1685_v1  ;;  %1027 = vmatpush.bf16.msra.mxu0 %v1861_v3  ;;  %v1609_v1 = vor.u32 %v2037_v54, %v1608_v53  ;;  %v1785_v3 = vor.u32 %v2081_v56, %v1784_v55  ;;  %v1448_v16 = vld [vmem:[%s3363_s1 + $0x48] sm:$0xf]  ;;  %v2073_v22 = vld [vmem:[%s3363_s1 + $0x2b4] sm:$0xf0] }
  0x42   :  { %992 = vmatpush.bf16.msrb.mxu1 %v1413_v13  ;;  %1005 = vmatpush.bf16.msrb.mxu2 %v1541_v14  ;;  %v1465_v13 = vor.u32 %v2001_v5, %v1464_v4  ;;  %v1593_v14 = vor.u32 %v2033_v8, %v1592_v6  ;;  %v1752_v21 = vld [vmem:[%s3363_s1 + $0x2a8] sm:$0xf]  ;;  %v1993_v29 = vld [vmem:[%s3363_s1 + $0x34] sm:$0xf0] }
  0x43   :  { %v1880_v23 = vld [vmem:[%s3363_s1 + $0x3a8] sm:$0xf]  ;;  %v1753_v27 = vor.u32 %v2073_v22, %v1752_v21  ;;  %v2069_v34 = vld [vmem:[%s3363_s1 + $0x294] sm:$0xf0] }
  0x44   :  { %v1432_v28 = vld [vmem:[%s3363_s1 + $0x28] sm:$0xf]  ;;  %v1989_v39 = vld [vmem:[%s3363_s1 + $0x14] sm:$0xf0] }
  0x45   :  { %1018 = vmatpush.bf16.msrb.mxu3 %v1669_v17  ;;  %1028 = vmatpush.bf16.msra.mxu0 %v1845_v18  ;;  %v1997_v17 = vld [vmem:[%s3363_s1 + $0x54] sm:$0xf0]  ;;  %v1576_v18 = vld [vmem:[%s3363_s1 + $0x148] sm:$0xf]  ;;  %v1433_v37 = vor.u32 %v1993_v29, %v1432_v28 }
  0x46   :  { %1041 = vmatpush.bf16.msra.mxu1 %v1973_v19  ;;  %1050 = vmatpush.bf16.msra.mxu2 %v1529_v20  ;;  %v1897_v19 = vor.u32 %v2109_v12, %v1896_v11  ;;  %v2029_v20 = vld [vmem:[%s3363_s1 + $0x154] sm:$0xf0]  ;;  %v1449_v25 = vor.u32 %v1997_v17, %v1448_v16  ;;  %v1736_v33 = vld [vmem:[%s3363_s1 + $0x288] sm:$0xf] }
  0x47   :  { %993 = vmatmul.bf16.vlgmr.msrb.gmra.mxu1 %v2496_v60  ;;  %1006 = vmatmul.bf16.vlgmr.msrb.gmra.mxu2 %v2500_v62  ;;  %v1577_v26 = vor.u32 %v2029_v20, %v1576_v18  ;;  %v1864_v35 = vld [vmem:[%s3363_s1 + $0x388] sm:$0xf]  ;;  %v2021_v43 = vld [vmem:[%s3363_s1 + $0x114] sm:$0xf0] }
  0x48   :  { %1019 = vmatmul.bf16.vlgmr.msrb.gmra.mxu3 %v2498_v61  ;;  %v1416_v38 = vld [vmem:[%s3363_s1 + $0x8] sm:$0xf]  ;;  %v2097_v49 = vld [vmem:[%s3363_s1 + $0x374] sm:$0xf0] }
  0x49   :  { %1063 = vmatpush.bf16.msra.mxu3 %v1657_v24  ;;  %1029 = vmatpush.bf16.msra.mxu0 %v1829_v30  ;;  %v2105_v24 = vld [vmem:[%s3363_s1 + $0x3b4] sm:$0xf0]  ;;  %v1560_v30 = vld [vmem:[%s3363_s1 + $0x128] sm:$0xf] }
  0x4a   :  { %1042 = vmatpush.bf16.msra.mxu1 %v1957_v31  ;;  %1051 = vmatpush.bf16.msra.mxu2 %v1513_v32  ;;  %v1881_v31 = vor.u32 %v2105_v24, %v1880_v23  ;;  %v2025_v32 = vld [vmem:[%s3363_s1 + $0x134] sm:$0xf0]  ;;  %v1544_v40 = vld [vmem:[%s3363_s1 + $0x108] sm:$0xf] }
  0x4b   :  { %v1561_v41 = vor.u32 %v2025_v32, %v1560_v30  ;;  %v1848_v48 = vld [vmem:[%s3363_s1 + $0x368] sm:$0xf]  ;;  %v2129_v51 = vld [vmem:[%s3363_s1 + $0x474] sm:$0xf0] }
  0x4d   :  { %1064 = vmatpush.bf16.msra.mxu3 %v1641_v36  ;;  %1030 = vmatpush.bf16.msra.mxu0 %v1813_v42  ;;  %v2101_v36 = vld [vmem:[%s3363_s1 + $0x394] sm:$0xf0]  ;;  %v1737_v42 = vor.u32 %v2069_v34, %v1736_v33 }
  0x4e   :  { %1043 = vmatpush.bf16.msra.mxu1 %v1941_v45  ;;  %1052 = vmatpush.bf16.msra.mxu2 %v1497_v46  ;;  %v1720_v45 = vld [vmem:[%s3363_s1 + $0x268] sm:$0xf]  ;;  %v2065_v46 = vld [vmem:[%s3363_s1 + $0x274] sm:$0xf0]  ;;  %v1865_v47 = vor.u32 %v2101_v36, %v1864_v35 }
  0x51   :  { %1065 = vmatpush.bf16.msra.mxu3 %v1625_v50  ;;  %1031 = vmatpush.bf16.msra.mxu0 %v1797_v57  ;;  %v1976_v50 = vld [vmem:[%s3363_s1 + $0x468] sm:$0xf] }
  0x52   :  { %1044 = vmatpush.bf16.msra.mxu1 %v1925_v63  ;;  %1053 = vmatpush.bf16.msra.mxu2 %v1481_v0 }
  0x54   :  { %1032 = vmatmul.bf16.vlgmr.msra.gmra.mxu0 %v2509_v2 }
  0x55   :  { %1066 = vmatpush.bf16.msra.mxu3 %v1609_v1  ;;  %1076 = vmatpush.bf16.msrb.mxu0 %v1785_v3 }
  0x56   :  { %1089 = vmatpush.bf16.msrb.mxu1 %v1913_v7  ;;  %1054 = vmatpush.bf16.msra.mxu2 %v1465_v13 }
  0x57   :  { %1983 = vmatmul.msk.bf16.vlgmr.msra.gmra.mxu1 %vm917_vm0, %v2598_v44 }
  0x59   :  { %1067 = vmatpush.bf16.msra.mxu3 %v1593_v14  ;;  %1077 = vmatpush.bf16.msrb.mxu0 %v1769_v15 }
  0x5a   :  { %1090 = vmatpush.bf16.msrb.mxu1 %v1897_v19  ;;  %1055 = vmatpush.bf16.msra.mxu2 %v1449_v25 }
  0x5d   :  { %1068 = vmatpush.bf16.msra.mxu3 %v1577_v26  ;;  %1078 = vmatpush.bf16.msrb.mxu0 %v1753_v27 }
  0x5e   :  { %1091 = vmatpush.bf16.msrb.mxu1 %v1881_v31 }
  0x5f   :  { %15 = vsyncpa [#allocation5], 0  ;;  %1056 = vmatpush.bf16.msra.mxu2 %v1433_v37  ;;  %v1417_v52 = vor.u32 %v1989_v39, %v1416_v38  ;;  %v2015_v53 = vld [vmem:[%s3363_s1 + $0xec] sm:$0xf]  ;;  %v1530_v54 = vld [vmem:[%s3363_s1 + $0xf8] sm:$0xf0]  ;;  %v1545_v55 = vor.u32 %v2021_v43, %v1544_v40  ;;  %v1721_v56 = vor.u32 %v2065_v46, %v1720_v45  ;;  %v1849_v57 = vor.u32 %v2097_v49, %v1848_v48 }
  0x60   :  { %v1977_v58 = vor.u32 %v2129_v51, %v1976_v50  ;;  %v1704_v59 = vld [vmem:[%s3363_s1 + $0x248] sm:$0xf]  ;;  %v2061_v63 = vld [vmem:[%s3363_s1 + $0x254] sm:$0xf0]  ;;  %v1533_v1 = vor.u32 %v2015_v53, %v1530_v54  ;;  %v2011_v6 = vld [vmem:[%s3363_s1 + $0xcc] sm:$0xf] }
  0x61   :  { %1069 = vmatpush.bf16.msra.mxu3 %v1561_v41  ;;  %1079 = vmatpush.bf16.msrb.mxu0 %v1737_v42  ;;  %v1832_v0 = vld [vmem:[%s3363_s1 + $0x348] sm:$0xf]  ;;  %v2093_v3 = vld [vmem:[%s3363_s1 + $0x354] sm:$0xf0]  ;;  %v1514_v7 = vld [vmem:[%s3363_s1 + $0xd8] sm:$0xf0]  ;;  %v1705_v8 = vor.u32 %v2061_v63, %v1704_v59 }
  0x62   :  { %1092 = vmatpush.bf16.msrb.mxu1 %v1865_v47  ;;  %v1960_v4 = vld [vmem:[%s3363_s1 + $0x448] sm:$0xf]  ;;  %v2125_v5 = vld [vmem:[%s3363_s1 + $0x454] sm:$0xf0]  ;;  %v1833_v9 = vor.u32 %v2093_v3, %v1832_v0  ;;  %v1517_v14 = vor.u32 %v2011_v6, %v1514_v7  ;;  %v2007_v18 = vld [vmem:[%s3363_s1 + $0xac] sm:$0xf] }
  0x63   :  { %1057 = vmatpush.bf16.msra.mxu2 %v1417_v52  ;;  %v1961_v10 = vor.u32 %v2125_v5, %v1960_v4  ;;  %v1688_v11 = vld [vmem:[%s3363_s1 + $0x228] sm:$0xf]  ;;  %v2057_v12 = vld [vmem:[%s3363_s1 + $0x234] sm:$0xf0]  ;;  %v1498_v19 = vld [vmem:[%s3363_s1 + $0xb8] sm:$0xf0] }
  0x64   :  { %v1816_v13 = vld [vmem:[%s3363_s1 + $0x328] sm:$0xf]  ;;  %v2089_v15 = vld [vmem:[%s3363_s1 + $0x334] sm:$0xf0]  ;;  %v1689_v20 = vor.u32 %v2057_v12, %v1688_v11  ;;  %v1501_v28 = vor.u32 %v2007_v18, %v1498_v19  ;;  %v2003_v30 = vld [vmem:[%s3363_s1 + $0x8c] sm:$0xf] }
  0x65   :  { %1070 = vmatpush.bf16.msra.mxu3 %v1545_v55  ;;  %1080 = vmatpush.bf16.msrb.mxu0 %v1721_v56  ;;  %v1944_v16 = vld [vmem:[%s3363_s1 + $0x428] sm:$0xf]  ;;  %v2121_v17 = vld [vmem:[%s3363_s1 + $0x434] sm:$0xf0]  ;;  %v1817_v23 = vor.u32 %v2089_v15, %v1816_v13  ;;  %v1482_v31 = vld [vmem:[%s3363_s1 + $0x98] sm:$0xf0] }
  0x66   :  { %1093 = vmatpush.bf16.msrb.mxu1 %v1849_v57  ;;  %1058 = vmatmul.bf16.vlgmr.msra.gmra.mxu2 %v2496_v60  ;;  %v1672_v21 = vld [vmem:[%s3363_s1 + $0x208] sm:$0xf]  ;;  %v2053_v22 = vld [vmem:[%s3363_s1 + $0x214] sm:$0xf0]  ;;  %v1945_v24 = vor.u32 %v2121_v17, %v1944_v16  ;;  %v2047_v32 = vld [vmem:[%s3363_s1 + $0x1ec] sm:$0xf]  ;;  %v1485_v41 = vor.u32 %v2003_v30, %v1482_v31 }
  0x67   :  { %1106 = vmatpush.bf16.msrb.mxu2 %v1977_v58  ;;  %v1800_v25 = vld [vmem:[%s3363_s1 + $0x308] sm:$0xf]  ;;  %v2085_v26 = vld [vmem:[%s3363_s1 + $0x314] sm:$0xf0]  ;;  %v1658_v33 = vld [vmem:[%s3363_s1 + $0x1f8] sm:$0xf0]  ;;  %v1673_v35 = vor.u32 %v2053_v22, %v1672_v21 }
  0x68   :  { %1071 = vmatmul.bf16.vlgmr.msra.gmra.mxu3 %v2500_v62  ;;  %v1928_v27 = vld [vmem:[%s3363_s1 + $0x408] sm:$0xf]  ;;  %v2117_v29 = vld [vmem:[%s3363_s1 + $0x414] sm:$0xf0]  ;;  %v2079_v34 = vld [vmem:[%s3363_s1 + $0x2ec] sm:$0xf]  ;;  %v1801_v39 = vor.u32 %v2085_v26, %v1800_v25  ;;  %v1661_v42 = vor.u32 %v2047_v32, %v1658_v33 }
  0x69   :  { %1115 = vmatpush.bf16.msrb.mxu3 %v1533_v1  ;;  %1081 = vmatpush.bf16.msrb.mxu0 %v1705_v8  ;;  %v1786_v36 = vld [vmem:[%s3363_s1 + $0x2f8] sm:$0xf0]  ;;  %v2111_v37 = vld [vmem:[%s3363_s1 + $0x3ec] sm:$0xf]  ;;  %v1929_v40 = vor.u32 %v2117_v29, %v1928_v27  ;;  %vm1332_vm1 = vcmask 74752   ;;  %vm1360_vm3 = vcmask 1024  }
  0x6a   :  { %1094 = vmatpush.bf16.msrb.mxu1 %v1833_v9  ;;  %v1914_v38 = vld [vmem:[%s3363_s1 + $0x3f8] sm:$0xf0]  ;;  %v1999_v43 = vld [vmem:[%s3363_s1 + $0x6c] sm:$0xf]  ;;  %v1789_v46 = vor.u32 %v2079_v34, %v1786_v36  ;;  %s2194_s21 = smov [#allocation2]   ;;  %s1381_s25 = sshll.u32 %s3369_s7, 4  ;;  %s1382_s25 = int_to_ptr.hbm [resolvable:$true] %s1381_s25 }
  0x6b   :  { %1107 = vmatpush.bf16.msrb.mxu2 %v1961_v10  ;;  %v1466_v45 = vld [vmem:[%s3363_s1 + $0x78] sm:$0xf0]  ;;  %v1917_v47 = vor.u32 %v2111_v37, %v1914_v38  ;;  %v2043_v48 = vld [vmem:[%s3363_s1 + $0x1cc] sm:$0xf]  ;;  %s1379_s22 = sshll.u32 %s2194_s21, 4  ;;  %s1392_s28 = sshll.u32 %s3370_s8, 4  ;;  %s1380_s22 = int_to_ptr.vmem [resolvable:$true] %s1379_s22  ;;  %s1393_s28 = int_to_ptr.hbm [resolvable:$true] %s1392_s28 }
  0x6c   :  { %v1642_v49 = vld [vmem:[%s3363_s1 + $0x1d8] sm:$0xf0]  ;;  %v2075_v50 = vld [vmem:[%s3363_s1 + $0x2cc] sm:$0xf]  ;;  %v1469_v54 = vor.u32 %v1999_v43, %v1466_v45  ;;  %vm1372_vm4 = vcmask 0  }
  0x6d   :  { %1116 = vmatpush.bf16.msrb.mxu3 %v1517_v14  ;;  %1082 = vmatpush.bf16.msrb.mxu0 %v1689_v20  ;;  %v1770_v51 = vld [vmem:[%s3363_s1 + $0x2d8] sm:$0xf0]  ;;  %v2107_v52 = vld [vmem:[%s3363_s1 + $0x3cc] sm:$0xf]  ;;  %v1645_v55 = vor.u32 %v2043_v48, %v1642_v49 }
  0x6e   :  { %1095 = vmatpush.bf16.msrb.mxu1 %v1817_v23  ;;  %v1898_v53 = vld [vmem:[%s3363_s1 + $0x3d8] sm:$0xf0]  ;;  %v1995_v56 = vld [vmem:[%s3363_s1 + $0x4c] sm:$0xf]  ;;  %v1773_v58 = vor.u32 %v2075_v50, %v1770_v51 }
  0x6f   :  { %1108 = vmatpush.bf16.msrb.mxu2 %v1945_v24  ;;  %v1450_v57 = vld [vmem:[%s3363_s1 + $0x58] sm:$0xf0]  ;;  %v1901_v59 = vor.u32 %v2107_v52, %v1898_v53  ;;  %v2039_v63 = vld [vmem:[%s3363_s1 + $0x1ac] sm:$0xf] }
  0x70   :  { %v1626_v0 = vld [vmem:[%s3363_s1 + $0x1b8] sm:$0xf0]  ;;  %v2071_v1 = vld [vmem:[%s3363_s1 + $0x2ac] sm:$0xf]  ;;  %v1453_v6 = vor.u32 %v1995_v56, %v1450_v57 }
  0x71   :  { %1117 = vmatpush.bf16.msrb.mxu3 %v1501_v28  ;;  %1083 = vmatpush.bf16.msrb.mxu0 %v1673_v35  ;;  %v1754_v3 = vld [vmem:[%s3363_s1 + $0x2b8] sm:$0xf0]  ;;  %v2103_v4 = vld [vmem:[%s3363_s1 + $0x3ac] sm:$0xf]  ;;  %v1629_v7 = vor.u32 %v2039_v63, %v1626_v0 }
  0x72   :  { %1096 = vmatpush.bf16.msrb.mxu1 %v1801_v39  ;;  %v1882_v5 = vld [vmem:[%s3363_s1 + $0x3b8] sm:$0xf0]  ;;  %v1991_v8 = vld [vmem:[%s3363_s1 + $0x2c] sm:$0xf]  ;;  %v1757_v10 = vor.u32 %v2071_v1, %v1754_v3 }
  0x73   :  { %1109 = vmatpush.bf16.msrb.mxu2 %v1929_v40  ;;  %v1434_v9 = vld [vmem:[%s3363_s1 + $0x38] sm:$0xf0]  ;;  %v1885_v11 = vor.u32 %v2103_v4, %v1882_v5  ;;  %v2035_v12 = vld [vmem:[%s3363_s1 + $0x18c] sm:$0xf] }
  0x74   :  { %1084 = vmatmul.bf16.vlgmr.msrb.gmra.mxu0 %v2498_v61  ;;  %v1610_v13 = vld [vmem:[%s3363_s1 + $0x198] sm:$0xf0]  ;;  %v2067_v14 = vld [vmem:[%s3363_s1 + $0x28c] sm:$0xf]  ;;  %v1437_v18 = vor.u32 %v1991_v8, %v1434_v9 }
  0x75   :  { %1118 = vmatpush.bf16.msrb.mxu3 %v1485_v41  ;;  %1128 = vmatpush.bf16.msra.mxu0 %v1661_v42  ;;  %v1738_v15 = vld [vmem:[%s3363_s1 + $0x298] sm:$0xf0]  ;;  %v2099_v16 = vld [vmem:[%s3363_s1 + $0x38c] sm:$0xf]  ;;  %v1613_v19 = vor.u32 %v2035_v12, %v1610_v13 }
  0x76   :  { %1141 = vmatpush.bf16.msra.mxu1 %v1789_v46  ;;  %1984 = vmatmul.msk.bf16.vlgmr.msrb.gmra.mxu2 %vm917_vm0, %v2598_v44  ;;  %v1866_v17 = vld [vmem:[%s3363_s1 + $0x398] sm:$0xf0]  ;;  %v1987_v20 = vld [vmem:[%s3363_s1 + $0xc] sm:$0xf]  ;;  %v1741_v22 = vor.u32 %v2067_v14, %v1738_v15  ;;  %v1198_v14 = vld [vmem:[%s3365_s3 + $0x70] sm:$0xff] }
  0x77   :  { %1154 = vmatpush.bf16.msra.mxu2 %v1917_v47  ;;  %1097 = vmatmul.bf16.vlgmr.msrb.gmra.mxu1 %v2509_v2  ;;  %v1418_v21 = vld [vmem:[%s3363_s1 + $0x18] sm:$0xf0]  ;;  %v1869_v23 = vor.u32 %v2099_v16, %v1866_v17  ;;  %v2031_v24 = vld [vmem:[%s3363_s1 + $0x16c] sm:$0xf]  ;;  %v1214_v16 = vld [vmem:[%s3365_s3 + $0xf0] sm:$0xff] }
  0x78   :  { %v1594_v25 = vld [vmem:[%s3363_s1 + $0x178] sm:$0xf0]  ;;  %v2063_v26 = vld [vmem:[%s3363_s1 + $0x26c] sm:$0xf]  ;;  %v1421_v32 = vor.u32 %v1987_v20, %v1418_v21  ;;  %v1212_v20 = vld [vmem:[%s3365_s3 + $0xe0] sm:$0xff] }
  0x79   :  { %1119 = vmatpush.bf16.msrb.mxu3 %v1469_v54  ;;  %1129 = vmatpush.bf16.msra.mxu0 %v1645_v55  ;;  %v1722_v27 = vld [vmem:[%s3363_s1 + $0x278] sm:$0xf0]  ;;  %v2095_v28 = vld [vmem:[%s3363_s1 + $0x36c] sm:$0xf]  ;;  %v1597_v33 = vor.u32 %v2031_v24, %v1594_v25  ;;  %v3190_v24 = vld [vmem:[%s3364_s2] sm:$0xf] }
  0x7a   :  { %1142 = vmatpush.bf16.msra.mxu1 %v1773_v58  ;;  %v1850_v29 = vld [vmem:[%s3363_s1 + $0x378] sm:$0xf0]  ;;  %v2127_v30 = vld [vmem:[%s3363_s1 + $0x46c] sm:$0xf]  ;;  %v1725_v34 = vor.u32 %v2063_v26, %v1722_v27  ;;  %v1188_v26 = vld [vmem:[%s3365_s3 + $0x20] sm:$0xff]  ;;  %v178_v27 = vperm.slane %v3190_v24, 0 }
  0x7b   :  { %1155 = vmatpush.bf16.msra.mxu2 %v1901_v59  ;;  %v1978_v31 = vld [vmem:[%s3363_s1 + $0x478] sm:$0xf0]  ;;  %v1853_v35 = vor.u32 %v2095_v28, %v1850_v29  ;;  %v2027_v36 = vld [vmem:[%s3363_s1 + $0x14c] sm:$0xf]  ;;  %v1210_v29 = vld [vmem:[%s3365_s3 + $0xd0] sm:$0xff] }
  0x7c   :  { %v1578_v37 = vld [vmem:[%s3363_s1 + $0x158] sm:$0xf0]  ;;  %v2059_v38 = vld [vmem:[%s3363_s1 + $0x24c] sm:$0xf]  ;;  %v1981_v39 = vor.u32 %v2127_v30, %v1978_v31 }
  0x7d   :  { %1120 = vmatpush.bf16.msrb.mxu3 %v1453_v6  ;;  %1130 = vmatpush.bf16.msra.mxu0 %v1629_v7  ;;  %v1706_v40 = vld [vmem:[%s3363_s1 + $0x258] sm:$0xf0]  ;;  %v2091_v41 = vld [vmem:[%s3363_s1 + $0x34c] sm:$0xf]  ;;  %v1581_v46 = vor.u32 %v2027_v36, %v1578_v37 }
  0x7e   :  { %1143 = vmatpush.bf16.msra.mxu1 %v1757_v10  ;;  %v1834_v42 = vld [vmem:[%s3363_s1 + $0x358] sm:$0xf0]  ;;  %v2123_v43 = vld [vmem:[%s3363_s1 + $0x44c] sm:$0xf]  ;;  %v1709_v47 = vor.u32 %v2059_v38, %v1706_v40  ;;  %v1184_v38 = vld [vmem:[%s3365_s3] sm:$0xff] }
  0x7f   :  { %1156 = vmatpush.bf16.msra.mxu2 %v1885_v11  ;;  %v1962_v45 = vld [vmem:[%s3363_s1 + $0x458] sm:$0xf0]  ;;  %v1837_v48 = vor.u32 %v2091_v41, %v1834_v42  ;;  %v2023_v49 = vld [vmem:[%s3363_s1 + $0x12c] sm:$0xf]  ;;  %v1206_v40 = vld [vmem:[%s3365_s3 + $0xb0] sm:$0xff] }
  0x80   :  { %v1562_v50 = vld [vmem:[%s3363_s1 + $0x138] sm:$0xf0]  ;;  %v2055_v51 = vld [vmem:[%s3363_s1 + $0x22c] sm:$0xf]  ;;  %v1965_v52 = vor.u32 %v2123_v43, %v1962_v45 }
  0x81   :  { %1121 = vmatpush.bf16.msrb.mxu3 %v1437_v18  ;;  %1131 = vmatpush.bf16.msra.mxu0 %v1613_v19  ;;  %v1690_v53 = vld [vmem:[%s3363_s1 + $0x238] sm:$0xf0]  ;;  %v2087_v54 = vld [vmem:[%s3363_s1 + $0x32c] sm:$0xf]  ;;  %v1565_v58 = vor.u32 %v2023_v49, %v1562_v50  ;;  %v1196_v18 = vld [vmem:[%s3365_s3 + $0x60] sm:$0xff] }
  0x82   :  { %1144 = vmatpush.bf16.msra.mxu1 %v1741_v22  ;;  %v1818_v55 = vld [vmem:[%s3363_s1 + $0x338] sm:$0xf0]  ;;  %v2119_v56 = vld [vmem:[%s3363_s1 + $0x42c] sm:$0xf]  ;;  %v1693_v59 = vor.u32 %v2055_v51, %v1690_v53  ;;  %v1192_v19 = vld [vmem:[%s3365_s3 + $0x40] sm:$0xff] }
  0x83   :  { %1157 = vmatpush.bf16.msra.mxu2 %v1869_v23  ;;  %v1946_v57 = vld [vmem:[%s3363_s1 + $0x438] sm:$0xf0]  ;;  %v1821_v63 = vor.u32 %v2087_v54, %v1818_v55  ;;  %v2019_v0 = vld [vmem:[%s3363_s1 + $0x10c] sm:$0xf]  ;;  %v1190_v23 = vld [vmem:[%s3365_s3 + $0x30] sm:$0xff] }
  0x84   :  { %v2051_v1 = vld [vmem:[%s3363_s1 + $0x20c] sm:$0xf]  ;;  %v1949_v3 = vor.u32 %v2119_v56, %v1946_v57  ;;  %v1674_v4 = vld [vmem:[%s3363_s1 + $0x218] sm:$0xf0]  ;;  %v1202_v53 = vld [vmem:[%s3365_s3 + $0x90] sm:$0xff] }
  0x85   :  { %1122 = vmatpush.bf16.msrb.mxu3 %v1421_v32  ;;  %1132 = vmatpush.bf16.msra.mxu0 %v1597_v33  ;;  %v2083_v5 = vld [vmem:[%s3363_s1 + $0x30c] sm:$0xf]  ;;  %v1802_v6 = vld [vmem:[%s3363_s1 + $0x318] sm:$0xf0]  ;;  %v1677_v10 = vor.u32 %v2051_v1, %v1674_v4  ;;  %v1186_v33 = vld [vmem:[%s3365_s3 + $0x10] sm:$0xff]  ;;  %v179_v4 = vperm.slane %v3190_v24, 1 }
  0x86   :  { %1145 = vmatpush.bf16.msra.mxu1 %v1725_v34  ;;  %v2115_v7 = vld [vmem:[%s3363_s1 + $0x40c] sm:$0xf]  ;;  %v1930_v8 = vld [vmem:[%s3363_s1 + $0x418] sm:$0xf0]  ;;  %v1805_v11 = vor.u32 %v2083_v5, %v1802_v6  ;;  %v1208_v34 = vld [vmem:[%s3365_s3 + $0xc0] sm:$0xff] }
  0x87   :  { %1158 = vmatpush.bf16.msra.mxu2 %v1853_v35  ;;  %v1933_v12 = vor.u32 %v2115_v7, %v1930_v8  ;;  %v1199_v13 = vld [vmem:[%s3365_s3 + $0x78] sm:$0xff]  ;;  %v1197_v17 = vld [vmem:[%s3365_s3 + $0x68] sm:$0xff]  ;;  %v1200_v57 = vld [vmem:[%s3365_s3 + $0x80] sm:$0xff] }
  0x88   :  { %1123 = vmatmul.bf16.vlgmr.msrb.gmra.mxu3 %v2496_v60  ;;  %v1546_v60 = vld [vmem:[%s3363_s1 + $0x118] sm:$0xf0]  ;;  %v1189_v25 = vld [vmem:[%s3365_s3 + $0x28] sm:$0xff]  ;;  %v1228_v1 = vld [vmem:[%s3365_s3 + $0x160] sm:$0xff] }
  0x89   :  { %1171 = vmatpush.bf16.msra.mxu3 %v1981_v39  ;;  %1133 = vmatpush.bf16.msra.mxu0 %v1581_v46  ;;  %v1549_v9 = vor.u32 %v2019_v0, %v1546_v60  ;;  %v1215_v15 = vld [vmem:[%s3365_s3 + $0xf8] sm:$0xff]  ;;  %v1209_v30 = vld [vmem:[%s3365_s3 + $0xc8] sm:$0xff]  ;;  %v1226_v7 = vld [vmem:[%s3365_s3 + $0x150] sm:$0xff] }
  0x8a   :  { %1146 = vmatpush.bf16.msra.mxu1 %v1709_v47  ;;  %v1211_v21 = vld [vmem:[%s3365_s3 + $0xd8] sm:$0xff]  ;;  %v1185_v36 = vld [vmem:[%s3365_s3 + $0x8] sm:$0xff]  ;;  %v1204_v47 = vld [vmem:[%s3365_s3 + $0xa0] sm:$0xff] }
  0x8b   :  { %1159 = vmatpush.bf16.msra.mxu2 %v1837_v48  ;;  %v1191_v22 = vld [vmem:[%s3365_s3 + $0x38] sm:$0xff]  ;;  %v1205_v42 = vld [vmem:[%s3365_s3 + $0xa8] sm:$0xff] }
  0x8c   :  { %v1187_v28 = vld [vmem:[%s3365_s3 + $0x18] sm:$0xff]  ;;  %v1201_v56 = vld [vmem:[%s3365_s3 + $0x88] sm:$0xff] }
  0x8d   :  { %1172 = vmatpush.bf16.msra.mxu3 %v1965_v52  ;;  %1134 = vmatpush.bf16.msra.mxu0 %v1565_v58  ;;  %v1207_v37 = vld [vmem:[%s3365_s3 + $0xb8] sm:$0xff]  ;;  %v1229_v0 = vld [vmem:[%s3365_s3 + $0x168] sm:$0xff] }
  0x8e   :  { %1147 = vmatpush.bf16.msra.mxu1 %v1693_v59  ;;  %v1203_v49 = vld [vmem:[%s3365_s3 + $0x98] sm:$0xff]  ;;  %v1225_v8 = vld [vmem:[%s3365_s3 + $0x148] sm:$0xff] }
  0x8f   :  { %1160 = vmatpush.bf16.msra.mxu2 %v1821_v63  ;;  %v1231_v59 = vld [vmem:[%s3365_s3 + $0x178] sm:$0xff]  ;;  %v1230_v63 = vld [vmem:[%s3365_s3 + $0x170] sm:$0xff] }
  0x91   :  { %1173 = vmatpush.bf16.msra.mxu3 %v1949_v3  ;;  %1135 = vmatpush.bf16.msra.mxu0 %v1549_v9  ;;  %v1227_v3 = vld [vmem:[%s3365_s3 + $0x158] sm:$0xff] }
  0x92   :  { %1148 = vmatpush.bf16.msra.mxu1 %v1677_v10 }
  0x93   :  { %1161 = vmatpush.bf16.msra.mxu2 %v1805_v11  ;;  %v1224_v11 = vld [vmem:[%s3365_s3 + $0x140] sm:$0xff] }
  0x94   :  { %1136 = vmatmul.bf16.vlgmr.msra.gmra.mxu0 %v2500_v62  ;;  %v1194_v62 = vld [vmem:[%s3365_s3 + $0x50] sm:$0xff] }
  0x95   :  { %1174 = vmatpush.bf16.msra.mxu3 %v1933_v12  ;;  %1252 = vmatpush.msrb.mxu0 %v1199_v13 }
  0x96   :  { %1272 = vmatpush.msrb.mxu1 %v1215_v15  ;;  %1162 = vmatmul.bf16.vlgmr.msra.gmra.mxu2 %v2509_v2  ;;  %v1193_v2 = vld [vmem:[%s3365_s3 + $0x48] sm:$0xff] }
  0x97   :  { %1149 = vmatmul.bf16.vlgmr.msra.gmra.mxu1 %v2498_v61  ;;  %1253 = vmatpush.msrb.mxu0 %v1198_v14  ;;  %v1195_v61 = vld [vmem:[%s3365_s3 + $0x58] sm:$0xff] }
  0x98   :  { %1273 = vmatpush.msrb.mxu1 %v1214_v16  ;;  %1985 = vmatmul.msk.bf16.vlgmr.msra.gmra.mxu3 %vm917_vm0, %v2598_v44  ;;  %v1213_v44 = vld [vmem:[%s3365_s3 + $0xe8] sm:$0xff]  ;;  %v1223_v14 = vld [vmem:[%s3365_s3 + $0x138] sm:$0xff]  ;;  %v1222_v16 = vld [vmem:[%s3365_s3 + $0x130] sm:$0xff] }
  0x99   :  { %1254 = vmatpush.msrb.mxu0 %v1197_v17  ;;  %1292 = vmatpush.msrb.mxu2 %v1231_v59  ;;  %v1232_v59 = vld [vmem:[%s3365_s3 + $0x180] sm:$0xff] }
  0x9a   :  { %1274 = vmatpush.msrb.mxu1 %v1213_v44  ;;  %v1220_v44 = vld [vmem:[%s3365_s3 + $0x120] sm:$0xff] }
  0x9b   :  { %1255 = vmatpush.msrb.mxu0 %v1196_v18  ;;  %1293 = vmatpush.msrb.mxu2 %v1230_v63  ;;  %v1221_v18 = vld [vmem:[%s3365_s3 + $0x128] sm:$0xff] }
  0x9c   :  { %1275 = vmatpush.msrb.mxu1 %v1212_v20 }
  0x9d   :  { %1256 = vmatpush.msrb.mxu0 %v1195_v61  ;;  %1294 = vmatpush.msrb.mxu2 %v1229_v0 }
  0x9e   :  { %1276 = vmatpush.msrb.mxu1 %v1211_v21 }
  0x9f   :  { %1257 = vmatpush.msrb.mxu0 %v1194_v62  ;;  %1295 = vmatpush.msrb.mxu2 %v1228_v1 }
  0xa0   :  { %1277 = vmatpush.msrb.mxu1 %v1210_v29 }
  0xa1   :  { %1258 = vmatpush.msrb.mxu0 %v1193_v2  ;;  %1296 = vmatpush.msrb.mxu2 %v1227_v3  ;;  %v181_v3 = vperm.slane %v3190_v24, 3 }
  0xa2   :  { %1278 = vmatpush.msrb.mxu1 %v1209_v30  ;;  %v1246_v30 = vld [vmem:[%s3365_s3 + $0x1f0] sm:$0xff] }
  0xa3   :  { %1259 = vmatpush.msrb.mxu0 %v1192_v19  ;;  %1297 = vmatpush.msrb.mxu2 %v1226_v7  ;;  %v1219_v19 = vld [vmem:[%s3365_s3 + $0x118] sm:$0xff] }
  0xa4   :  { %1279 = vmatpush.msrb.mxu1 %v1208_v34  ;;  %v1242_v34 = vld [vmem:[%s3365_s3 + $0x1d0] sm:$0xff] }
  0xa5   :  { %1260 = vmatpush.msrb.mxu0 %v1191_v22  ;;  %1298 = vmatpush.msrb.mxu2 %v1225_v8 }
  0xa6   :  { %1280 = vmatpush.msrb.mxu1 %v1207_v37  ;;  %v1241_v37 = vld [vmem:[%s3365_s3 + $0x1c8] sm:$0xff] }
  0xa7   :  { %1261 = vmatpush.msrb.mxu0 %v1190_v23  ;;  %1299 = vmatpush.msrb.mxu2 %v1224_v11 }
  0xa8   :  { %v929_v31 = vpop.f32.mrf.mxu0  ;;  %1281 = vmatpush.msrb.mxu1 %v1206_v40  ;;  %v1239_v40 = vld [vmem:[%s3365_s3 + $0x1b8] sm:$0xff] }
  0xa9   :  { %1262 = vmatpush.msrb.mxu0 %v1189_v25  ;;  %v942_v32 = vpop.f32.mrf.mxu1  ;;  %v930_v35 = vadd.f32 %v929_v31, %v178_v27  ;;  %1300 = vmatpush.msrb.mxu2 %v1223_v14  ;;  %v1218_v25 = vld [vmem:[%s3365_s3 + $0x110] sm:$0xff]  ;;  %v1247_v27 = vld [vmem:[%s3365_s3 + $0x1f8] sm:$0xff]  ;;  %v1245_v31 = vld [vmem:[%s3365_s3 + $0x1e8] sm:$0xff] }
  0xaa   :  { %1282 = vmatpush.msrb.mxu1 %v1205_v42  ;;  %1312 = vmatpush.msrb.mxu3 %v1247_v27  ;;  %v1238_v42 = vld [vmem:[%s3365_s3 + $0x1b0] sm:$0xff] }
  0xab   :  { %1263 = vmatpush.msrb.mxu0 %v1188_v26  ;;  %v943_v39 = vadd.f32 %v942_v32, %v930_v35  ;;  %1301 = vmatpush.msrb.mxu2 %v1222_v16  ;;  %v1217_v26 = vld [vmem:[%s3365_s3 + $0x108] sm:$0xff]  ;;  %v1244_v32 = vld [vmem:[%s3365_s3 + $0x1e0] sm:$0xff]  ;;  %v180_v35 = vperm.slane %v3190_v24, 2 }
  0xac   :  { %1283 = vmatpush.msrb.mxu1 %v1204_v47  ;;  %1313 = vmatpush.msrb.mxu3 %v1246_v30  ;;  %v1237_v47 = vld [vmem:[%s3365_s3 + $0x1a8] sm:$0xff]  ;;  %v2136_v24 = vld [vmem:[%s3366_s4] ss:$0 sm:$0xff] }
  0xad   :  { %1264 = vmatpush.msrb.mxu0 %v1187_v28  ;;  %1302 = vmatpush.msrb.mxu2 %v1221_v18  ;;  %v1216_v28 = vld [vmem:[%s3365_s3 + $0x100] sm:$0xff] }
  0xae   :  { %v955_v41 = vpop.f32.mrf.mxu2  ;;  %1284 = vmatpush.msrb.mxu1 %v1203_v49  ;;  %1314 = vmatpush.msrb.mxu3 %v1245_v31 }
  0xaf   :  { %1265 = vmatpush.msrb.mxu0 %v1186_v33  ;;  %v968_v45 = vpop.f32.mrf.mxu3  ;;  %v956_v48 = vadd.f32 %v955_v41, %v943_v39  ;;  %1303 = vmatpush.msrb.mxu2 %v1220_v44  ;;  %v1243_v33 = vld [vmem:[%s3365_s3 + $0x1d8] sm:$0xff] }
  0xb0   :  { %v931_v43 = vpop.f32.mrf.mxu0  ;;  %1285 = vmatpush.msrb.mxu1 %v1202_v53  ;;  %1315 = vmatpush.msrb.mxu3 %v1244_v32  ;;  %v1234_v53 = vld [vmem:[%s3365_s3 + $0x190] sm:$0xff]  ;;  %v1346_v32 = vlaneseq }
  0xb1   :  { %1266 = vmatpush.msrb.mxu0 %v1185_v36  ;;  %v944_v46 = vpop.f32.mrf.mxu1  ;;  %v969_v50 = vadd.f32 %v968_v45, %v956_v48  ;;  %1304 = vmatpush.msrb.mxu2 %v1219_v19  ;;  %v1236_v48 = vld [vmem:[%s3365_s3 + $0x1a0] sm:$0xff] }
  0xb2   :  { %1286 = vmatpush.msrb.mxu1 %v1201_v56  ;;  %1316 = vmatpush.msrb.mxu3 %v1243_v33  ;;  %v1233_v56 = vld [vmem:[%s3365_s3 + $0x188] sm:$0xff]  ;;  %v1347_v33 = vand.u32 127, %v1346_v32 }
  0xb3   :  { %1267 = vmatpush.msrb.mxu0 %v1184_v38  ;;  %1305 = vmatpush.msrb.mxu2 %v1218_v25  ;;  %v1240_v38 = vld [vmem:[%s3365_s3 + $0x1c0] sm:$0xff] }
  0xb4   :  { %1287 = vmatpush.msrb.mxu1 %v1200_v57  ;;  %1317 = vmatpush.msrb.mxu3 %v1242_v34 }
  0xb5   :  { %1306 = vmatpush.msrb.mxu2 %v1217_v26  ;;  %v1348_v26 = vld [vmem:[%s3367_s5] sm:$0x3] }
  0xb6   :  { %v957_v51 = vpop.f32.mrf.mxu2  ;;  %1318 = vmatpush.msrb.mxu3 %v1241_v37 }
  0xb7   :  { %v970_v52 = vpop.f32.mrf.mxu3  ;;  %1307 = vmatpush.msrb.mxu2 %v1216_v28 }
  0xb8   :  { %v981_v54 = vpop.f32.mrf.mxu0  ;;  %1319 = vmatpush.msrb.mxu3 %v1240_v38  ;;  %v1235_v52 = vld [vmem:[%s3365_s3 + $0x198] sm:$0xff] }
  0xb9   :  { %v982_v55 = vadd.f32 %v981_v54, %v969_v50 }
  0xba   :  { %1320 = vmatpush.msrb.mxu3 %v1239_v40 }
  0xbb   :  { %v1180_v58 = vmax.f32 %v982_v55, 0.0 }
  0xbc   :  { %1321 = vmatpush.msrb.mxu3 %v1238_v42  ;;  %v1358_v42 = vld [vmem:[%s3368_s6] sm:$0x3]  ;;  %s2195_s6 = smov [#allocation4]  }
  0xbd   :  { %1268 = vmatmul.f32.vlgmr.msrb.gmra.mxu0 %v1180_v58  ;;  %s1390_s26 = sshll.u32 %s2195_s6, 4  ;;  %s1391_s26 = int_to_ptr.vmem [resolvable:$true] %s1390_s26 }
  0xbe   :  { %1322 = vmatpush.msrb.mxu3 %v1237_v47 }
  0xc0   :  { %v983_v60 = vpop.f32.mrf.mxu0  ;;  %1323 = vmatpush.msrb.mxu3 %v1236_v48 }
  0xc2   :  { %1324 = vmatpush.msrb.mxu3 %v1235_v52 }
  0xc4   :  { %v994_v5 = vpop.f32.mrf.mxu1  ;;  %1325 = vmatpush.msrb.mxu3 %v1234_v53 }
  0xc5   :  { %v995_v6 = vadd.f32 %v994_v5, %v179_v4 }
  0xc6   :  { %1326 = vmatpush.msrb.mxu3 %v1233_v56 }
  0xc8   :  { %1327 = vmatpush.msrb.mxu3 %v1232_v59 }
  0xca   :  { %v1007_v9 = vpop.f32.mrf.mxu2 }
  0xcb   :  { %v1020_v10 = vpop.f32.mrf.mxu3  ;;  %v1008_v13 = vadd.f32 %v1007_v9, %v995_v6 }
  0xcc   :  { %v996_v12 = vpop.f32.mrf.mxu1 }
  0xcd   :  { %v1021_v15 = vadd.f32 %v1020_v10, %v1008_v13 }
  0xd1   :  { %v1033_v17 = vpop.f32.mrf.mxu0 }
  0xd2   :  { %v1034_v61 = vadd.f32 %v1033_v17, %v1021_v15  ;;  %v1009_v62 = vpop.f32.mrf.mxu2 }
  0xd3   :  { %v1022_v2 = vpop.f32.mrf.mxu3 }
  0xd4   :  { %v1046_v20 = vpop.f32.mrf.mxu1 }
  0xd5   :  { %v1047_v21 = vadd.f32 %v1046_v20, %v1034_v61  ;;  %v2193_v61 = vmov 0  }
  0xd6   :  { %2135 = vset.pattern.permute.xlu0 %v2193_v61 }
  0xd7   :  { %v1181_v22 = vmax.f32 %v1047_v21, 0.0 }
  0xd9   :  { %v1035_v23 = vpop.f32.mrf.mxu0  ;;  %1288 = vmatmul.f32.vlgmr.msrb.gmra.mxu1 %v1181_v22 }
  0xdc   :  { %v1048_v29 = vpop.f32.mrf.mxu1 }
  0xe9   :  { %v1059_v36 = vpop.f32.mrf.mxu2 }
  0xea   :  { %v1060_v41 = vadd.f32 %v1059_v36, %v180_v35 }
  0xeb   :  { %v1072_v39 = vpop.f32.mrf.mxu3 }
  0xec   :  { %v1073_v43 = vadd.f32 %v1072_v39, %v1060_v41 }
  0xf1   :  { %v1061_v45 = vpop.f32.mrf.mxu2  ;;  %v1085_v46 = vpop.f32.mrf.mxu0 }
  0xf2   :  { %v1086_v51 = vadd.f32 %v1085_v46, %v1073_v43 }
  0xf3   :  { %v1074_v49 = vpop.f32.mrf.mxu3 }
  0xf4   :  { %v1098_v50 = vpop.f32.mrf.mxu1 }
  0xf5   :  { %v1099_v54 = vadd.f32 %v1098_v50, %v1086_v51 }
  0xf9   :  { %v1087_v55 = vpop.f32.mrf.mxu0  ;;  %v1111_v58 = vpop.f32.mrf.mxu2 }
  0xfa   :  { %v1112_v63 = vadd.f32 %v1111_v58, %v1099_v54 }
  0xfc   :  { %v1100_v57 = vpop.f32.mrf.mxu1  ;;  %v1182_v0 = vmax.f32 %v1112_v63, 0.0 }
  0xfe   :  { %1308 = vmatmul.f32.vlgmr.msrb.gmra.mxu2 %v1182_v0 }
 0x101   :  { %v1113_v60 = vpop.f32.mrf.mxu2 }
 0x10b   :  { %v1124_v1 = vpop.f32.mrf.mxu3 }
 0x10c   :  { %v1125_v4 = vadd.f32 %v1124_v1, %v181_v3 }
 0x111   :  { %v1137_v5 = vpop.f32.mrf.mxu0 }
 0x112   :  { %v1138_v7 = vadd.f32 %v1137_v5, %v1125_v4 }
 0x113   :  { %v1126_v8 = vpop.f32.mrf.mxu3 }
 0x114   :  { %v1150_v6 = vpop.f32.mrf.mxu1 }
 0x115   :  { %v1151_v9 = vadd.f32 %v1150_v6, %v1138_v7 }
 0x119   :  { %v1163_v10 = vpop.f32.mrf.mxu2  ;;  %v1139_v12 = vpop.f32.mrf.mxu0 }
 0x11a   :  { %v1164_v11 = vadd.f32 %v1163_v10, %v1151_v9 }
 0x11b   :  { %v1176_v14 = vpop.f32.mrf.mxu3 }
 0x11c   :  { %v1152_v13 = vpop.f32.mrf.mxu1  ;;  %v1177_v15 = vadd.f32 %v1176_v14, %v1164_v11 }
 0x11e   :  { %v1183_v16 = vmax.f32 %v1177_v15, 0.0 }
 0x120   :  { %1328 = vmatmul.f32.vlgmr.msrb.gmra.mxu3 %v1183_v16 }
 0x121   :  { %v1165_v17 = vpop.f32.mrf.mxu2 }
 0x123   :  { %v1178_v18 = vpop.f32.mrf.mxu3 }
 0x13a   :  { %v1269_v62 = vpop.f32.mrf.mxu0 }
 0x13b   :  { %v1270_v44 = vadd.f32 %v2136_v24, %v1269_v62 }
 0x156   :  { %v1289_v2 = vpop.f32.mrf.mxu1 }
 0x157   :  { %v1290_v20 = vadd.f32 %v1289_v2, %v1270_v44 }
 0x181   :  { %v1309_v19 = vpop.f32.mrf.mxu2 }
 0x182   :  { %v1310_v21 = vadd.f32 %v1309_v19, %v1290_v20 }
 0x1a3   :  { %v1329_v22 = vpop.f32.mrf.mxu3 }
 0x1a4   :  { %v1330_v23 = vadd.f32 %v1329_v22, %v1310_v21 }
 0x1a6   :  { %v1334_v25 = vsel %vm1332_vm1, %v1330_v23, -inf  ;;  %1333 = vst.msk [vmem:[#allocation2] sm:$0x3] %vm1332_vm1, %v1330_v23 }
 0x1a7   :  { %1335 = vmax.xlane.f32.xlu0 %v1334_v25  ;;  %1384 = dma.vmem_to_hbm [thread:$0]  %s1380_s22, 32, %s1382_s25, [#allocation3]  }
 0x1bb   :  { %1350 = vperm.xlu0 %2135, %v1348_v26  }
 0x21a   :  { %v1336_v27 = vpop.xlane.xlu0 %1335 }
 0x21b   :  { %v1337_v28 = vsub.f32 %v1330_v23, %v1336_v27 }
 0x21d   :  { %v1338_v29 = vmul.f32 1.442695, %v1337_v28 }
 0x21f   :  { %2137 = vpow2.f32 %v1338_v29 }
 0x225   :  { %v2138_v30 = vpop.eup %2137 }
 0x226   :  { %v1340_v31 = vsel %vm1332_vm1, %v2138_v30, 0.0 }
 0x227   :  { %1341 = vadd.xlane.f32.xlu1 %v1340_v31 }
 0x22d   :  { %v1351_v34 = vpop.permute.xlu0 %1350 }
 0x22e   :  { %vm1352_vm2 = vcmp.eq.s32.totalorder %v1347_v33, %v1351_v34 }
 0x22f   :  { %v1353_v35 = vsel %vm1352_vm2, %v1330_v23, 0.0 }
 0x230   :  { %v1354_v36 = vsel %vm1332_vm1, %v1353_v35, 0.0 }
 0x231   :  { %1355 = vadd.xlane.f32.xlu1 %v1354_v36 }
 0x29a   :  { %v1342_v37 = vpop.xlane.xlu1 %1341 }
 0x29b   :  { %2139 = vlog2.f32 %v1342_v37 }
 0x2a1   :  { %v2140_v38 = vpop.eup %2139 }
 0x2a2   :  { %v1344_v39 = vmul.f32 0.6931472, %v2140_v38 }
 0x2a4   :  { %v1345_v40 = vadd.f32 %v1344_v39, %v1336_v27  ;;  %v1356_v41 = vpop.xlane.xlu1 %1355 }
 0x2a6   :  { %v1357_v43 = vsub.f32 %v1345_v40, %v1356_v41 }
 0x2a8   :  { %v1359_v45 = vmul.f32 %v1358_v42, %v1357_v43 }
 0x2aa   :  { %v1361_v46 = vsel %vm1360_vm3, %v1359_v45, 0.0 }
 0x2ab   :  { %1362 = vadd.xlane.f32.xlu2 %v1361_v46 }
 0x31e   :  { %v1363_v47 = vpop.xlane.xlu2 %1362 }
 0x31f   :  { %v1364_v48 = vrot.slane %v1363_v47, 4 }
 0x321   :  { %v1365_v49 = vadd.f32 %v1364_v48, %v1363_v47 }
 0x323   :  { %v1366_v50 = vrot.slane %v1365_v49, 2 }
 0x325   :  { %v1367_v51 = vadd.f32 %v1366_v50, %v1365_v49 }
 0x327   :  { %v1368_v52 = vrot.slane %v1367_v51, 1 }
 0x329   :  { %v1369_v53 = vadd.f32 %v1368_v52, %v1367_v51 }
 0x32b   :  { %2130 = vpush %v1369_v53 }
 0x35c   :  { %s2131_s7 = spop %2130 }
 0x35d   :  { %v1371_v54 = vstv %s2131_s7 }
 0x35e   :  { %1373 = vst.msk [vmem:[#allocation4] sm:$0x1] %vm1372_vm4, %v1371_v54 }
 0x35f   :  { %1395 = dma.vmem_to_hbm [thread:$0]  %s1391_s26, 16, %s1393_s28, [#allocation5]  }
 0x360   :  { %2189 = dma.done.wait [#allocation3], 32  }
 0x361   :  { %2190 = vsyncadd [#allocation3], 4294967264 }
 0x362   :  { %2191 = dma.done.wait [#allocation5], 16  }
 0x363   :  { %2192 = vsyncadd [#allocation5], 4294967280 }
 0x364   :  { %1404 = vsyncpa [#allocation3], 1 }
 0x365   :  { %1405 = vsyncpa [#allocation5], 1 }

// kernel: _lambda_.6
= control target key start
LH: loop header
LB: loop body
LE: loop exit
PB: predicated region body
PF: predicated region fallthrough
CT: control target
= control target key end

     0   :  { %s2585_s12 = smov 0   ;;  %s3073_s0 = inlined_call_operand.vmem [shape: bf16[2,4,16,1600], index: 0, kind: input, shape index: {}]   ;;  %s3074_s1 = inlined_call_operand.vmem [shape: bf16[1600,64], index: 1, kind: input, shape index: {}]   ;;  %s3075_s2 = inlined_call_operand.vmem [shape: f32[1,1,64], index: 2, kind: input, shape index: {}]   ;;  %s3076_s3 = inlined_call_operand.vmem [shape: bf16[2,16,64], index: 3, kind: output, shape index: {}]  }
   0x1 LB: > { %s1760_s13 = sadd.s32 4294967295, %s2563_s12   ;;  %p1764_p0 = scmp.ge.s32.totalorder %s2563_s12, 1  ;;  %s2563_s12 = sphi %s2585_s12, %s13_s12  }
   0x2   : > { %p137_p1 = scmp.lt.s32.totalorder %s2563_s12, 3 }
   0x4   : > { %p138_p2 = pnand %p1764_p0, %p137_p1 }
   0x5   : > { %p161_p3 = scmp.lt.s32.totalorder (!%p138_p2), %s1760_s13, 1 }
   0x6   : > { %141 = sbr.rel (%p138_p2) target bundleno = 405 (0x195), region = 32 }
   0xb   : > { %v2442_v0 = vld [vmem:[%s3074_s1 + $0x38] sm:$0xff]  ;;  %v2441_v2 = vld [vmem:[%s3074_s1 + $0x30] sm:$0xff]  ;;  %v2440_v6 = vld [vmem:[%s3074_s1 + $0x28] sm:$0xff]  ;;  %s3078_s13 = smov (!%p161_p3, %s1760_s13), 1  ;;  %vm1288_vm0 = vcmask 523264   ;;  %vm1702_vm1 = vcmask 519168  }
   0xc   : > { %v2458_v1 = vld [vmem:[%s3074_s1 + $0xb8] sm:$0xff]  ;;  %2535 = vmatpush.bf16.msra.mxu1 %v2442_v0  ;;  %1301 = vmatpush.bf16.msra.mxu0 %v2442_v0  ;;  %v2457_v3 = vld [vmem:[%s3074_s1 + $0xb0] sm:$0xff]  ;;  %v2456_v7 = vld [vmem:[%s3074_s1 + $0xa8] sm:$0xff]  ;;  %s2547_s21 = smul.u32 416, %s3078_s13  ;;  %s2382_s25 = sshll.u32 %s3078_s13, 3 }
   0xd   : > { %1359 = vmatpush.bf16.msra.mxu2 %v2458_v1  ;;  %v2466_v4 = vld [vmem:[%s3074_s1 + $0xf8] sm:$0xff]  ;;  %v2465_v5 = vld [vmem:[%s3074_s1 + $0xf0] sm:$0xff]  ;;  %v2464_v8 = vld [vmem:[%s3074_s1 + $0xe8] sm:$0xff]  ;;  %s170_s28 = scalar_lea.vmem %s3076_s3, %s2382_s25 }
   0xe   : > { %1388 = vmatpush.bf16.msra.mxu3 %v2466_v4  ;;  %v2439_v9 = vld [vmem:[%s3074_s1 + $0x20] sm:$0xff]  ;;  %v2438_v12 = vld [vmem:[%s3074_s1 + $0x18] sm:$0xff]  ;;  %v2437_v15 = vld [vmem:[%s3074_s1 + $0x10] sm:$0xff]  ;;  %s2660_s30 = scalar_lea.vmem %s3073_s0, %s2547_s21 }
   0xf   : > { %v2455_v10 = vld [vmem:[%s3074_s1 + $0xa0] sm:$0xff]  ;;  %v2454_v13 = vld [vmem:[%s3074_s1 + $0x98] sm:$0xff]  ;;  %v2453_v16 = vld [vmem:[%s3074_s1 + $0x90] sm:$0xff] }
  0x10   : > { %2536 = vmatpush.bf16.msra.mxu1 %v2441_v2  ;;  %1302 = vmatpush.bf16.msra.mxu0 %v2441_v2  ;;  %v2463_v11 = vld [vmem:[%s3074_s1 + $0xe0] sm:$0xff]  ;;  %v2462_v14 = vld [vmem:[%s3074_s1 + $0xd8] sm:$0xff]  ;;  %v2461_v17 = vld [vmem:[%s3074_s1 + $0xd0] sm:$0xff] }
  0x11   : > { %1360 = vmatpush.bf16.msra.mxu2 %v2457_v3  ;;  %v2436_v18 = vld [vmem:[%s3074_s1 + $0x8] sm:$0xff]  ;;  %v2435_v20 = vld [vmem:[%s3074_s1] sm:$0xff]  ;;  %v1874_v21 = vld [vmem:[%s2660_s30 + $0xd0] sm:$0xf] }
  0x12   : > { %1389 = vmatpush.bf16.msra.mxu3 %v2465_v5  ;;  %v2452_v19 = vld [vmem:[%s3074_s1 + $0x88] sm:$0xff]  ;;  %v2450_v22 = vld [vmem:[%s3074_s1 + $0x78] sm:$0xff]  ;;  %v2415_v24 = vld [vmem:[%s2660_s30 + $0x100] sm:$0xf0] }
  0x13   : > { %v2460_v23 = vld [vmem:[%s3074_s1 + $0xc8] sm:$0xff]  ;;  %v1770_v25 = vld [vmem:[%s2660_s30] sm:$0xf]  ;;  %v2389_v26 = vld [vmem:[%s2660_s30 + $0x30] sm:$0xf0]  ;;  %v1875_v32 = vor.u32 %v2415_v24, %v1874_v21 }
  0x14   : > { %2537 = vmatpush.bf16.msra.mxu1 %v2440_v6  ;;  %1303 = vmatpush.bf16.msra.mxu0 %v2440_v6  ;;  %v2451_v27 = vld [vmem:[%s3074_s1 + $0x80] sm:$0xff]  ;;  %v1778_v28 = vld [vmem:[%s2660_s30 + $0x8] sm:$0xf]  ;;  %v2390_v29 = vld [vmem:[%s2660_s30 + $0x38] sm:$0xf0]  ;;  %v1771_v33 = vor.u32 %v2389_v26, %v1770_v25 }
  0x15   : > { %1361 = vmatpush.bf16.msra.mxu2 %v2456_v7  ;;  %v2474_v30 = vld [vmem:[%s3074_s1 + $0x138] sm:$0xff]  ;;  %v1779_v34 = vor.u32 %v2390_v29, %v1778_v28  ;;  %v2459_v35 = vld [vmem:[%s3074_s1 + $0xc0] sm:$0xff]  ;;  %v2384_v36 = vld [vmem:[%s2660_s30 + $0xc] sm:$0xf] }
  0x16   : > { %1390 = vmatpush.bf16.msra.mxu3 %v2464_v8  ;;  %v2490_v31 = vld [vmem:[%s3074_s1 + $0x1b8] sm:$0xff]  ;;  %v1780_v37 = vld [vmem:[%s2660_s30 + $0x3c] sm:$0xf0]  ;;  %v2449_v38 = vld [vmem:[%s3074_s1 + $0x70] sm:$0xff] }
  0x17   : > { %v2498_v39 = vld [vmem:[%s3074_s1 + $0x1f8] sm:$0xff]  ;;  %v2473_v40 = vld [vmem:[%s3074_s1 + $0x130] sm:$0xff]  ;;  %v1783_v42 = vor.u32 %v2384_v36, %v1780_v37  ;;  %v2448_v43 = vld [vmem:[%s3074_s1 + $0x68] sm:$0xff] }
  0x18   : > { %2538 = vmatpush.bf16.msra.mxu1 %v2439_v9  ;;  %1304 = vmatpush.bf16.msra.mxu0 %v2439_v9  ;;  %v2489_v41 = vld [vmem:[%s3074_s1 + $0x1b0] sm:$0xff]  ;;  %v2472_v45 = vld [vmem:[%s3074_s1 + $0x128] sm:$0xff]  ;;  %v2447_v47 = vld [vmem:[%s3074_s1 + $0x60] sm:$0xff] }
  0x19   : > { %1362 = vmatpush.bf16.msra.mxu2 %v2455_v10  ;;  %v2497_v44 = vld [vmem:[%s3074_s1 + $0x1f0] sm:$0xff]  ;;  %v2488_v46 = vld [vmem:[%s3074_s1 + $0x1a8] sm:$0xff]  ;;  %v2471_v49 = vld [vmem:[%s3074_s1 + $0x120] sm:$0xff] }
  0x1a   : > { %1391 = vmatpush.bf16.msra.mxu3 %v2463_v11  ;;  %v2496_v48 = vld [vmem:[%s3074_s1 + $0x1e8] sm:$0xff]  ;;  %v2487_v50 = vld [vmem:[%s3074_s1 + $0x1a0] sm:$0xff]  ;;  %v1926_v51 = vld [vmem:[%s2660_s30 + $0x138] sm:$0xf] }
  0x1b   : > { %v2428_v52 = vld [vmem:[%s2660_s30 + $0x168] sm:$0xf0]  ;;  %v1822_v53 = vld [vmem:[%s2660_s30 + $0x68] sm:$0xf]  ;;  %v2402_v54 = vld [vmem:[%s2660_s30 + $0x98] sm:$0xf0] }
  0x1c   : > { %2539 = vmatpush.bf16.msra.mxu1 %v2438_v12  ;;  %1305 = vmatpush.bf16.msra.mxu0 %v2438_v12  ;;  %v2446_v55 = vld [vmem:[%s3074_s1 + $0x58] sm:$0xff]  ;;  %v1830_v56 = vld [vmem:[%s2660_s30 + $0x70] sm:$0xf]  ;;  %v2403_v57 = vld [vmem:[%s2660_s30 + $0xa0] sm:$0xf0]  ;;  %v1927_v59 = vor.u32 %v2428_v52, %v1926_v51  ;;  %v1823_v60 = vor.u32 %v2402_v54, %v1822_v53 }
  0x1d   : > { %1363 = vmatpush.bf16.msra.mxu2 %v2454_v13  ;;  %v2470_v58 = vld [vmem:[%s3074_s1 + $0x118] sm:$0xff]  ;;  %v1831_v61 = vor.u32 %v2403_v57, %v1830_v56  ;;  %v2397_v62 = vld [vmem:[%s2660_s30 + $0x74] sm:$0xf]  ;;  %v1832_v63 = vld [vmem:[%s2660_s30 + $0xa4] sm:$0xf0] }
  0x1e   : > { %1392 = vmatpush.bf16.msra.mxu3 %v2462_v14  ;;  %v2445_v0 = vld [vmem:[%s3074_s1 + $0x50] sm:$0xff]  ;;  %v1835_v2 = vor.u32 %v2397_v62, %v1832_v63  ;;  %v2486_v3 = vld [vmem:[%s3074_s1 + $0x198] sm:$0xff]  ;;  %v2444_v4 = vld [vmem:[%s3074_s1 + $0x48] sm:$0xff] }
  0x1f   : > { %v2469_v1 = vld [vmem:[%s3074_s1 + $0x110] sm:$0xff]  ;;  %v2495_v5 = vld [vmem:[%s3074_s1 + $0x1e0] sm:$0xff]  ;;  %v2468_v6 = vld [vmem:[%s3074_s1 + $0x108] sm:$0xff] }
  0x20   : > { %2540 = vmatpush.bf16.msra.mxu1 %v2437_v15  ;;  %1306 = vmatpush.bf16.msra.mxu0 %v2437_v15  ;;  %v2485_v7 = vld [vmem:[%s3074_s1 + $0x190] sm:$0xff]  ;;  %v2494_v8 = vld [vmem:[%s3074_s1 + $0x1d8] sm:$0xff]  ;;  %v2443_v9 = vld [vmem:[%s3074_s1 + $0x40] sm:$0xff] }
  0x21   : > { %1364 = vmatpush.bf16.msra.mxu2 %v2453_v16  ;;  %v2482_v10 = vld [vmem:[%s3074_s1 + $0x178] sm:$0xff]  ;;  %v2467_v11 = vld [vmem:[%s3074_s1 + $0x100] sm:$0xff]  ;;  %v1786_v15 = vld [vmem:[%s2660_s30 + $0x10] sm:$0xf] }
  0x22   : > { %1393 = vmatpush.bf16.msra.mxu3 %v2461_v17  ;;  %v2383_v12 = vld [vmem:[%s2660_s30 + $0x4] sm:$0xf]  ;;  %v2506_v13 = vld [vmem:[%s3074_s1 + $0x238] sm:$0xff]  ;;  %v1884_v24 = vld [vmem:[%s2660_s30 + $0x10c] sm:$0xf0] }
  0x23   : > { %v1772_v14 = vld [vmem:[%s2660_s30 + $0x34] sm:$0xf0]  ;;  %v2391_v16 = vld [vmem:[%s2660_s30 + $0x40] sm:$0xf0]  ;;  %v2505_v25 = vld [vmem:[%s3074_s1 + $0x230] sm:$0xff] }
  0x24   : > { %2541 = vmatpush.bf16.msra.mxu1 %v2436_v18  ;;  %1307 = vmatpush.bf16.msra.mxu0 %v2436_v18  ;;  %v1882_v17 = vld [vmem:[%s2660_s30 + $0xd8] sm:$0xf]  ;;  %v2416_v18 = vld [vmem:[%s2660_s30 + $0x108] sm:$0xf0]  ;;  %v1787_v21 = vor.u32 %v2391_v16, %v1786_v15  ;;  %v2483_v29 = vld [vmem:[%s3074_s1 + $0x180] sm:$0xff] }
  0x25   : > { %1365 = vmatpush.bf16.msra.mxu2 %v2452_v19  ;;  %v2481_v19 = vld [vmem:[%s3074_s1 + $0x170] sm:$0xff]  ;;  %v2480_v26 = vld [vmem:[%s3074_s1 + $0x168] sm:$0xff]  ;;  %v1824_v37 = vld [vmem:[%s2660_s30 + $0x9c] sm:$0xf0] }
  0x26   : > { %1394 = vmatpush.bf16.msra.mxu3 %v2460_v23  ;;  %v2410_v23 = vld [vmem:[%s2660_s30 + $0xdc] sm:$0xf]  ;;  %v2396_v36 = vld [vmem:[%s2660_s30 + $0x6c] sm:$0xf]  ;;  %v2491_v51 = vld [vmem:[%s3074_s1 + $0x1c0] sm:$0xff] }
  0x27   : > { %v1887_v28 = vor.u32 %v2410_v23, %v1884_v24  ;;  %v2502_v52 = vld [vmem:[%s3074_s1 + $0x218] sm:$0xff]  ;;  %v2475_v53 = vld [vmem:[%s3074_s1 + $0x140] sm:$0xff]  ;;  %v2521_v54 = vld [vmem:[%s3074_s1 + $0x2b0] sm:$0xff] }
  0x28   : > { %2542 = vmatpush.bf16.msra.mxu1 %v2435_v20  ;;  %1308 = vmatpush.bf16.msra.mxu0 %v2435_v20  ;;  %v1775_v20 = vor.u32 %v2383_v12, %v1772_v14  ;;  %v2530_v56 = vld [vmem:[%s3074_s1 + $0x2f8] sm:$0xff]  ;;  %v2409_v57 = vld [vmem:[%s2660_s30 + $0xd4] sm:$0xf]  ;;  %v2392_v63 = vld [vmem:[%s2660_s30 + $0x48] sm:$0xf0] }
  0x29   : > { %1366 = vmatpush.bf16.msra.mxu2 %v2451_v27  ;;  %v2484_v27 = vld [vmem:[%s3074_s1 + $0x188] sm:$0xff]  ;;  %v1794_v62 = vld [vmem:[%s2660_s30 + $0x18] sm:$0xf]  ;;  %v1928_v14 = vld [vmem:[%s2660_s30 + $0x16c] sm:$0xf0] }
  0x2a   : > { %1395 = vmatpush.bf16.msra.mxu3 %v2459_v35  ;;  %v2478_v35 = vld [vmem:[%s3074_s1 + $0x158] sm:$0xff]  ;;  %v2528_v12 = vld [vmem:[%s3074_s1 + $0x2e8] sm:$0xff] }
  0x2b   : > { %1319 = vmatmul.bf16.vlgmr.msra.gmra.mxu1 %v1875_v32  ;;  %1309 = vmatmul.bf16.vlgmr.msra.gmra.mxu0 %v1771_v33  ;;  %v2479_v32 = vld [vmem:[%s3074_s1 + $0x160] sm:$0xff]  ;;  %v2492_v33 = vld [vmem:[%s3074_s1 + $0x1c8] sm:$0xff]  ;;  %v2430_v16 = vld [vmem:[%s2660_s30 + $0x178] sm:$0xf0] }
  0x2c   : > { %1330 = vmatpush.bf16.msrb.mxu1 %v2450_v22  ;;  %1417 = vmatpush.bf16.msrb.mxu0 %v2474_v30  ;;  %v1883_v22 = vor.u32 %v2416_v18, %v1882_v17  ;;  %v2493_v30 = vld [vmem:[%s3074_s1 + $0x1d0] sm:$0xff]  ;;  %v1942_v15 = vld [vmem:[%s2660_s30 + $0x148] sm:$0xf]  ;;  %v1846_v17 = vld [vmem:[%s2660_s30 + $0x80] sm:$0xf] }
  0x2d   : > { %1475 = vmatpush.bf16.msrb.mxu2 %v2490_v31  ;;  %1396 = vmatmul.bf16.vlgmr.msra.gmra.mxu3 %v1783_v42  ;;  %v2504_v31 = vld [vmem:[%s3074_s1 + $0x228] sm:$0xff]  ;;  %v2477_v42 = vld [vmem:[%s3074_s1 + $0x150] sm:$0xff]  ;;  %v1848_v23 = vld [vmem:[%s2660_s30 + $0xb4] sm:$0xf0] }
  0x2e   : > { %1367 = vmatmul.bf16.vlgmr.msra.gmra.mxu2 %v1779_v34  ;;  %1504 = vmatpush.bf16.msrb.mxu3 %v2498_v39  ;;  %v2503_v34 = vld [vmem:[%s3074_s1 + $0x220] sm:$0xff]  ;;  %v2404_v39 = vld [vmem:[%s2660_s30 + $0xa8] sm:$0xf0]  ;;  %v2405_v18 = vld [vmem:[%s2660_s30 + $0xb0] sm:$0xf0] }
  0x30   : > { %1331 = vmatpush.bf16.msrb.mxu1 %v2449_v38  ;;  %1418 = vmatpush.bf16.msrb.mxu0 %v2473_v40  ;;  %v1838_v38 = vld [vmem:[%s2660_s30 + $0x78] sm:$0xf]  ;;  %v1934_v40 = vld [vmem:[%s2660_s30 + $0x140] sm:$0xf] }
  0x31   : > { %1476 = vmatpush.bf16.msrb.mxu2 %v2489_v41  ;;  %v2429_v41 = vld [vmem:[%s2660_s30 + $0x170] sm:$0xf0] }
  0x32   : > { %1505 = vmatpush.bf16.msrb.mxu3 %v2497_v44  ;;  %v1839_v44 = vor.u32 %v2404_v39, %v1838_v38 }
  0x34   : > { %1332 = vmatpush.bf16.msrb.mxu1 %v2448_v43  ;;  %1419 = vmatpush.bf16.msrb.mxu0 %v2472_v45  ;;  %v1827_v43 = vor.u32 %v2396_v36, %v1824_v37  ;;  %v1935_v45 = vor.u32 %v2429_v41, %v1934_v40  ;;  %v2418_v36 = vld [vmem:[%s2660_s30 + $0x118] sm:$0xf0]  ;;  %v2412_v40 = vld [vmem:[%s2660_s30 + $0xec] sm:$0xf]  ;;  %v1900_v41 = vld [vmem:[%s2660_s30 + $0x11c] sm:$0xf0] }
  0x35   : > { %1477 = vmatpush.bf16.msrb.mxu2 %v2488_v46  ;;  %v2423_v46 = vld [vmem:[%s2660_s30 + $0x144] sm:$0xf] }
  0x36   : > { %1506 = vmatpush.bf16.msrb.mxu3 %v2496_v48 }
  0x38   : > { %1333 = vmatpush.bf16.msrb.mxu1 %v2447_v47  ;;  %1420 = vmatpush.bf16.msrb.mxu0 %v2471_v49  ;;  %v1936_v47 = vld [vmem:[%s2660_s30 + $0x174] sm:$0xf0]  ;;  %v2476_v49 = vld [vmem:[%s3074_s1 + $0x148] sm:$0xff] }
  0x39   : > { %1478 = vmatpush.bf16.msrb.mxu2 %v2487_v50  ;;  %v1939_v48 = vor.u32 %v2423_v46, %v1936_v47  ;;  %v2522_v50 = vld [vmem:[%s3074_s1 + $0x2b8] sm:$0xff]  ;;  %v2515_v46 = vld [vmem:[%s3074_s1 + $0x280] sm:$0xff]  ;;  %v2525_v47 = vld [vmem:[%s3074_s1 + $0x2d0] sm:$0xff] }
  0x3a   : > { %1507 = vmatpush.bf16.msrb.mxu3 %v2495_v5 }
  0x3b   : > { %1324 = vmatmul.bf16.gmra.mxu1 %v1927_v59  ;;  %1314 = vmatmul.bf16.gmra.mxu0 %v1823_v60  ;;  %v1876_v59 = vld [vmem:[%s2660_s30 + $0x104] sm:$0xf0]  ;;  %v1890_v60 = vld [vmem:[%s2660_s30 + $0xe0] sm:$0xf] }
  0x3c   : > { %1334 = vmatpush.bf16.msrb.mxu1 %v2446_v55  ;;  %1421 = vmatpush.bf16.msrb.mxu0 %v2470_v58  ;;  %v2501_v55 = vld [vmem:[%s3074_s1 + $0x210] sm:$0xff]  ;;  %v2500_v58 = vld [vmem:[%s3074_s1 + $0x208] sm:$0xff] }
  0x3d   : > { %1479 = vmatpush.bf16.msrb.mxu2 %v2486_v3  ;;  %1401 = vmatmul.bf16.gmra.mxu3 %v1835_v2  ;;  %v1795_v2 = vor.u32 %v2392_v63, %v1794_v62  ;;  %v2386_v3 = vld [vmem:[%s2660_s30 + $0x1c] sm:$0xf]  ;;  %v2508_v63 = vld [vmem:[%s3074_s1 + $0x248] sm:$0xff] }
  0x3e   : > { %1372 = vmatmul.bf16.gmra.mxu2 %v1831_v61  ;;  %1508 = vmatpush.bf16.msrb.mxu3 %v2494_v8  ;;  %v2417_v61 = vld [vmem:[%s2660_s30 + $0x110] sm:$0xf0]  ;;  %v2499_v8 = vld [vmem:[%s3074_s1 + $0x200] sm:$0xff] }
  0x40   : > { %1335 = vmatpush.bf16.msrb.mxu1 %v2445_v0  ;;  %1422 = vmatpush.bf16.msrb.mxu0 %v2469_v1  ;;  %v1879_v0 = vor.u32 %v2409_v57, %v1876_v59  ;;  %v1891_v1 = vor.u32 %v2417_v61, %v1890_v60  ;;  %v2425_v59 = vld [vmem:[%s2660_s30 + $0x154] sm:$0xf]  ;;  %v1952_v60 = vld [vmem:[%s2660_s30 + $0x184] sm:$0xf0] }
  0x41   : > { %1480 = vmatpush.bf16.msrb.mxu2 %v2485_v7  ;;  %v2520_v7 = vld [vmem:[%s3074_s1 + $0x2a8] sm:$0xff]  ;;  %v1955_v62 = vor.u32 %v2425_v59, %v1952_v60 }
  0x42   : > { %1509 = vmatpush.bf16.msrb.mxu3 %v2493_v30  ;;  %v2517_v30 = vld [vmem:[%s3074_s1 + $0x290] sm:$0xff]  ;;  %v2524_v61 = vld [vmem:[%s3074_s1 + $0x2c8] sm:$0xff] }
  0x44   : > { %1336 = vmatpush.bf16.msrb.mxu1 %v2444_v4  ;;  %1423 = vmatpush.bf16.msrb.mxu0 %v2468_v6  ;;  %v1796_v4 = vld [vmem:[%s2660_s30 + $0x4c] sm:$0xf0]  ;;  %v2514_v6 = vld [vmem:[%s3074_s1 + $0x278] sm:$0xff] }
  0x45   : > { %1481 = vmatpush.bf16.msrb.mxu2 %v2484_v27  ;;  %v1799_v5 = vor.u32 %v2386_v3, %v1796_v4  ;;  %v2527_v27 = vld [vmem:[%s3074_s1 + $0x2e0] sm:$0xff]  ;;  %v1892_v4 = vld [vmem:[%s2660_s30 + $0x114] sm:$0xf0] }
  0x46   : > { %1510 = vmatpush.bf16.msrb.mxu3 %v2492_v33  ;;  %v1802_v33 = vld [vmem:[%s2660_s30 + $0x20] sm:$0xf]  ;;  %v2411_v3 = vld [vmem:[%s2660_s30 + $0xe4] sm:$0xf] }
  0x48   : > { %1337 = vmatpush.bf16.msrb.mxu1 %v2443_v9  ;;  %1424 = vmatpush.bf16.msrb.mxu0 %v2467_v11  ;;  %v2529_v9 = vld [vmem:[%s3074_s1 + $0x2f0] sm:$0xff]  ;;  %v2519_v11 = vld [vmem:[%s3074_s1 + $0x2a0] sm:$0xff] }
  0x49   : > { %1482 = vmatpush.bf16.msrb.mxu2 %v2483_v29  ;;  %v2511_v29 = vld [vmem:[%s3074_s1 + $0x260] sm:$0xff] }
  0x4a   : > { %1511 = vmatpush.bf16.msrb.mxu3 %v2491_v51  ;;  %v1840_v51 = vld [vmem:[%s2660_s30 + $0xac] sm:$0xf0] }
  0x4b   : > { %1338 = vmatmul.bf16.vlgmr.msrb.gmra.mxu1 %v1775_v20  ;;  %1425 = vmatmul.bf16.vlgmr.msrb.gmra.mxu0 %v1787_v21  ;;  %v1943_v20 = vor.u32 %v2430_v16, %v1942_v15  ;;  %v1847_v21 = vor.u32 %v2405_v18, %v1846_v17  ;;  %v1812_v15 = vld [vmem:[%s2660_s30 + $0x5c] sm:$0xf0] }
  0x4c   : > { %1446 = vmatpush.bf16.msra.mxu1 %v2482_v10  ;;  %1533 = vmatpush.bf16.msra.mxu0 %v2506_v13  ;;  %v2513_v10 = vld [vmem:[%s3074_s1 + $0x270] sm:$0xff]  ;;  %v2422_v13 = vld [vmem:[%s2660_s30 + $0x13c] sm:$0xf]  ;;  %v2531_v17 = vld [vmem:[%s3074_s1 + $0x300] sm:$0xff] }
  0x4d   : > { %1406 = vmatmul.bf16.gmra.mxu3 %v1887_v28  ;;  %1591 = vmatpush.bf16.msra.mxu2 %v2522_v50  ;;  %v2534_v28 = vld [vmem:[%s3074_s1 + $0x318] sm:$0xff] }
  0x4e   : > { %1377 = vmatmul.bf16.gmra.mxu2 %v1883_v22  ;;  %1620 = vmatpush.bf16.msra.mxu3 %v2530_v56  ;;  %v2399_v22 = vld [vmem:[%s2660_s30 + $0x84] sm:$0xf]  ;;  %v2398_v50 = vld [vmem:[%s2660_s30 + $0x7c] sm:$0xf] }
  0x4f   : > { %v1851_v24 = vor.u32 %v2399_v22, %v1848_v23  ;;  %v1843_v56 = vor.u32 %v2398_v50, %v1840_v51  ;;  %v2424_v22 = vld [vmem:[%s2660_s30 + $0x14c] sm:$0xf]  ;;  %v1944_v23 = vld [vmem:[%s2660_s30 + $0x17c] sm:$0xf0] }
  0x50   : > { %1447 = vmatpush.bf16.msra.mxu1 %v2481_v19  ;;  %1534 = vmatpush.bf16.msra.mxu0 %v2505_v25  ;;  %v1931_v19 = vor.u32 %v2422_v13, %v1928_v14  ;;  %v2512_v25 = vld [vmem:[%s3074_s1 + $0x268] sm:$0xff] }
  0x51   : > { %1592 = vmatpush.bf16.msra.mxu2 %v2521_v54  ;;  %v1950_v54 = vld [vmem:[%s2660_s30 + $0x150] sm:$0xf]  ;;  %v2388_v14 = vld [vmem:[%s2660_s30 + $0x2c] sm:$0xf] }
  0x52   : > { %1621 = vmatpush.bf16.msra.mxu3 %v2529_v9  ;;  %v1895_v9 = vor.u32 %v2411_v3, %v1892_v4  ;;  %v1815_v16 = vor.u32 %v2388_v14, %v1812_v15  ;;  %v2400_v4 = vld [vmem:[%s2660_s30 + $0x8c] sm:$0xf] }
  0x54   : > { %1448 = vmatpush.bf16.msra.mxu1 %v2480_v26  ;;  %1535 = vmatpush.bf16.msra.mxu0 %v2504_v31  ;;  %v2518_v26 = vld [vmem:[%s3074_s1 + $0x298] sm:$0xff]  ;;  %v2385_v31 = vld [vmem:[%s2660_s30 + $0x14] sm:$0xf] }
  0x55   : > { %1593 = vmatpush.bf16.msra.mxu2 %v2520_v7  ;;  %v1810_v7 = vld [vmem:[%s2660_s30 + $0x28] sm:$0xf] }
  0x56   : > { %1622 = vmatpush.bf16.msra.mxu3 %v2528_v12 }
  0x58   : > { %1449 = vmatpush.bf16.msra.mxu1 %v2479_v32  ;;  %1536 = vmatpush.bf16.msra.mxu0 %v2503_v34  ;;  %v1788_v32 = vld [vmem:[%s2660_s30 + $0x44] sm:$0xf0]  ;;  %v2393_v34 = vld [vmem:[%s2660_s30 + $0x50] sm:$0xf0] }
  0x59   : > { %1594 = vmatpush.bf16.msra.mxu2 %v2519_v11  ;;  %v1791_v37 = vor.u32 %v2385_v31, %v1788_v32  ;;  %v1803_v38 = vor.u32 %v2393_v34, %v1802_v33  ;;  %v2401_v34 = vld [vmem:[%s2660_s30 + $0x94] sm:$0xf] }
  0x5a   : > { %1623 = vmatpush.bf16.msra.mxu3 %v2527_v27  ;;  %v2407_v27 = vld [vmem:[%s2660_s30 + $0xc0] sm:$0xf0] }
  0x5b   : > { %1343 = vmatmul.bf16.gmra.mxu1 %v1827_v43  ;;  %1430 = vmatmul.bf16.gmra.mxu0 %v1839_v44  ;;  %v2516_v43 = vld [vmem:[%s3074_s1 + $0x288] sm:$0xff]  ;;  %v1903_v44 = vor.u32 %v2412_v40, %v1900_v41 }
  0x5c   : > { %1450 = vmatpush.bf16.msra.mxu1 %v2478_v35  ;;  %1537 = vmatpush.bf16.msra.mxu0 %v2502_v52  ;;  %v1898_v35 = vld [vmem:[%s2660_s30 + $0xe8] sm:$0xf] }
  0x5d   : > { %1411 = vmatmul.bf16.gmra.mxu3 %v1939_v48  ;;  %1595 = vmatpush.bf16.msra.mxu2 %v2518_v26  ;;  %v1899_v39 = vor.u32 %v2418_v36, %v1898_v35  ;;  %v2533_v48 = vld [vmem:[%s3074_s1 + $0x310] sm:$0xff]  ;;  %v1854_v52 = vld [vmem:[%s2660_s30 + $0x88] sm:$0xf] }
  0x5e   : > { %1382 = vmatmul.bf16.gmra.mxu2 %v1935_v45  ;;  %v2510_v45 = vld [vmem:[%s3074_s1 + $0x258] sm:$0xff]  ;;  %v1862_v26 = vld [vmem:[%s2660_s30 + $0x90] sm:$0xf]  ;;  %v1864_v35 = vld [vmem:[%s2660_s30 + $0xc4] sm:$0xf0] }
  0x5f   : > { %v1863_v33 = vor.u32 %v2407_v27, %v1862_v26 }
  0x60   : > { %1451 = vmatpush.bf16.msra.mxu1 %v2477_v42  ;;  %1538 = vmatpush.bf16.msra.mxu0 %v2501_v55  ;;  %v2526_v42 = vld [vmem:[%s3074_s1 + $0x2d8] sm:$0xff]  ;;  %v2431_v55 = vld [vmem:[%s2660_s30 + $0x180] sm:$0xf0] }
  0x61   : > { %1596 = vmatpush.bf16.msra.mxu2 %v2517_v30  ;;  %1624 = vmatpush.bf16.msra.mxu3 %v2526_v42  ;;  %v2387_v42 = vld [vmem:[%s2660_s30 + $0x24] sm:$0xf] }
  0x64   : > { %1452 = vmatpush.bf16.msra.mxu1 %v2476_v49  ;;  %1539 = vmatpush.bf16.msra.mxu0 %v2500_v58  ;;  %v2509_v49 = vld [vmem:[%s3074_s1 + $0x250] sm:$0xff]  ;;  %v1951_v58 = vor.u32 %v2431_v55, %v1950_v54  ;;  %v2414_v54 = vld [vmem:[%s2660_s30 + $0xfc] sm:$0xf] }
  0x65   : > { %1597 = vmatpush.bf16.msra.mxu2 %v2516_v43  ;;  %1625 = vmatpush.bf16.msra.mxu3 %v2525_v47  ;;  %v1804_v43 = vld [vmem:[%s2660_s30 + $0x54] sm:$0xf0]  ;;  %v2420_v47 = vld [vmem:[%s2660_s30 + $0x128] sm:$0xf0]  ;;  %v1916_v55 = vld [vmem:[%s2660_s30 + $0x12c] sm:$0xf0] }
  0x66   : > { %v1919_v59 = vor.u32 %v2414_v54, %v1916_v55 }
  0x68   : > { %1453 = vmatpush.bf16.msra.mxu1 %v2475_v53  ;;  %1540 = vmatpush.bf16.msra.mxu0 %v2499_v8  ;;  %v2406_v53 = vld [vmem:[%s2660_s30 + $0xb8] sm:$0xf0] }
  0x69   : > { %1598 = vmatpush.bf16.msra.mxu2 %v2515_v46  ;;  %v1855_v57 = vor.u32 %v2406_v53, %v1854_v52  ;;  %1626 = vmatpush.bf16.msra.mxu3 %v2524_v61  ;;  %v2394_v8 = vld [vmem:[%s2660_s30 + $0x58] sm:$0xf0]  ;;  %v1914_v46 = vld [vmem:[%s2660_s30 + $0xf8] sm:$0xf] }
  0x6a   : > { %v1811_v13 = vor.u32 %v2394_v8, %v1810_v7  ;;  %v1915_v53 = vor.u32 %v2420_v47, %v1914_v46  ;;  %v2408_v7 = vld [vmem:[%s2660_s30 + $0xc8] sm:$0xf0] }
  0x6b   : > { %1348 = vmatmul.bf16.gmra.mxu1 %v1879_v0  ;;  %1435 = vmatmul.bf16.gmra.mxu0 %v1891_v1  ;;  %v2523_v0 = vld [vmem:[%s3074_s1 + $0x2c0] sm:$0xff]  ;;  %v2532_v1 = vld [vmem:[%s3074_s1 + $0x308] sm:$0xff] }
  0x6c   : > { %1562 = vmatpush.bf16.msrb.mxu1 %v2514_v6  ;;  %1653 = vmatpush.bf16.msrb.mxu0 %v2534_v28  ;;  %v2419_v6 = vld [vmem:[%s2660_s30 + $0x120] sm:$0xf0] }
  0x6d   : > { %1512 = vmatmul.bf16.vlgmr.msrb.gmra.mxu3 %v1799_v5  ;;  %v1906_v5 = vld [vmem:[%s2660_s30 + $0xf0] sm:$0xf] }
  0x6e   : > { %1483 = vmatmul.bf16.vlgmr.msrb.gmra.mxu2 %v1795_v2  ;;  %1627 = vmatpush.bf16.msra.mxu3 %v2523_v0  ;;  %v2507_v2 = vld [vmem:[%s3074_s1 + $0x240] sm:$0xff] }
  0x6f   : > { %2543 = vmatpush.bf16.msrb.mxu2 %v2534_v28  ;;  %v1947_v28 = vor.u32 %v2424_v22, %v1944_v23 }
  0x70   : > { %1563 = vmatpush.bf16.msrb.mxu1 %v2513_v10  ;;  %1654 = vmatpush.bf16.msrb.mxu0 %v2533_v48  ;;  %v1907_v10 = vor.u32 %v2419_v6, %v1906_v5  ;;  %v1856_v5 = vld [vmem:[%s2660_s30 + $0xbc] sm:$0xf0]  ;;  %v1870_v6 = vld [vmem:[%s2660_s30 + $0x98] sm:$0xf] }
  0x71   : > { %v1871_v15 = vor.u32 %v2408_v7, %v1870_v6 }
  0x73   : > { %2544 = vmatpush.bf16.msrb.mxu2 %v2533_v48  ;;  %v1807_v48 = vor.u32 %v2387_v42, %v1804_v43  ;;  %v1974_v43 = vld [vmem:[%s2660_s30 + $0x168] sm:$0xf] }
  0x74   : > { %1564 = vmatpush.bf16.msrb.mxu1 %v2512_v25  ;;  %1655 = vmatpush.bf16.msrb.mxu0 %v2532_v1  ;;  %v2432_v25 = vld [vmem:[%s2660_s30 + $0x188] sm:$0xf0] }
  0x77   : > { %2545 = vmatpush.bf16.msrb.mxu2 %v2532_v1 }
  0x78   : > { %1565 = vmatpush.bf16.msrb.mxu1 %v2511_v29  ;;  %1656 = vmatpush.bf16.msrb.mxu0 %v2531_v17 }
  0x7b   : > { %1353 = vmatmul.bf16.gmra.mxu1 %v1931_v19  ;;  %1440 = vmatmul.bf16.gmra.mxu0 %v1943_v20 }
  0x7c   : > { %1566 = vmatpush.bf16.msrb.mxu1 %v2510_v45  ;;  %2546 = vmatpush.bf16.msrb.mxu2 %v2531_v17  ;;  %v2395_v45 = vld [vmem:[%s2660_s30 + $0x60] sm:$0xf0] }
  0x7d   : > { %1517 = vmatmul.bf16.gmra.mxu3 %v1851_v24  ;;  %v1958_v24 = vld [vmem:[%s2660_s30 + $0x158] sm:$0xf] }
  0x7e   : > { %1488 = vmatmul.bf16.gmra.mxu2 %v1847_v21  ;;  %v1959_v30 = vor.u32 %v2432_v25, %v1958_v24 }
  0x80   : > { %1567 = vmatpush.bf16.msrb.mxu1 %v2509_v49 }
  0x84   : > { %1568 = vmatpush.bf16.msrb.mxu1 %v2508_v63 }
  0x88   : > { %1569 = vmatpush.bf16.msrb.mxu1 %v2507_v2 }
  0x8b   : > { %1454 = vmatmul.bf16.vlgmr.msra.gmra.mxu1 %v1791_v37  ;;  %1541 = vmatmul.bf16.vlgmr.msra.gmra.mxu0 %v1803_v38  ;;  %v1867_v37 = vor.u32 %v2401_v34, %v1864_v35  ;;  %v2413_v35 = vld [vmem:[%s2660_s30 + $0xf4] sm:$0xf] }
  0x8d   : > { %1522 = vmatmul.bf16.gmra.mxu3 %v1903_v44  ;;  %v1818_v44 = vld [vmem:[%s2660_s30 + $0x30] sm:$0xf] }
  0x8e   : > { %1493 = vmatmul.bf16.gmra.mxu2 %v1899_v39  ;;  %v1819_v50 = vor.u32 %v2395_v45, %v1818_v44  ;;  %v2434_v44 = vld [vmem:[%s2660_s30 + $0x198] sm:$0xf0] }
  0x9b   : > { %1459 = vmatmul.bf16.gmra.mxu1 %v1843_v56  ;;  %1546 = vmatmul.bf16.gmra.mxu0 %v1855_v57 }
  0x9d   : > { %1527 = vmatmul.bf16.gmra.mxu3 %v1955_v62 }
  0x9e   : > { %1498 = vmatmul.bf16.gmra.mxu2 %v1951_v58 }
  0xa8   : > { %v2972_v11 = vpop.f32.mrf.mxu1  ;;  %v1310_v12 = vpop.f32.mrf.mxu0 }
  0xab   : > { %1464 = vmatmul.bf16.gmra.mxu1 %v1895_v9  ;;  %1551 = vmatmul.bf16.gmra.mxu0 %v1907_v10  ;;  %v1966_v9 = vld [vmem:[%s2660_s30 + $0x160] sm:$0xf]  ;;  %v2433_v10 = vld [vmem:[%s2660_s30 + $0x190] sm:$0xf0] }
  0xad   : > { %1628 = vmatmul.bf16.vlgmr.msra.gmra.mxu3 %v1815_v16 }
  0xae   : > { %1599 = vmatmul.bf16.vlgmr.msra.gmra.mxu2 %v1811_v13  ;;  %v1859_v13 = vor.u32 %v2400_v4, %v1856_v5 }
  0xb0   : > { %v2979_v19 = vpop.f32.mrf.mxu1  ;;  %v1312_v20 = vpop.f32.mrf.mxu0 }
  0xb1   : > { %v1368_v18 = vpop.f32.mrf.mxu2  ;;  %v1397_v21 = vpop.f32.mrf.mxu3 }
  0xb8   : > { %v2987_v31 = vpop.f32.mrf.mxu1  ;;  %v1315_v32 = vpop.f32.mrf.mxu0 }
  0xb9   : > { %v1370_v29 = vpop.f32.mrf.mxu2  ;;  %v1399_v36 = vpop.f32.mrf.mxu3 }
  0xbb   : > { %1469 = vmatmul.bf16.gmra.mxu1 %v1947_v28  ;;  %1556 = vmatmul.bf16.gmra.mxu0 %v1959_v30 }
  0xbd   : > { %1633 = vmatmul.bf16.gmra.mxu3 %v1867_v37  ;;  %v1922_v37 = vld [vmem:[%s2660_s30 + $0x100] sm:$0xf] }
  0xbe   : > { %1604 = vmatmul.bf16.gmra.mxu2 %v1863_v33 }
  0xc0   : > { %v2991_v39 = vpop.f32.mrf.mxu1  ;;  %v1317_v40 = vpop.f32.mrf.mxu0 }
  0xc1   : > { %v1373_v38 = vpop.f32.mrf.mxu2  ;;  %v1402_v41 = vpop.f32.mrf.mxu3 }
  0xc8   : > { %v1339_v51 = vpop.f32.mrf.mxu1  ;;  %v1426_v52 = vpop.f32.mrf.mxu0 }
  0xc9   : > { %v1375_v49 = vpop.f32.mrf.mxu2  ;;  %v1340_v56 = vadd.f32 %v1339_v51, %v1310_v12  ;;  %v1404_v57 = vpop.f32.mrf.mxu3  ;;  %v1975_v51 = vor.u32 %v2434_v44, %v1974_v43 }
  0xcb   : > { %v1369_v58 = vadd.f32 %v1368_v18, %v1340_v56  ;;  %1570 = vmatmul.bf16.vlgmr.msrb.gmra.mxu1 %v1807_v48  ;;  %2376 = vmatmul.msk.bf16.vlgmr.msrb.gmra.mxu0 %vm1288_vm0, %v1819_v50  ;;  %v1967_v18 = vor.u32 %v2433_v10, %v1966_v9 }
  0xcd   : > { %v1398_v60 = vadd.f32 %v1397_v21, %v1369_v58  ;;  %1638 = vmatmul.bf16.gmra.mxu3 %v1919_v59  ;;  %v1968_v21 = vld [vmem:[%s2660_s30 + $0x194] sm:$0xf0] }
  0xce   : > { %1609 = vmatmul.bf16.gmra.mxu2 %v1915_v53 }
  0xcf   : > { %v3002_v61 = vadd.f32 %v1426_v52, %v1398_v60 }
  0xd0   : > { %v1341_v63 = vpop.f32.mrf.mxu1  ;;  %v1428_v0 = vpop.f32.mrf.mxu0 }
  0xd1   : > { %v1378_v62 = vpop.f32.mrf.mxu2  ;;  %v1342_v1 = vadd.f32 %v1341_v63, %v1312_v20  ;;  %v1407_v2 = vpop.f32.mrf.mxu3  ;;  %v2427_v20 = vld [vmem:[%s2660_s30 + $0x164] sm:$0xf]  ;;  %v2426_v63 = vld [vmem:[%s2660_s30 + $0x15c] sm:$0xf] }
  0xd2   : > { %v1971_v25 = vor.u32 %v2427_v20, %v1968_v21 }
  0xd3   : > { %v1371_v3 = vadd.f32 %v1370_v29, %v1342_v1 }
  0xd5   : > { %v1400_v8 = vadd.f32 %v1399_v36, %v1371_v3  ;;  %v1908_v36 = vld [vmem:[%s2660_s30 + $0x124] sm:$0xf0] }
  0xd6   : > { %v1911_v46 = vor.u32 %v2413_v35, %v1908_v36 }
  0xd7   : > { %v3010_v12 = vadd.f32 %v1428_v0, %v1400_v8  ;;  %v1960_v0 = vld [vmem:[%s2660_s30 + $0x18c] sm:$0xf0] }
  0xd8   : > { %v1344_v16 = vpop.f32.mrf.mxu1  ;;  %v1431_v17 = vpop.f32.mrf.mxu0 }
  0xd9   : > { %v1380_v14 = vpop.f32.mrf.mxu2  ;;  %v1345_v22 = vadd.f32 %v1344_v16, %v1315_v32  ;;  %v1409_v23 = vpop.f32.mrf.mxu3 }
  0xdb   : > { %v1374_v24 = vadd.f32 %v1373_v38, %v1345_v22  ;;  %1575 = vmatmul.bf16.gmra.mxu1 %v1859_v13  ;;  %2377 = vmatmul.msk.bf16.gmra.mxu0 %vm1288_vm0, %v1871_v15  ;;  %v2421_v38 = vld [vmem:[%s2660_s30 + $0x130] sm:$0xf0] }
  0xdc   : > { %v1923_v47 = vor.u32 %v2421_v38, %v1922_v37 }
  0xdd   : > { %v1403_v26 = vadd.f32 %v1402_v41, %v1374_v24  ;;  %1643 = vmatmul.bf16.gmra.mxu3 %v1971_v25 }
  0xde   : > { %1614 = vmatmul.bf16.gmra.mxu2 %v1967_v18 }
  0xdf   : > { %v3015_v27 = vadd.f32 %v1431_v17, %v1403_v26 }
  0xe0   : > { %v1346_v29 = vpop.f32.mrf.mxu1  ;;  %v1433_v30 = vpop.f32.mrf.mxu0 }
  0xe1   : > { %v1383_v28 = vpop.f32.mrf.mxu2  ;;  %v1347_v32 = vadd.f32 %v1346_v29, %v1317_v40  ;;  %v1412_v33 = vpop.f32.mrf.mxu3 }
  0xe3   : > { %v1376_v34 = vadd.f32 %v1375_v49, %v1347_v32 }
  0xe5   : > { %v1405_v42 = vadd.f32 %v1404_v57, %v1376_v34 }
  0xe7   : > { %v3023_v45 = vadd.f32 %v1433_v30, %v1405_v42 }
  0xe8   : > { %v1349_v48 = vpop.f32.mrf.mxu1  ;;  %v1436_v50 = vpop.f32.mrf.mxu0 }
  0xe9   : > { %v1385_v41 = vpop.f32.mrf.mxu2  ;;  %v1350_v40 = vadd.f32 %v1349_v48, %v2972_v11  ;;  %v1414_v49 = vpop.f32.mrf.mxu3 }
  0xeb   : > { %v1379_v52 = vadd.f32 %v1378_v62, %v1350_v40  ;;  %1580 = vmatmul.bf16.gmra.mxu1 %v1911_v46  ;;  %2378 = vmatmul.msk.bf16.gmra.mxu0 %vm1288_vm0, %v1923_v47  ;;  %v1963_v62 = vor.u32 %v2426_v63, %v1960_v0 }
  0xed   : > { %v1408_v53 = vadd.f32 %v1407_v2, %v1379_v52 }
  0xee   : > { %2379 = vmatmul.msk.bf16.vlgmr.msrb.gmra.mxu2 %vm1288_vm0, %v1975_v51 }
  0xef   : > { %v3028_v54 = vadd.f32 %v1436_v50, %v1408_v53 }
  0xf0   : > { %v1351_v56 = vpop.f32.mrf.mxu1  ;;  %v1438_v57 = vpop.f32.mrf.mxu0 }
  0xf1   : > { %v1484_v55 = vpop.f32.mrf.mxu2  ;;  %v1352_v58 = vadd.f32 %v1351_v56, %v2979_v19  ;;  %v1513_v59 = vpop.f32.mrf.mxu3 }
  0xf3   : > { %v1381_v60 = vadd.f32 %v1380_v14, %v1352_v58 }
  0xf5   : > { %v1410_v11 = vadd.f32 %v1409_v23, %v1381_v60 }
  0xf7   : > { %v1439_v1 = vadd.f32 %v1438_v57, %v1410_v11 }
  0xf8   : > { %v1354_v4 = vpop.f32.mrf.mxu1  ;;  %v1441_v5 = vpop.f32.mrf.mxu0 }
  0xf9   : > { %v1486_v3 = vpop.f32.mrf.mxu2  ;;  %v1355_v6 = vadd.f32 %v1354_v4, %v2987_v31  ;;  %v1515_v2 = vpop.f32.mrf.mxu3 }
  0xfb   : > { %v1384_v7 = vadd.f32 %v1383_v28, %v1355_v6  ;;  %1585 = vmatmul.bf16.gmra.mxu1 %v1963_v62 }
  0xfd   : > { %v1413_v8 = vadd.f32 %v1412_v33, %v1384_v7 }
  0xff   : > { %v1442_v9 = vadd.f32 %v1441_v5, %v1413_v8 }
 0x100   : > { %v1356_v13 = vpop.f32.mrf.mxu1  ;;  %v1443_v19 = vpop.f32.mrf.mxu0 }
 0x101   : > { %v1489_v10 = vpop.f32.mrf.mxu2  ;;  %v1357_v14 = vadd.f32 %v1356_v13, %v2991_v39  ;;  %v1518_v15 = vpop.f32.mrf.mxu3 }
 0x103   : > { %v1386_v16 = vadd.f32 %v1385_v41, %v1357_v14 }
 0x105   : > { %v1415_v17 = vadd.f32 %v1414_v49, %v1386_v16 }
 0x107   : > { %v1444_v18 = vadd.f32 %v1443_v19, %v1415_v17 }
 0x108   : > { %v1455_v21 = vpop.f32.mrf.mxu1  ;;  %v1542_v22 = vpop.f32.mrf.mxu0 }
 0x109   : > { %v1491_v20 = vpop.f32.mrf.mxu2  ;;  %v1456_v23 = vadd.f32 %v1455_v21, %v3002_v61  ;;  %v1520_v24 = vpop.f32.mrf.mxu3 }
 0x10b   : > { %v1485_v31 = vadd.f32 %v1484_v55, %v1456_v23 }
 0x10d   : > { %v1514_v25 = vadd.f32 %v1513_v59, %v1485_v31 }
 0x10f   : > { %v3036_v26 = vadd.f32 %v1542_v22, %v1514_v25 }
 0x110   : > { %v1457_v29 = vpop.f32.mrf.mxu1  ;;  %v1544_v30 = vpop.f32.mrf.mxu0 }
 0x111   : > { %v1494_v28 = vpop.f32.mrf.mxu2  ;;  %v1458_v32 = vadd.f32 %v1457_v29, %v3010_v12  ;;  %v1523_v34 = vpop.f32.mrf.mxu3 }
 0x113   : > { %v1487_v39 = vadd.f32 %v1486_v3, %v1458_v32 }
 0x115   : > { %v1516_v33 = vadd.f32 %v1515_v2, %v1487_v39 }
 0x117   : > { %v1545_v35 = vadd.f32 %v1544_v30, %v1516_v33 }
 0x118   : > { %v1460_v37 = vpop.f32.mrf.mxu1  ;;  %v1547_v38 = vpop.f32.mrf.mxu0 }
 0x119   : > { %v1496_v36 = vpop.f32.mrf.mxu2  ;;  %v1461_v42 = vadd.f32 %v1460_v37, %v3015_v27  ;;  %v1525_v41 = vpop.f32.mrf.mxu3 }
 0x11b   : > { %v1490_v61 = vadd.f32 %v1489_v10, %v1461_v42 }
 0x11d   : > { %v1519_v43 = vadd.f32 %v1518_v15, %v1490_v61 }
 0x11f   : > { %v3040_v44 = vadd.f32 %v1547_v38, %v1519_v43 }
 0x120   : > { %v1462_v47 = vpop.f32.mrf.mxu1  ;;  %v1549_v48 = vpop.f32.mrf.mxu0 }
 0x121   : > { %v1499_v46 = vpop.f32.mrf.mxu2  ;;  %v1463_v50 = vadd.f32 %v1462_v47, %v3023_v45  ;;  %v1528_v27 = vpop.f32.mrf.mxu3 }
 0x123   : > { %v1492_v12 = vadd.f32 %v1491_v20, %v1463_v50 }
 0x125   : > { %v1521_v51 = vadd.f32 %v1520_v24, %v1492_v12 }
 0x127   : > { %v3043_v40 = vadd.f32 %v1549_v48, %v1521_v51 }
 0x128   : > { %v1465_v52 = vpop.f32.mrf.mxu1  ;;  %v1552_v53 = vpop.f32.mrf.mxu0 }
 0x129   : > { %v1501_v49 = vpop.f32.mrf.mxu2  ;;  %v1466_v55 = vadd.f32 %v1465_v52, %v3028_v54  ;;  %v3046_v11 = vpop.f32.mrf.mxu3 }
 0x12b   : > { %v1495_v56 = vadd.f32 %v1494_v28, %v1466_v55 }
 0x12d   : > { %v1524_v57 = vadd.f32 %v1523_v34, %v1495_v56 }
 0x130   : > { %v1467_v59 = vpop.f32.mrf.mxu1  ;;  %v1554_v60 = vpop.f32.mrf.mxu0 }
 0x131   : > { %v1600_v58 = vpop.f32.mrf.mxu2  ;;  %v1468_v63 = vadd.f32 %v1467_v59, %v1439_v1  ;;  %v1629_v2 = vpop.f32.mrf.mxu3 }
 0x133   : > { %v1497_v0 = vadd.f32 %v1496_v36, %v1468_v63 }
 0x135   : > { %v1526_v45 = vadd.f32 %v1525_v41, %v1497_v0 }
 0x138   : > { %v1470_v3 = vpop.f32.mrf.mxu1  ;;  %v1557_v4 = vpop.f32.mrf.mxu0 }
 0x139   : > { %v1602_v62 = vpop.f32.mrf.mxu2  ;;  %v1471_v5 = vadd.f32 %v1470_v3, %v1442_v9  ;;  %v1631_v19 = vpop.f32.mrf.mxu3 }
 0x13b   : > { %v1500_v6 = vadd.f32 %v1499_v46, %v1471_v5  ;;  %v1555_v46 = vadd.f32 %v1554_v60, %v1526_v45 }
 0x140   : > { %v1472_v8 = vpop.f32.mrf.mxu1  ;;  %v3048_v54 = vpop.f32.mrf.mxu0 }
 0x141   : > { %v1605_v7 = vpop.f32.mrf.mxu2  ;;  %v1473_v10 = vadd.f32 %v1472_v8, %v1444_v18  ;;  %v1634_v20 = vpop.f32.mrf.mxu3  ;;  %v1553_v18 = vadd.f32 %v1552_v53, %v1524_v57  ;;  %v1529_v53 = vadd.f32 %v1528_v27, %v1500_v6 }
 0x143   : > { %v1502_v13 = vadd.f32 %v1501_v49, %v1473_v10  ;;  %v1558_v60 = vadd.f32 %v1557_v4, %v1529_v53 }
 0x145   : > { %v1531_v27 = vadd.f32 %v3046_v11, %v1502_v13  ;;  %v2556_v11 = vld [vmem:[%s3075_s2] ss:$0 sm:$0xff] }
 0x148   : > { %v1571_v14 = vpop.f32.mrf.mxu1  ;;  %v1658_v15 = vpop.f32.mrf.mxu0 }
 0x149   : > { %v1607_v1 = vpop.f32.mrf.mxu2  ;;  %v1636_v31 = vpop.f32.mrf.mxu3  ;;  %v1572_v28 = vadd.f32 %v1571_v14, %v3036_v26  ;;  %v1560_v14 = vadd.f32 %v3048_v54, %v1531_v27 }
 0x14b   : > { %v1601_v29 = vadd.f32 %v1600_v58, %v1572_v28 }
 0x14d   : > { %v1630_v34 = vadd.f32 %v1629_v2, %v1601_v29 }
 0x14f   : > { %v1659_v61 = vadd.f32 %v1658_v15, %v1630_v34 }
 0x150   : > { %v1573_v16 = vpop.f32.mrf.mxu1  ;;  %v1660_v17 = vpop.f32.mrf.mxu0 }
 0x151   : > { %v1610_v21 = vpop.f32.mrf.mxu2  ;;  %v1639_v30 = vpop.f32.mrf.mxu3  ;;  %v1574_v32 = vadd.f32 %v1573_v16, %v1545_v35  ;;  %v1678_v26 = vsel %vm1288_vm0, %v1659_v61, -inf }
 0x153   : > { %v1603_v42 = vadd.f32 %v1602_v62, %v1574_v32 }
 0x155   : > { %v1632_v47 = vadd.f32 %v1631_v19, %v1603_v42 }
 0x157   : > { %v1661_v56 = vadd.f32 %v1660_v17, %v1632_v47 }
 0x158   : > { %v1576_v22 = vpop.f32.mrf.mxu1  ;;  %v1663_v23 = vpop.f32.mrf.mxu0 }
 0x159   : > { %v1612_v9 = vpop.f32.mrf.mxu2  ;;  %v1641_v48 = vpop.f32.mrf.mxu3  ;;  %v1577_v12 = vadd.f32 %v1576_v22, %v3040_v44  ;;  %v1685_v0 = vsel %vm1288_vm0, %v1661_v56, -inf }
 0x15b   : > { %v1606_v58 = vadd.f32 %v1605_v7, %v1577_v12 }
 0x15d   : > { %v1635_v62 = vadd.f32 %v1634_v20, %v1606_v58 }
 0x15f   : > { %v1664_v19 = vadd.f32 %v1663_v23, %v1635_v62 }
 0x160   : > { %v1578_v24 = vpop.f32.mrf.mxu1  ;;  %v1665_v25 = vpop.f32.mrf.mxu0 }
 0x161   : > { %v1615_v39 = vpop.f32.mrf.mxu2  ;;  %v1579_v3 = vadd.f32 %v1578_v24, %v3043_v40  ;;  %v1644_v2 = vpop.f32.mrf.mxu3  ;;  %v1679_v17 = vsel %vm1288_vm0, %v1664_v19, -inf }
 0x163   : > { %v1608_v7 = vadd.f32 %v1607_v1, %v1579_v3 }
 0x165   : > { %v1637_v40 = vadd.f32 %v1636_v31, %v1608_v7 }
 0x168   : > { %v1581_v33 = vpop.f32.mrf.mxu1  ;;  %v1668_v37 = vpop.f32.mrf.mxu0 }
 0x169   : > { %v1582_v36 = vadd.f32 %v1581_v33, %v1553_v18  ;;  %v1617_v49 = vpop.f32.mrf.mxu2  ;;  %v1646_v1 = vpop.f32.mrf.mxu3 }
 0x16b   : > { %v1611_v38 = vadd.f32 %v1610_v21, %v1582_v36 }
 0x16d   : > { %v1640_v43 = vadd.f32 %v1639_v30, %v1611_v38 }
 0x16f   : > { %v1669_v41 = vadd.f32 %v1668_v37, %v1640_v43 }
 0x170   : > { %v1583_v50 = vpop.f32.mrf.mxu1  ;;  %v1670_v57 = vpop.f32.mrf.mxu0 }
 0x171   : > { %v1680_v35 = vsel %vm1288_vm0, %v1669_v41, -inf  ;;  %v1584_v51 = vadd.f32 %v1583_v50, %v1555_v46  ;;  %v1673_v10 = vpop.f32.mrf.mxu2 }
 0x172   : > { %v1681_v52 = vmax.f32 %v1678_v26, %v1680_v35 }
 0x173   : > { %v1613_v55 = vadd.f32 %v1612_v9, %v1584_v51  ;;  %v1666_v9 = vadd.f32 %v1665_v25, %v1637_v40 }
 0x175   : > { %v1642_v59 = vadd.f32 %v1641_v48, %v1613_v55  ;;  %v1686_v31 = vsel %vm1288_vm0, %v1666_v9, -inf }
 0x177   : > { %v1671_v63 = vadd.f32 %v1670_v57, %v1642_v59 }
 0x178   : > { %v1586_v45 = vpop.f32.mrf.mxu1 }
 0x179   : > { %v1687_v44 = vsel %vm1288_vm0, %v1671_v63, -inf  ;;  %v1587_v5 = vadd.f32 %v1586_v45, %v1558_v60  ;;  %v1675_v28 = vpop.f32.mrf.mxu2 }
 0x17a   : > { %v1688_v8 = vmax.f32 %v1685_v0, %v1687_v44 }
 0x17b   : > { %v1616_v6 = vadd.f32 %v1615_v39, %v1587_v5 }
 0x17d   : > { %v1645_v4 = vadd.f32 %v1644_v2, %v1616_v6 }
 0x17f   : > { %v1674_v15 = vadd.f32 %v1673_v10, %v1645_v4 }
 0x180   : > { %v1588_v16 = vpop.f32.mrf.mxu1 }
 0x181   : > { %v1682_v20 = vsel %vm1288_vm0, %v1674_v15, -inf  ;;  %v1589_v21 = vadd.f32 %v1588_v16, %v1560_v14 }
 0x182   : > { %v1683_v22 = vmax.f32 %v1679_v17, %v1682_v20 }
 0x183   : > { %v1618_v13 = vadd.f32 %v1617_v49, %v1589_v21 }
 0x184   : > { %v1684_v23 = vmax.f32 %v1681_v52, %v1683_v22 }
 0x185   : > { %v1647_v24 = vadd.f32 %v1646_v1, %v1618_v13 }
 0x186   : > { %v1696_v54 = vadd.f32 %v2556_v11, %v1684_v23 }
 0x187   : > { %v1676_v29 = vadd.f32 %v1675_v28, %v1647_v24 }
 0x188   : > { %v1698_v30 = vmax.f32 %v1696_v54, 0.0 }
 0x189   : > { %v1689_v18 = vsel %vm1288_vm0, %v1676_v29, -inf }
 0x18a   : > { %v1700_v32 = vpack.c.bf16 %v1698_v30, %v1698_v30  ;;  %v1690_v39 = vmax.f32 %v1686_v31, %v1689_v18 }
 0x18c   : > { %1703 = vst.msk [vmem:[%s170_s28] sm:$0xf] %vm1702_vm1, %v1700_v32  ;;  %v1691_v33 = vmax.f32 %v1688_v8, %v1690_v39 }
 0x18e   : > { %v1697_v25 = vadd.f32 %v2556_v11, %v1691_v33 }
 0x190   : > { %v1699_v34 = vmax.f32 %v1697_v25, 0.0 }
 0x192   : > { %v1701_v36 = vpack.c.bf16 %v1699_v34, %v1699_v34 }
 0x194   : > { %1704 = vst.msk [vmem:[%s170_s28 + $0x4] sm:$0xf] %vm1702_vm1, %v1701_v36 }
 0x195 PF: > { %s13_s12 = sadd.s32 1, %s2563_s12  }
 0x196   : > { %p10_p4 = scmp.ge.s32.totalorder %s13_s12, 4  }
 0x198   :  { %12 = sbr.rel (!%p10_p4) target bundleno = 1 (0x1), region = 62 }

</bundles_post_ra>
